<compile_context>
chip_gen: v7x
topology: tpu7x:2x2x1
jax: 0.10.0
libtpu: 0.0.40
codegen_flags: <defaults>
</compile_context>

<pallas_src>
import jax
import jax.numpy as jnp
from jax.experimental import pallas as pl
from jax.experimental.pallas import tpu as pltpu


def _leaky_relu(h, slope=0.2):
    return jnp.where(h >= 0, h, slope * h)


def _round_up(n, m):
    return ((n + m - 1) // m) * m


# ---------------------------------------------------------------------------
# Kernel
# ---------------------------------------------------------------------------
def discriminator_kernel(x_ref,
                         w1_ref, b1_ref,
                         w2_ref, b2_ref,
                         w3_ref, b3_ref,
                         w4_ref, b4_ref,
                         o_ref):
    x = x_ref[...]
    if x.dtype != jnp.bfloat16:          # no-op when the caller already feeds bf16
        x = x.astype(jnp.bfloat16)

    # Three bf16 MXU matmuls with f32 accumulation + VPU bias / LeakyReLU.
    h = jnp.dot(x, w1_ref[...], preferred_element_type=jnp.float32) + b1_ref[...]
    h = _leaky_relu(h)

    h = jnp.dot(h.astype(jnp.bfloat16), w2_ref[...],
                preferred_element_type=jnp.float32) + b2_ref[...]
    h = _leaky_relu(h)

    h = jnp.dot(h.astype(jnp.bfloat16), w3_ref[...],
                preferred_element_type=jnp.float32) + b3_ref[...]
    h = _leaky_relu(h)                                    # (TB, 128) f32

    # Final Linear(128 -> 1) on VPU/XLU, stored lane-dense:
    # transpose -> (128, TB), multiply by the (128, 1) weight column,
    # sublane-reduce -> (1, TB), add the SMEM scalar bias.
    ht = jnp.transpose(h)                                 # XLU transpose
    out_row = jnp.sum(ht * w4_ref[...], axis=0, keepdims=True) + b4_ref[0]
    o_ref[0] = out_row.astype(o_ref.dtype)                # (1, TB) lane-dense store


# ---------------------------------------------------------------------------
# Tiling / VMEM budgeting
# ---------------------------------------------------------------------------
_VMEM_SIZING_BUDGET = 40 * 1024 * 1024   # conservative footprint target (v7x-safe)
_VMEM_LIMIT_BYTES = 48 * 1024 * 1024     # scoped-VMEM limit handed to the compiler
_TB_MAX = 2048                           # diminishing returns past this tile size


def _choose_batch_tile(B, D, H1, H2, H3, x_itemsize):
    """VMEM-budget-aware batch tile.  Minimises padding waste and keeps both
    TensorCores busy on v7x for reasonably sized batches."""
    # Resident (single-buffered) params: bf16 weights + f32 biases + w4 column + b4.
    weight_bytes = 2 * (D * H1 + H1 * H2 + H2 * H3) + 4 * (H1 + H2 + 2 * H3 + 1)
    # Per batch-row: double-buffered x tile + double-buffered lane-dense output
    # + live f32 intermediates (h1, h2, h3 and the transposed final tile).
    per_row = 2 * D * x_itemsize + 2 * 4 + 4 * (H1 + H2 + 2 * H3)
    avail = max(_VMEM_SIZING_BUDGET - weight_bytes, 16 * per_row)
    tb_cap = max(8, min(_TB_MAX, (avail // per_row) // 8 * 8))

    num_tiles = pl.cdiv(B, tb_cap)
    if B >= 16:
        num_tiles = max(num_tiles, 2)     # both TCs get a tile (v7x megacore)
    TB = _round_up(pl.cdiv(B, num_tiles), 8)
    return TB, num_tiles


def _prepare_params(params):
    """bf16 weights for the three big layers; w4 as a (128, 1) f32 column; b4 as (1,)."""
    (w1, b1), (w2, b2), (w3, b3), (w4, b4) = params
    return (w1.astype(jnp.bfloat16), b1.reshape(1, -1).astype(jnp.float32),
            w2.astype(jnp.bfloat16), b2.reshape(1, -1).astype(jnp.float32),
            w3.astype(jnp.bfloat16), b3.reshape(1, -1).astype(jnp.float32),
            w4.reshape(-1, 1).astype(jnp.float32),
            b4.reshape(-1).astype(jnp.float32))


def _build_forward(TB, num_tiles, D, H1, H2, H3, single_buffer_weights):
    # Constant-index weight specs stay resident in VMEM across the whole grid;
    # single-buffer them (multi-buffering a constant block buys nothing).
    res_kwargs = {"pipeline_mode": pl.Buffered(1)} if single_buffer_weights else {}

    def resident(s0, s1):
        return pl.BlockSpec((s0, s1), lambda i: (0, 0), **res_kwargs)

    in_specs = [
        pl.BlockSpec((TB, D), lambda i: (i, 0)),            # x tile (double-buffered)
        resident(D, H1), resident(1, H1),                   # w1 (bf16), b1
        resident(H1, H2), resident(1, H2),                  # w2 (bf16), b2
        resident(H2, H3), resident(1, H3),                  # w3 (bf16), b3
        resident(H3, 1),                                    # w4 as (128, 1) column
        pl.BlockSpec(memory_space=pltpu.MemorySpace.SMEM),  # b4 scalar in SMEM
    ]
    out_specs = pl.BlockSpec((1, 1, TB), lambda i: (i, 0, 0))  # lane-dense output rows

    return pl.pallas_call(
        discriminator_kernel,
        out_shape=jax.ShapeDtypeStruct((num_tiles, 1, TB), jnp.float32),
        grid=(num_tiles,),
        in_specs=in_specs,
        out_specs=out_specs,
        compiler_params=pltpu.CompilerParams(
            dimension_semantics=("parallel",),
            vmem_limit_bytes=_VMEM_LIMIT_BYTES,
        ),
    )


def discriminator_forward(x, params):
    """x: (B, C, H, W); bf16 preferred at the boundary (halves the HBM x-stream).
    Returns (B, 1) float32."""
    B = x.shape[0]
    D = int(x.size // B)
    x_flat = x.reshape(B, D)   # torch Flatten on NCHW (row-major)

    w1, b1, w2, b2, w3, b3, w4_col, b4 = _prepare_params(params)
    H1, H2, H3 = w1.shape[1], w2.shape[1], w3.shape[1]

    TB, num_tiles = _choose_batch_tile(B, D, H1, H2, H3, x_flat.dtype.itemsize)
    B_pad = num_tiles * TB
    if B_pad != B:
        x_flat = jnp.pad(x_flat, ((0, B_pad - B), (0, 0)))

    args = (x_flat, w1, b1, w2, b2, w3, b3, w4_col, b4)
    try:
        out = _build_forward(TB, num_tiles, D, H1, H2, H3, True)(*args)
    except Exception:
        # Fallback if this JAX build rejects pipeline_mode=pl.Buffered(1) on the
        # resident weight specs: use default double-buffering (correct, slightly
        # more VMEM).
        out = _build_forward(TB, num_tiles, D, H1, H2, H3, False)(*args)

    return out.reshape(B_pad, 1)[:B]   # drop zero-padded batch rows


# ---------------------------------------------------------------------------
# Params + references
# ---------------------------------------------------------------------------
def init_params(key, in_features):
    """Deterministic init mirroring torch.nn.Linear default (U(+/- 1/sqrt(fan_in))).
    Weights stored as (in, out) == W.T, biases as (1, out)."""
    sizes = [(in_features, 512), (512, 256), (256, 128), (128, 1)]
    params = []
    for (fan_in, fan_out) in sizes:
        key, kw, kb = jax.random.split(key, 3)
        bound = 1.0 / (fan_in ** 0.5)
        w = jax.random.uniform(kw, (fan_in, fan_out), jnp.float32, -bound, bound)
        b = jax.random.uniform(kb, (1, fan_out), jnp.float32, -bound, bound)
        params.append((w, b))
    return params


def reference_forward(x, params):
    """Pure-JAX mirror of the kernel math (bf16 x/weights, f32 accumulation)."""
    B = x.shape[0]
    w1, b1, w2, b2, w3, b3, w4_col, b4 = _prepare_params(params)
    h = x.reshape(B, -1).astype(jnp.bfloat16)
    h = _leaky_relu(jnp.dot(h, w1, preferred_element_type=jnp.float32) + b1)
    h = _leaky_relu(jnp.dot(h.astype(jnp.bfloat16), w2,
                            preferred_element_type=jnp.float32) + b2)
    h = _leaky_relu(jnp.dot(h.astype(jnp.bfloat16), w3,
                            preferred_element_type=jnp.float32) + b3)
    return jnp.dot(h, w4_col) + b4.reshape(1, 1)


def reference_forward_f32(x, params):
    """Full-f32 oracle matching the PyTorch module math."""
    (w1, b1), (w2, b2), (w3, b3), (w4, b4) = params
    B = x.shape[0]
    h = x.reshape(B, -1).astype(jnp.float32)
    h = _leaky_relu(h @ w1 + b1)
    h = _leaky_relu(h @ w2 + b2)
    h = _leaky_relu(h @ w3 + b3)
    return h @ w4 + b4


if __name__ == "__main__":
    # Small shapes consistent with the module: image_shape = (C, H, W) = (4, 16, 16)
    B, C, H, W = 2, 4, 16, 16
    in_features = C * H * W  # 1024

    key = jax.random.PRNGKey(0)
    key, kx = jax.random.split(key)
    # The critic consumes bf16 activations (upstream producer emits bf16), so the
    # dominant HBM x-stream is half-width; matmuls accumulate in f32.
    x = jax.random.normal(kx, (B, C, H, W), jnp.float32).astype(jnp.bfloat16)

    params = init_params(key, in_features)

    out = jax.block_until_ready(discriminator_forward(x, params))
    assert out.shape == (B, 1), out.shape

    # Tight check vs. a pure-JAX mirror of the kernel's own numerics.
    ref = reference_forward(x, params)
    assert jnp.allclose(out, ref, atol=5e-3, rtol=5e-3), (out, ref)

    # Loose sanity check vs. the full-f32 (PyTorch-equivalent) oracle.
    ref_f32 = reference_forward_f32(x.astype(jnp.float32), params)
    assert jnp.allclose(out, ref_f32, atol=1e-1, rtol=1e-1), (out, ref_f32)

    print("KERNEL_OK")
</pallas_src>

<mosaic_0001>
module attributes {stable_mosaic.version = 11 : i64} {
  func.func @discriminator_kernel(%arg0: i32, %arg1: memref<8x1024xbf16, #tpu.memory_space<vmem>>, %arg2: memref<1024x512xbf16, #tpu.memory_space<vmem>>, %arg3: memref<1x512xf32, #tpu.memory_space<vmem>>, %arg4: memref<512x256xbf16, #tpu.memory_space<vmem>>, %arg5: memref<1x256xf32, #tpu.memory_space<vmem>>, %arg6: memref<256x128xbf16, #tpu.memory_space<vmem>>, %arg7: memref<1x128xf32, #tpu.memory_space<vmem>>, %arg8: memref<128x1xf32, #tpu.memory_space<vmem>>, %arg9: memref<1xf32, #tpu.memory_space<smem>>, %arg10: memref<1x1x8xf32, #tpu.memory_space<vmem>>) attributes {dimension_semantics = [#tpu.dimension_semantics<parallel>], iteration_bounds = array<i64: 1>, scalar_prefetch = 0 : i64, scratch_operands = 0 : i64, tpu.core_type = #tpu.core_type<tc>, window_params = [{transform_indices = @transform_0, window_bounds = array<i64: 8, 1024>}, {pipeline_mode = #tpu.pipeline_mode<synchronous>, transform_indices = @transform_1, window_bounds = array<i64: 1024, 512>}, {pipeline_mode = #tpu.pipeline_mode<synchronous>, transform_indices = @transform_2, window_bounds = array<i64: 1, 512>}, {pipeline_mode = #tpu.pipeline_mode<synchronous>, transform_indices = @transform_3, window_bounds = array<i64: 512, 256>}, {pipeline_mode = #tpu.pipeline_mode<synchronous>, transform_indices = @transform_4, window_bounds = array<i64: 1, 256>}, {pipeline_mode = #tpu.pipeline_mode<synchronous>, transform_indices = @transform_5, window_bounds = array<i64: 256, 128>}, {pipeline_mode = #tpu.pipeline_mode<synchronous>, transform_indices = @transform_6, window_bounds = array<i64: 1, 128>}, {pipeline_mode = #tpu.pipeline_mode<synchronous>, transform_indices = @transform_7, window_bounds = array<i64: 128, 1>}, {transform_indices = @transform_8, window_bounds = array<i64: 1>}, {transform_indices = @transform_9, window_bounds = array<i64: 1, 1, 8>}]} {
    %c0 = arith.constant 0 : index
    %c0_0 = arith.constant 0 : index
    %0 = vector.load %arg1[%c0, %c0_0] : memref<8x1024xbf16, #tpu.memory_space<vmem>>, vector<8x1024xbf16>
    %c0_1 = arith.constant 0 : index
    %c0_2 = arith.constant 0 : index
    %1 = vector.load %arg2[%c0_1, %c0_2] : memref<1024x512xbf16, #tpu.memory_space<vmem>>, vector<1024x512xbf16>
    %cst = arith.constant dense<0.000000e+00> : vector<8x512xf32>
    %2 = tpu.matmul %0, %1, %cst {dimension_numbers = #tpu.dot_dimension_numbers<[1], [0], [0], [1], [0, 0, 1, 1], [], []>} : vector<8x1024xbf16>, vector<1024x512xbf16>, vector<8x512xf32> -> vector<8x512xf32>
    %c0_3 = arith.constant 0 : index
    %c0_4 = arith.constant 0 : index
    %3 = vector.load %arg3[%c0_3, %c0_4] : memref<1x512xf32, #tpu.memory_space<vmem>>, vector<1x512xf32>
    %4 = vector.broadcast %3 : vector<1x512xf32> to vector<8x512xf32>
    %5 = arith.addf %2, %4 : vector<8x512xf32>
    %cst_5 = arith.constant 0.000000e+00 : f32
    %6 = vector.broadcast %cst_5 : f32 to vector<8x512xf32>
    %7 = arith.cmpf oge, %5, %6 : vector<8x512xf32>
    %cst_6 = arith.constant 2.000000e-01 : f32
    %8 = vector.broadcast %cst_6 : f32 to vector<8x512xf32>
    %9 = arith.mulf %8, %5 : vector<8x512xf32>
    %10 = arith.select %7, %5, %9 : vector<8x512xi1>, vector<8x512xf32>
    %11 = arith.truncf %10 : vector<8x512xf32> to vector<8x512xbf16>
    %c0_7 = arith.constant 0 : index
    %c0_8 = arith.constant 0 : index
    %12 = vector.load %arg4[%c0_7, %c0_8] : memref<512x256xbf16, #tpu.memory_space<vmem>>, vector<512x256xbf16>
    %cst_9 = arith.constant dense<0.000000e+00> : vector<8x256xf32>
    %13 = tpu.matmul %11, %12, %cst_9 {dimension_numbers = #tpu.dot_dimension_numbers<[1], [0], [0], [1], [0, 0, 1, 1], [], []>} : vector<8x512xbf16>, vector<512x256xbf16>, vector<8x256xf32> -> vector<8x256xf32>
    %c0_10 = arith.constant 0 : index
    %c0_11 = arith.constant 0 : index
    %14 = vector.load %arg5[%c0_10, %c0_11] : memref<1x256xf32, #tpu.memory_space<vmem>>, vector<1x256xf32>
    %15 = vector.broadcast %14 : vector<1x256xf32> to vector<8x256xf32>
    %16 = arith.addf %13, %15 : vector<8x256xf32>
    %cst_12 = arith.constant 0.000000e+00 : f32
    %17 = vector.broadcast %cst_12 : f32 to vector<8x256xf32>
    %18 = arith.cmpf oge, %16, %17 : vector<8x256xf32>
    %cst_13 = arith.constant 2.000000e-01 : f32
    %19 = vector.broadcast %cst_13 : f32 to vector<8x256xf32>
    %20 = arith.mulf %19, %16 : vector<8x256xf32>
    %21 = arith.select %18, %16, %20 : vector<8x256xi1>, vector<8x256xf32>
    %22 = arith.truncf %21 : vector<8x256xf32> to vector<8x256xbf16>
    %c0_14 = arith.constant 0 : index
    %c0_15 = arith.constant 0 : index
    %23 = vector.load %arg6[%c0_14, %c0_15] : memref<256x128xbf16, #tpu.memory_space<vmem>>, vector<256x128xbf16>
    %cst_16 = arith.constant dense<0.000000e+00> : vector<8x128xf32>
    %24 = tpu.matmul %22, %23, %cst_16 {dimension_numbers = #tpu.dot_dimension_numbers<[1], [0], [0], [1], [0, 0, 1, 1], [], []>} : vector<8x256xbf16>, vector<256x128xbf16>, vector<8x128xf32> -> vector<8x128xf32>
    %c0_17 = arith.constant 0 : index
    %c0_18 = arith.constant 0 : index
    %25 = vector.load %arg7[%c0_17, %c0_18] : memref<1x128xf32, #tpu.memory_space<vmem>>, vector<1x128xf32>
    %26 = vector.broadcast %25 : vector<1x128xf32> to vector<8x128xf32>
    %27 = arith.addf %24, %26 : vector<8x128xf32>
    %cst_19 = arith.constant 0.000000e+00 : f32
    %28 = vector.broadcast %cst_19 : f32 to vector<8x128xf32>
    %29 = arith.cmpf oge, %27, %28 : vector<8x128xf32>
    %cst_20 = arith.constant 2.000000e-01 : f32
    %30 = vector.broadcast %cst_20 : f32 to vector<8x128xf32>
    %31 = arith.mulf %30, %27 : vector<8x128xf32>
    %32 = arith.select %29, %27, %31 : vector<8x128xi1>, vector<8x128xf32>
    %33 = tpu.transpose %32, [1, 0] : vector<8x128xf32> -> vector<128x8xf32>
    %c0_21 = arith.constant 0 : index
    %c0_22 = arith.constant 0 : index
    %34 = vector.load %arg8[%c0_21, %c0_22] : memref<128x1xf32, #tpu.memory_space<vmem>>, vector<128x1xf32>
    %35 = vector.broadcast %34 : vector<128x1xf32> to vector<128x8xf32>
    %36 = arith.mulf %33, %35 : vector<128x8xf32>
    %cst_23 = arith.constant dense<0.000000e+00> : vector<8xf32>
    %37 = vector.multi_reduction <add>, %36, %cst_23 [0] : vector<128x8xf32> to vector<8xf32>
    %38 = vector.shape_cast %37 : vector<8xf32> to vector<1x8xf32>
    %c0_24 = arith.constant 0 : index
    %39 = memref.load %arg9[%c0_24] : memref<1xf32, #tpu.memory_space<smem>>
    %40 = vector.broadcast %39 : f32 to vector<1x8xf32>
    %41 = arith.addf %38, %40 : vector<1x8xf32>
    %c0_25 = arith.constant 0 : index
    %c0_26 = arith.constant 0 : index
    %c0_27 = arith.constant 0 : index
    %42 = vector.load %arg10[%c0_25, %c0_26, %c0_27] : memref<1x1x8xf32, #tpu.memory_space<vmem>>, vector<1x1x8xf32>
    %43 = vector.shape_cast %42 : vector<1x1x8xf32> to vector<1x8xf32>
    %44 = vector.shape_cast %41 : vector<1x8xf32> to vector<1x1x8xf32>
    tpu.vector_store %arg10[%c0_25, %c0_26, %c0_27], %44 {strides = array<i32>} : memref<1x1x8xf32, #tpu.memory_space<vmem>>, vector<1x1x8xf32>,
    return
  }
  func.func @transform_0(%arg0: i32) -> (i32, i32) {
    %c0_i32 = arith.constant 0 : i32
    %c0_i32_0 = arith.constant 0 : i32
    return %arg0, %c0_i32 : i32, i32
  }
  func.func @transform_1(%arg0: i32) -> (i32, i32) {
    %c0_i32 = arith.constant 0 : i32
    %c0_i32_0 = arith.constant 0 : i32
    %c0_i32_1 = arith.constant 0 : i32
    return %c0_i32, %c0_i32_0 : i32, i32
  }
  func.func @transform_2(%arg0: i32) -> (i32, i32) {
    %c0_i32 = arith.constant 0 : i32
    %c0_i32_0 = arith.constant 0 : i32
    %c0_i32_1 = arith.constant 0 : i32
    return %c0_i32, %c0_i32_0 : i32, i32
  }
  func.func @transform_3(%arg0: i32) -> (i32, i32) {
    %c0_i32 = arith.constant 0 : i32
    %c0_i32_0 = arith.constant 0 : i32
    %c0_i32_1 = arith.constant 0 : i32
    return %c0_i32, %c0_i32_0 : i32, i32
  }
  func.func @transform_4(%arg0: i32) -> (i32, i32) {
    %c0_i32 = arith.constant 0 : i32
    %c0_i32_0 = arith.constant 0 : i32
    %c0_i32_1 = arith.constant 0 : i32
    return %c0_i32, %c0_i32_0 : i32, i32
  }
  func.func @transform_5(%arg0: i32) -> (i32, i32) {
    %c0_i32 = arith.constant 0 : i32
    %c0_i32_0 = arith.constant 0 : i32
    %c0_i32_1 = arith.constant 0 : i32
    return %c0_i32, %c0_i32_0 : i32, i32
  }
  func.func @transform_6(%arg0: i32) -> (i32, i32) {
    %c0_i32 = arith.constant 0 : i32
    %c0_i32_0 = arith.constant 0 : i32
    %c0_i32_1 = arith.constant 0 : i32
    return %c0_i32, %c0_i32_0 : i32, i32
  }
  func.func @transform_7(%arg0: i32) -> (i32, i32) {
    %c0_i32 = arith.constant 0 : i32
    %c0_i32_0 = arith.constant 0 : i32
    %c0_i32_1 = arith.constant 0 : i32
    return %c0_i32, %c0_i32_0 : i32, i32
  }
  func.func @transform_8(%arg0: i32) -> i32 {
    %c0_i32 = arith.constant 0 : i32
    %c0_i32_0 = arith.constant 0 : i32
    return %c0_i32 : i32
  }
  func.func @transform_9(%arg0: i32) -> (i32, i32, i32) {
    %c0_i32 = arith.constant 0 : i32
    %c0_i32_0 = arith.constant 0 : i32
    %c0_i32_1 = arith.constant 0 : i32
    return %arg0, %c0_i32, %c0_i32_0 : i32, i32, i32
  }
}

module attributes {stable_mosaic.version = 11 : i64} {
  func.func @discriminator_kernel(%arg0: i32, %arg1: memref<8x1024xbf16, #tpu.memory_space<vmem>>, %arg2: memref<1024x512xbf16, #tpu.memory_space<vmem>>, %arg3: memref<1x512xf32, #tpu.memory_space<vmem>>, %arg4: memref<512x256xbf16, #tpu.memory_space<vmem>>, %arg5: memref<1x256xf32, #tpu.memory_space<vmem>>, %arg6: memref<256x128xbf16, #tpu.memory_space<vmem>>, %arg7: memref<1x128xf32, #tpu.memory_space<vmem>>, %arg8: memref<128x1xf32, #tpu.memory_space<vmem>>, %arg9: memref<1xf32, #tpu.memory_space<smem>>, %arg10: memref<1x1x8xf32, #tpu.memory_space<vmem>>) attributes {dimension_semantics = [#tpu.dimension_semantics<parallel>], iteration_bounds = array<i64: 1>, scalar_prefetch = 0 : i64, scratch_operands = 0 : i64, tpu.core_type = #tpu.core_type<tc>, window_params = [{transform_indices = @transform_0, window_bounds = array<i64: 8, 1024>}, {pipeline_mode = #tpu.pipeline_mode<synchronous>, transform_indices = @transform_1, window_bounds = array<i64: 1024, 512>}, {pipeline_mode = #tpu.pipeline_mode<synchronous>, transform_indices = @transform_2, window_bounds = array<i64: 1, 512>}, {pipeline_mode = #tpu.pipeline_mode<synchronous>, transform_indices = @transform_3, window_bounds = array<i64: 512, 256>}, {pipeline_mode = #tpu.pipeline_mode<synchronous>, transform_indices = @transform_4, window_bounds = array<i64: 1, 256>}, {pipeline_mode = #tpu.pipeline_mode<synchronous>, transform_indices = @transform_5, window_bounds = array<i64: 256, 128>}, {pipeline_mode = #tpu.pipeline_mode<synchronous>, transform_indices = @transform_6, window_bounds = array<i64: 1, 128>}, {pipeline_mode = #tpu.pipeline_mode<synchronous>, transform_indices = @transform_7, window_bounds = array<i64: 128, 1>}, {transform_indices = @transform_8, window_bounds = array<i64: 1>}, {transform_indices = @transform_9, window_bounds = array<i64: 1, 1, 8>}]} {
    %c0 = arith.constant 0 : index
    %c0_0 = arith.constant 0 : index
    %0 = vector.load %arg1[%c0, %c0_0] : memref<8x1024xbf16, #tpu.memory_space<vmem>>, vector<8x1024xbf16>
    %c0_1 = arith.constant 0 : index
    %c0_2 = arith.constant 0 : index
    %1 = vector.load %arg2[%c0_1, %c0_2] : memref<1024x512xbf16, #tpu.memory_space<vmem>>, vector<1024x512xbf16>
    %cst = arith.constant dense<0.000000e+00> : vector<8x512xf32>
    %2 = tpu.matmul %0, %1, %cst {dimension_numbers = #tpu.dot_dimension_numbers<[1], [0], [0], [1], [0, 0, 1, 1], [], []>} : vector<8x1024xbf16>, vector<1024x512xbf16>, vector<8x512xf32> -> vector<8x512xf32>
    %c0_3 = arith.constant 0 : index
    %c0_4 = arith.constant 0 : index
    %3 = vector.load %arg3[%c0_3, %c0_4] : memref<1x512xf32, #tpu.memory_space<vmem>>, vector<1x512xf32>
    %4 = vector.broadcast %3 : vector<1x512xf32> to vector<8x512xf32>
    %5 = arith.addf %2, %4 : vector<8x512xf32>
    %cst_5 = arith.constant 0.000000e+00 : f32
    %6 = vector.broadcast %cst_5 : f32 to vector<8x512xf32>
    %7 = arith.cmpf oge, %5, %6 : vector<8x512xf32>
    %cst_6 = arith.constant 2.000000e-01 : f32
    %8 = vector.broadcast %cst_6 : f32 to vector<8x512xf32>
    %9 = arith.mulf %8, %5 : vector<8x512xf32>
    %10 = arith.select %7, %5, %9 : vector<8x512xi1>, vector<8x512xf32>
    %11 = arith.truncf %10 : vector<8x512xf32> to vector<8x512xbf16>
    %c0_7 = arith.constant 0 : index
    %c0_8 = arith.constant 0 : index
    %12 = vector.load %arg4[%c0_7, %c0_8] : memref<512x256xbf16, #tpu.memory_space<vmem>>, vector<512x256xbf16>
    %cst_9 = arith.constant dense<0.000000e+00> : vector<8x256xf32>
    %13 = tpu.matmul %11, %12, %cst_9 {dimension_numbers = #tpu.dot_dimension_numbers<[1], [0], [0], [1], [0, 0, 1, 1], [], []>} : vector<8x512xbf16>, vector<512x256xbf16>, vector<8x256xf32> -> vector<8x256xf32>
    %c0_10 = arith.constant 0 : index
    %c0_11 = arith.constant 0 : index
    %14 = vector.load %arg5[%c0_10, %c0_11] : memref<1x256xf32, #tpu.memory_space<vmem>>, vector<1x256xf32>
    %15 = vector.broadcast %14 : vector<1x256xf32> to vector<8x256xf32>
    %16 = arith.addf %13, %15 : vector<8x256xf32>
    %cst_12 = arith.constant 0.000000e+00 : f32
    %17 = vector.broadcast %cst_12 : f32 to vector<8x256xf32>
    %18 = arith.cmpf oge, %16, %17 : vector<8x256xf32>
    %cst_13 = arith.constant 2.000000e-01 : f32
    %19 = vector.broadcast %cst_13 : f32 to vector<8x256xf32>
    %20 = arith.mulf %19, %16 : vector<8x256xf32>
    %21 = arith.select %18, %16, %20 : vector<8x256xi1>, vector<8x256xf32>
    %22 = arith.truncf %21 : vector<8x256xf32> to vector<8x256xbf16>
    %c0_14 = arith.constant 0 : index
    %c0_15 = arith.constant 0 : index
    %23 = vector.load %arg6[%c0_14, %c0_15] : memref<256x128xbf16, #tpu.memory_space<vmem>>, vector<256x128xbf16>
    %cst_16 = arith.constant dense<0.000000e+00> : vector<8x128xf32>
    %24 = tpu.matmul %22, %23, %cst_16 {dimension_numbers = #tpu.dot_dimension_numbers<[1], [0], [0], [1], [0, 0, 1, 1], [], []>} : vector<8x256xbf16>, vector<256x128xbf16>, vector<8x128xf32> -> vector<8x128xf32>
    %c0_17 = arith.constant 0 : index
    %c0_18 = arith.constant 0 : index
    %25 = vector.load %arg7[%c0_17, %c0_18] : memref<1x128xf32, #tpu.memory_space<vmem>>, vector<1x128xf32>
    %26 = vector.broadcast %25 : vector<1x128xf32> to vector<8x128xf32>
    %27 = arith.addf %24, %26 : vector<8x128xf32>
    %cst_19 = arith.constant 0.000000e+00 : f32
    %28 = vector.broadcast %cst_19 : f32 to vector<8x128xf32>
    %29 = arith.cmpf oge, %27, %28 : vector<8x128xf32>
    %cst_20 = arith.constant 2.000000e-01 : f32
    %30 = vector.broadcast %cst_20 : f32 to vector<8x128xf32>
    %31 = arith.mulf %30, %27 : vector<8x128xf32>
    %32 = arith.select %29, %27, %31 : vector<8x128xi1>, vector<8x128xf32>
    %33 = tpu.transpose %32, [1, 0] : vector<8x128xf32> -> vector<128x8xf32>
    %c0_21 = arith.constant 0 : index
    %c0_22 = arith.constant 0 : index
    %34 = vector.load %arg8[%c0_21, %c0_22] : memref<128x1xf32, #tpu.memory_space<vmem>>, vector<128x1xf32>
    %35 = vector.broadcast %34 : vector<128x1xf32> to vector<128x8xf32>
    %36 = arith.mulf %33, %35 : vector<128x8xf32>
    %cst_23 = arith.constant dense<0.000000e+00> : vector<8xf32>
    %37 = vector.multi_reduction <add>, %36, %cst_23 [0] : vector<128x8xf32> to vector<8xf32>
    %38 = vector.shape_cast %37 : vector<8xf32> to vector<1x8xf32>
    %c0_24 = arith.constant 0 : index
    %39 = memref.load %arg9[%c0_24] : memref<1xf32, #tpu.memory_space<smem>>
    %40 = vector.broadcast %39 : f32 to vector<1x8xf32>
    %41 = arith.addf %38, %40 : vector<1x8xf32>
    %c0_25 = arith.constant 0 : index
    %c0_26 = arith.constant 0 : index
    %c0_27 = arith.constant 0 : index
    %42 = vector.load %arg10[%c0_25, %c0_26, %c0_27] : memref<1x1x8xf32, #tpu.memory_space<vmem>>, vector<1x1x8xf32>
    %43 = vector.shape_cast %42 : vector<1x1x8xf32> to vector<1x8xf32>
    %44 = vector.shape_cast %41 : vector<1x8xf32> to vector<1x1x8xf32>
    tpu.vector_store %arg10[%c0_25, %c0_26, %c0_27], %44 {strides = array<i32>} : memref<1x1x8xf32, #tpu.memory_space<vmem>>, vector<1x1x8xf32>,
    return
  }
  func.func @transform_0(%arg0: i32) -> (i32, i32) {
    %c0_i32 = arith.constant 0 : i32
    %c0_i32_0 = arith.constant 0 : i32
    return %arg0, %c0_i32 : i32, i32
  }
  func.func @transform_1(%arg0: i32) -> (i32, i32) {
    %c0_i32 = arith.constant 0 : i32
    %c0_i32_0 = arith.constant 0 : i32
    %c0_i32_1 = arith.constant 0 : i32
    return %c0_i32, %c0_i32_0 : i32, i32
  }
  func.func @transform_2(%arg0: i32) -> (i32, i32) {
    %c0_i32 = arith.constant 0 : i32
    %c0_i32_0 = arith.constant 0 : i32
    %c0_i32_1 = arith.constant 0 : i32
    return %c0_i32, %c0_i32_0 : i32, i32
  }
  func.func @transform_3(%arg0: i32) -> (i32, i32) {
    %c0_i32 = arith.constant 0 : i32
    %c0_i32_0 = arith.constant 0 : i32
    %c0_i32_1 = arith.constant 0 : i32
    return %c0_i32, %c0_i32_0 : i32, i32
  }
  func.func @transform_4(%arg0: i32) -> (i32, i32) {
    %c0_i32 = arith.constant 0 : i32
    %c0_i32_0 = arith.constant 0 : i32
    %c0_i32_1 = arith.constant 0 : i32
    return %c0_i32, %c0_i32_0 : i32, i32
  }
  func.func @transform_5(%arg0: i32) -> (i32, i32) {
    %c0_i32 = arith.constant 0 : i32
    %c0_i32_0 = arith.constant 0 : i32
    %c0_i32_1 = arith.constant 0 : i32
    return %c0_i32, %c0_i32_0 : i32, i32
  }
  func.func @transform_6(%arg0: i32) -> (i32, i32) {
    %c0_i32 = arith.constant 0 : i32
    %c0_i32_0 = arith.constant 0 : i32
    %c0_i32_1 = arith.constant 0 : i32
    return %c0_i32, %c0_i32_0 : i32, i32
  }
  func.func @transform_7(%arg0: i32) -> (i32, i32) {
    %c0_i32 = arith.constant 0 : i32
    %c0_i32_0 = arith.constant 0 : i32
    %c0_i32_1 = arith.constant 0 : i32
    return %c0_i32, %c0_i32_0 : i32, i32
  }
  func.func @transform_8(%arg0: i32) -> i32 {
    %c0_i32 = arith.constant 0 : i32
    %c0_i32_0 = arith.constant 0 : i32
    return %c0_i32 : i32
  }
  func.func @transform_9(%arg0: i32) -> (i32, i32, i32) {
    %c0_i32 = arith.constant 0 : i32
    %c0_i32_0 = arith.constant 0 : i32
    %c0_i32_1 = arith.constant 0 : i32
    return %arg0, %c0_i32, %c0_i32_0 : i32, i32, i32
  }
}

</mosaic_0001>

<bundles_post_ra>
// kernel: tpu_custom_call.1
= control target key start
LH: loop header
LB: loop body
LE: loop exit
PB: predicated region body
PF: predicated region fallthrough
CT: control target
= control target key end

     0   :  { %15 = vsyncpa [#allocation4], 0  ;;  %s4179_s0 = inlined_call_operand.hbm [shape: bf16[8,1024], index: 0, kind: input, shape index: {}]   ;;  %s4180_s1 = inlined_call_operand.hbm [shape: bf16[1024,512], index: 1, kind: input, shape index: {}]   ;;  %s4181_s2 = inlined_call_operand.vmem [shape: f32[1,512], index: 2, kind: input, shape index: {}]   ;;  %s4182_s3 = inlined_call_operand.hbm [shape: bf16[512,256], index: 3, kind: input, shape index: {}]   ;;  %s4183_s4 = inlined_call_operand.vmem [shape: f32[1,256], index: 4, kind: input, shape index: {}]   ;;  %s4184_s5 = inlined_call_operand.vmem [shape: bf16[256,128], index: 5, kind: input, shape index: {}]   ;;  %s4185_s6 = inlined_call_operand.vmem [shape: f32[1,128], index: 6, kind: input, shape index: {}]   ;;  %s4186_s7 = inlined_call_operand.vmem [shape: f32[128,1], index: 7, kind: input, shape index: {}]   ;;  %s4187_s8 = inlined_call_operand.<no memory space> [shape: f32[1], index: 8, kind: input, shape index: {}]   ;;  %s4188_s9 = inlined_call_operand.hbm [shape: f32[1,1,8], index: 9, kind: output, shape index: {}]  }
   0x1   :  { %16 = vsyncpa [#allocation7], 0 }
   0x2   :  { %17 = vsyncpa [#allocation5], 0  ;;  %s3884_s30 = smov [#allocation6]   ;;  %s3790_s13 = scalar_lea.hbm %s4180_s1, 32768 }
   0x3   :  { %s33_s10 = sshll.u32 %s3884_s30, 4  ;;  %p3791_p0 = scmp.ne.s32.totalorder %s4180_s1, %s3790_s13  ;;  %s34_s10 = int_to_ptr.vmem [resolvable:$true] %s33_s10 }
   0x4   :  { %p3794_p1 = scmp.lt.u32.totalorder %s3790_s13, %s4180_s1 }
   0x6   :  { %p3796_p2 = pnand %p3794_p1, %p3791_p0 }
   0x8   :  { %3799 = shalt.err (!%p3796_p2)
}
   0x9   :  { %s3800_s18 = scalar_lea.vmem %s34_s10, 32768  ;;  %p3805_p4 = scmp.lt.s32.totalorder %s34_s10, %s34_s10 }
   0xa   :  { %p3801_p3 = scmp.ne.s32.totalorder %s34_s10, %s3800_s18  ;;  %p3806_p5 = scmp.lt.s32.totalorder %s3800_s18, %s3800_s18 }
   0xc   :  { %p3807_p6 = por %p3806_p5, %p3805_p4 }
   0xe   :  { %p3808_p7 = pnand %p3807_p6, %p3801_p3 }
  0x10   :  { %3811 = shalt.err (!%p3808_p7)
}
  0x11   :  { %s3885_s19 = smov 256   ;;  %s3886_s20 = smov 16  }
  0x12   :  { %39 = dma.hbm_to_vmem [thread:$0]  %s4180_s1, 32768, %s34_s10, [#allocation7], %s3885_s19, %s3885_s19, %s3886_s20  }
  0x13   :  { %s3887_s23 = smov [#allocation3]   ;;  %s3888_s25 = smov [#allocation8]  }
  0x14   :  { %s24_s24 = sshll.u32 %s3887_s23, 4  ;;  %s47_s26 = sshll.u32 %s3888_s25, 4  ;;  %s25_s24 = int_to_ptr.vmem [resolvable:$true] %s24_s24  ;;  %s48_s26 = int_to_ptr.vmem [resolvable:$true] %s47_s26 }
  0x15   :  { %s3812_s29 = scalar_lea.hbm %s4179_s0, 512 }
  0x16   :  { %p3813_p8 = scmp.ne.s32.totalorder %s4179_s0, %s3812_s29  ;;  %p3816_p9 = scmp.lt.u32.totalorder %s3812_s29, %s4179_s0 }
  0x18   :  { %p3818_p10 = pnand %p3816_p9, %p3813_p8 }
  0x1a   :  { %3821 = shalt.err (!%p3818_p10)
}
  0x1b   :  { %s3822_s1 = scalar_lea.vmem %s25_s24, 512  ;;  %p3827_p12 = scmp.lt.s32.totalorder %s25_s24, %s25_s24 }
  0x1c   :  { %p3823_p11 = scmp.ne.s32.totalorder %s25_s24, %s3822_s1  ;;  %p3828_p13 = scmp.lt.s32.totalorder %s3822_s1, %s3822_s1 }
  0x1e   :  { %p3829_p0 = por %p3828_p13, %p3827_p12 }
  0x20   :  { %p3830_p1 = pnand %p3829_p0, %p3823_p11 }
  0x22   :  { %3833 = shalt.err (!%p3830_p1)
}
  0x23   :  { %27 = dma.hbm_to_vmem [thread:$0]  %s4179_s0, 512, %s25_s24, [#allocation4]  }
  0x24   :  { %s3834_s17 = scalar_lea.hbm %s4182_s3, 8192 }
  0x25   :  { %p3835_p2 = scmp.ne.s32.totalorder %s4182_s3, %s3834_s17  ;;  %p3838_p3 = scmp.lt.u32.totalorder %s3834_s17, %s4182_s3 }
  0x27   :  { %p3840_p4 = pnand %p3838_p3, %p3835_p2 }
  0x29   :  { %3843 = shalt.err (!%p3840_p4)
}
  0x2a   :  { %s3844_s22 = scalar_lea.vmem %s48_s26, 8192  ;;  %p3849_p6 = scmp.lt.s32.totalorder %s48_s26, %s48_s26 }
  0x2b   :  { %p3845_p5 = scmp.ne.s32.totalorder %s48_s26, %s3844_s22  ;;  %p3850_p7 = scmp.lt.s32.totalorder %s3844_s22, %s3844_s22 }
  0x2d   :  { %p3851_p8 = por %p3850_p7, %p3849_p6 }
  0x2f   :  { %p3852_p9 = pnand %p3851_p8, %p3845_p5 }
  0x31   :  { %3855 = shalt.err (!%p3852_p9)
}
  0x32   :  { %s3889_s0 = smov 128   ;;  %s3890_s23 = smov 8  }
  0x33   :  { %53 = dma.hbm_to_vmem [thread:$0]  %s4182_s3, 8192, %s48_s26, [#allocation7], %s3889_s0, %s3889_s0, %s3890_s23  }
  0x34   :  { %3878 = dma.done.wait [#allocation4], 512  }
  0x35   :  { %3879 = vsyncadd [#allocation4], 4294966784 }
  0x36   :  { %3880 = dma.done.wait [#allocation7], 40960  }
  0x37   :  { %3881 = vsyncadd [#allocation7], 4294926336  ;;  %v3286_v0 = vld [vmem:[#allocation6 + $0x4] ss:$16 sps:$4 sm:$0xff]   ;;  %v3290_v2 = vld [vmem:[#allocation6] ss:$16 sps:$4 sm:$0xff]  }
  0x38   :  { %v3288_v1 = vld [vmem:[#allocation6 + $0x204] ss:$16 sps:$4 sm:$0xff]   ;;  %1664 = vmatprep.subr.bf16.mxu1 %v3286_v0  ;;  %v3291_v3 = vld [vmem:[#allocation6 + $0x200] ss:$16 sps:$4 sm:$0xff]   ;;  %v75_v48 = vld [vmem:[#allocation3 + $0x8] sm:$0xff]  ;;  %vm2816_vm7 = vcmask 64512  }
  0x39   :  { %1705 = vmatprep.subr.bf16.mxu0 %v3288_v1  ;;  %v3292_v4 = vld [vmem:[#allocation6 + $0x24] ss:$16 sps:$4 sm:$0xff]   ;;  %1665 = vmatpush1.bf16.msra.mxu1 %v3290_v2  ;;  %v3296_v6 = vld [vmem:[#allocation6 + $0x20] ss:$16 sps:$4 sm:$0xff]   ;;  %v3981_v51 = vcombine.high %v75_v48, %v75_v48  ;;  %s3892_s19 = smov [#allocation9]   ;;  %vm2857_vm8 = vcmask 57344  }
  0x3a   :  { %1706 = vmatpush1.bf16.msra.mxu0 %v3291_v3  ;;  %v3294_v5 = vld [vmem:[#allocation6 + $0x224] ss:$16 sps:$4 sm:$0xff]   ;;  %1666 = vmatprep.subr.bf16.mxu1 %v3292_v4  ;;  %v3297_v7 = vld [vmem:[#allocation6 + $0x220] ss:$16 sps:$4 sm:$0xff]   ;;  %s2865_s20 = sshll.u32 %s3892_s19, 4  ;;  %s2866_s20 = int_to_ptr.vmem [resolvable:$true] %s2865_s20 }
  0x3b   :  { %1707 = vmatprep.subr.bf16.mxu0 %v3294_v5  ;;  %v3298_v8 = vld [vmem:[#allocation6 + $0x44] ss:$16 sps:$4 sm:$0xff]   ;;  %v3302_v10 = vld [vmem:[#allocation6 + $0x40] ss:$16 sps:$4 sm:$0xff]   ;;  %1737 = vmatprep.mubr.bf16.mxu0 %v3981_v51  ;;  %v3391_v5 = vld [vmem:[#allocation6 + $0xc] ss:$16 sps:$4 sm:$0xff]   ;;  %p3861_p11 = scmp.lt.s32.totalorder %s2866_s20, %s2866_s20 }
  0x3c   :  { %v3300_v9 = vld [vmem:[#allocation6 + $0x244] ss:$16 sps:$4 sm:$0xff]   ;;  %v3303_v11 = vld [vmem:[#allocation6 + $0x240] ss:$16 sps:$4 sm:$0xff]   ;;  %s3856_s21 = scalar_lea.vmem %s2866_s20, 16  ;;  %s3860_s22 = scalar_lea.vmem %s2866_s20, 32 }
  0x3d   :  { %1667 = vmatpush1.bf16.msra.mxu1 %v3296_v6  ;;  %v3304_v12 = vld [vmem:[#allocation6 + $0x64] ss:$16 sps:$4 sm:$0xff]   ;;  %v3308_v14 = vld [vmem:[#allocation6 + $0x60] ss:$16 sps:$4 sm:$0xff]   ;;  %p3857_p10 = scmp.ne.s32.totalorder %s2866_s20, %s3856_s21  ;;  %p3862_p12 = scmp.lt.s32.totalorder %s3860_s22, %s3856_s21 }
  0x3e   :  { %1708 = vmatpush1.bf16.msra.mxu0 %v3297_v7  ;;  %1668 = vmatprep.subr.bf16.mxu1 %v3298_v8  ;;  %v3306_v13 = vld [vmem:[#allocation6 + $0x264] ss:$16 sps:$4 sm:$0xff]   ;;  %v3309_v15 = vld [vmem:[#allocation6 + $0x260] ss:$16 sps:$4 sm:$0xff]   ;;  %v3987_v7 = vcombine.low %v75_v48, %v75_v48 }
  0x3f   :  { %1709 = vmatprep.subr.bf16.mxu0 %v3300_v9  ;;  %v3310_v16 = vld [vmem:[#allocation6 + $0x84] ss:$16 sps:$4 sm:$0xff]   ;;  %v3314_v18 = vld [vmem:[#allocation6 + $0x80] ss:$16 sps:$4 sm:$0xff]   ;;  %v3389_v9 = vld [vmem:[#allocation6 + $0x8] ss:$16 sps:$4 sm:$0xff]   ;;  %p3863_p13 = por %p3862_p12, %p3861_p11 }
  0x40   :  { %v3312_v17 = vld [vmem:[#allocation6 + $0x284] ss:$16 sps:$4 sm:$0xff]   ;;  %v3315_v19 = vld [vmem:[#allocation6 + $0x280] ss:$16 sps:$4 sm:$0xff]  }
  0x41   :  { %1669 = vmatpush1.bf16.msra.mxu1 %v3302_v10  ;;  %v3316_v20 = vld [vmem:[#allocation6 + $0xa4] ss:$16 sps:$4 sm:$0xff]   ;;  %v3320_v22 = vld [vmem:[#allocation6 + $0xa0] ss:$16 sps:$4 sm:$0xff]   ;;  %p3864_p0 = pnand %p3863_p13, %p3857_p10 }
  0x42   :  { %1710 = vmatpush1.bf16.msra.mxu0 %v3303_v11  ;;  %1670 = vmatprep.subr.bf16.mxu1 %v3304_v12  ;;  %v3318_v21 = vld [vmem:[#allocation6 + $0x2a4] ss:$16 sps:$4 sm:$0xff]   ;;  %v3321_v23 = vld [vmem:[#allocation6 + $0x2a0] ss:$16 sps:$4 sm:$0xff]   ;;  %v3397_v11 = vld [vmem:[#allocation6 + $0x2c] ss:$16 sps:$4 sm:$0xff]  }
  0x43   :  { %1711 = vmatprep.subr.bf16.mxu0 %v3306_v13  ;;  %v3322_v24 = vld [vmem:[#allocation6 + $0xc4] ss:$16 sps:$4 sm:$0xff]   ;;  %v3326_v26 = vld [vmem:[#allocation6 + $0xc0] ss:$16 sps:$4 sm:$0xff]   ;;  %v3395_v13 = vld [vmem:[#allocation6 + $0x28] ss:$16 sps:$4 sm:$0xff]  }
  0x44   :  { %v3324_v25 = vld [vmem:[#allocation6 + $0x2c4] ss:$16 sps:$4 sm:$0xff]   ;;  %v3327_v27 = vld [vmem:[#allocation6 + $0x2c0] ss:$16 sps:$4 sm:$0xff]  }
  0x45   :  { %1671 = vmatpush1.bf16.msra.mxu1 %v3308_v14  ;;  %v3328_v28 = vld [vmem:[#allocation6 + $0xe4] ss:$16 sps:$4 sm:$0xff]   ;;  %v3332_v30 = vld [vmem:[#allocation6 + $0xe0] ss:$16 sps:$4 sm:$0xff]  }
  0x46   :  { %1712 = vmatpush1.bf16.msra.mxu0 %v3309_v15  ;;  %1672 = vmatprep.subr.bf16.mxu1 %v3310_v16  ;;  %v3330_v29 = vld [vmem:[#allocation6 + $0x2e4] ss:$16 sps:$4 sm:$0xff]   ;;  %v3333_v31 = vld [vmem:[#allocation6 + $0x2e0] ss:$16 sps:$4 sm:$0xff]   ;;  %v3403_v15 = vld [vmem:[#allocation6 + $0x4c] ss:$16 sps:$4 sm:$0xff]  }
  0x47   :  { %1713 = vmatprep.subr.bf16.mxu0 %v3312_v17  ;;  %v3334_v32 = vld [vmem:[#allocation6 + $0x104] ss:$16 sps:$4 sm:$0xff]   ;;  %v3338_v34 = vld [vmem:[#allocation6 + $0x100] ss:$16 sps:$4 sm:$0xff]   ;;  %v3401_v17 = vld [vmem:[#allocation6 + $0x48] ss:$16 sps:$4 sm:$0xff]  }
  0x48   :  { %v3336_v33 = vld [vmem:[#allocation6 + $0x304] ss:$16 sps:$4 sm:$0xff]   ;;  %v3339_v35 = vld [vmem:[#allocation6 + $0x300] ss:$16 sps:$4 sm:$0xff]  }
  0x49   :  { %1673 = vmatpush1.bf16.msra.mxu1 %v3314_v18  ;;  %v3340_v36 = vld [vmem:[#allocation6 + $0x124] ss:$16 sps:$4 sm:$0xff]   ;;  %v3344_v38 = vld [vmem:[#allocation6 + $0x120] ss:$16 sps:$4 sm:$0xff]  }
  0x4a   :  { %1714 = vmatpush1.bf16.msra.mxu0 %v3315_v19  ;;  %1674 = vmatprep.subr.bf16.mxu1 %v3316_v20  ;;  %v3342_v37 = vld [vmem:[#allocation6 + $0x324] ss:$16 sps:$4 sm:$0xff]   ;;  %v3345_v39 = vld [vmem:[#allocation6 + $0x320] ss:$16 sps:$4 sm:$0xff]   ;;  %v3409_v19 = vld [vmem:[#allocation6 + $0x6c] ss:$16 sps:$4 sm:$0xff]  }
  0x4b   :  { %1715 = vmatprep.subr.bf16.mxu0 %v3318_v21  ;;  %v3346_v40 = vld [vmem:[#allocation6 + $0x144] ss:$16 sps:$4 sm:$0xff]   ;;  %v3350_v42 = vld [vmem:[#allocation6 + $0x140] ss:$16 sps:$4 sm:$0xff]   ;;  %v3407_v21 = vld [vmem:[#allocation6 + $0x68] ss:$16 sps:$4 sm:$0xff]  }
  0x4c   :  { %v3348_v41 = vld [vmem:[#allocation6 + $0x344] ss:$16 sps:$4 sm:$0xff]   ;;  %v3351_v43 = vld [vmem:[#allocation6 + $0x340] ss:$16 sps:$4 sm:$0xff]  }
  0x4d   :  { %1675 = vmatpush1.bf16.msra.mxu1 %v3320_v22  ;;  %v3352_v44 = vld [vmem:[#allocation6 + $0x164] ss:$16 sps:$4 sm:$0xff]   ;;  %v3356_v49 = vld [vmem:[#allocation6 + $0x160] ss:$16 sps:$4 sm:$0xff]  }
  0x4e   :  { %1716 = vmatpush1.bf16.msra.mxu0 %v3321_v23  ;;  %1676 = vmatprep.subr.bf16.mxu1 %v3322_v24  ;;  %v3354_v45 = vld [vmem:[#allocation6 + $0x364] ss:$16 sps:$4 sm:$0xff]   ;;  %v3357_v50 = vld [vmem:[#allocation6 + $0x360] ss:$16 sps:$4 sm:$0xff]   ;;  %v3415_v23 = vld [vmem:[#allocation6 + $0x8c] ss:$16 sps:$4 sm:$0xff]  }
  0x4f   :  { %1717 = vmatprep.subr.bf16.mxu0 %v3324_v25  ;;  %v74_v46 = vld [vmem:[#allocation3] sm:$0xff]  ;;  %v3413_v25 = vld [vmem:[#allocation6 + $0x88] ss:$16 sps:$4 sm:$0xff]  }
  0x50   :  { %v3979_v47 = vcombine.high %v74_v46, %v74_v46  ;;  %v3358_v52 = vld [vmem:[#allocation6 + $0x184] ss:$16 sps:$4 sm:$0xff]   ;;  %v3362_v54 = vld [vmem:[#allocation6 + $0x180] ss:$16 sps:$4 sm:$0xff]   ;;  %v3985_v6 = vcombine.low %v74_v46, %v74_v46 }
  0x51   :  { %1677 = vmatpush1.bf16.msra.mxu1 %v3326_v26  ;;  %v3360_v53 = vld [vmem:[#allocation6 + $0x384] ss:$16 sps:$4 sm:$0xff]   ;;  %v3363_v55 = vld [vmem:[#allocation6 + $0x380] ss:$16 sps:$4 sm:$0xff]  }
  0x52   :  { %1718 = vmatpush1.bf16.msra.mxu0 %v3327_v27  ;;  %1678 = vmatprep.subr.bf16.mxu1 %v3328_v28  ;;  %v3364_v56 = vld [vmem:[#allocation6 + $0x1a4] ss:$16 sps:$4 sm:$0xff]   ;;  %v3368_v58 = vld [vmem:[#allocation6 + $0x1a0] ss:$16 sps:$4 sm:$0xff]   ;;  %v3421_v27 = vld [vmem:[#allocation6 + $0xac] ss:$16 sps:$4 sm:$0xff]  }
  0x53   :  { %1719 = vmatprep.subr.bf16.mxu0 %v3330_v29  ;;  %1696 = vmatprep.mubr.bf16.mxu1 %v3979_v47  ;;  %v3366_v57 = vld [vmem:[#allocation6 + $0x3a4] ss:$16 sps:$4 sm:$0xff]   ;;  %v3369_v59 = vld [vmem:[#allocation6 + $0x3a0] ss:$16 sps:$4 sm:$0xff]   ;;  %v3419_v29 = vld [vmem:[#allocation6 + $0xa8] ss:$16 sps:$4 sm:$0xff]  }
  0x54   :  { %v3370_v60 = vld [vmem:[#allocation6 + $0x1c4] ss:$16 sps:$4 sm:$0xff]   ;;  %v3374_v62 = vld [vmem:[#allocation6 + $0x1c0] ss:$16 sps:$4 sm:$0xff]  }
  0x55   :  { %1679 = vmatpush1.bf16.msra.mxu1 %v3332_v30  ;;  %v3372_v61 = vld [vmem:[#allocation6 + $0x3c4] ss:$16 sps:$4 sm:$0xff]   ;;  %v3375_v63 = vld [vmem:[#allocation6 + $0x3c0] ss:$16 sps:$4 sm:$0xff]  }
  0x56   :  { %1720 = vmatpush1.bf16.msra.mxu0 %v3333_v31  ;;  %1680 = vmatprep.subr.bf16.mxu1 %v3334_v32  ;;  %v3376_v0 = vld [vmem:[#allocation6 + $0x1e4] ss:$16 sps:$4 sm:$0xff]   ;;  %v3380_v2 = vld [vmem:[#allocation6 + $0x1e0] ss:$16 sps:$4 sm:$0xff]   ;;  %v3427_v31 = vld [vmem:[#allocation6 + $0xcc] ss:$16 sps:$4 sm:$0xff]  }
  0x57   :  { %1721 = vmatprep.subr.bf16.mxu0 %v3336_v33  ;;  %v3378_v1 = vld [vmem:[#allocation6 + $0x3e4] ss:$16 sps:$4 sm:$0xff]   ;;  %v3381_v3 = vld [vmem:[#allocation6 + $0x3e0] ss:$16 sps:$4 sm:$0xff]  }
  0x58   :  { %v3388_v4 = vld [vmem:[#allocation6 + $0x404] ss:$16 sps:$4 sm:$0xff]   ;;  %v3386_v8 = vld [vmem:[#allocation6 + $0x400] ss:$16 sps:$4 sm:$0xff]  }
  0x59   :  { %1681 = vmatpush1.bf16.msra.mxu1 %v3338_v34  ;;  %v3394_v10 = vld [vmem:[#allocation6 + $0x424] ss:$16 sps:$4 sm:$0xff]   ;;  %v3392_v12 = vld [vmem:[#allocation6 + $0x420] ss:$16 sps:$4 sm:$0xff]  }
  0x5a   :  { %1722 = vmatpush1.bf16.msra.mxu0 %v3339_v35  ;;  %1682 = vmatprep.subr.bf16.mxu1 %v3340_v36  ;;  %v3400_v14 = vld [vmem:[#allocation6 + $0x444] ss:$16 sps:$4 sm:$0xff]   ;;  %v3398_v16 = vld [vmem:[#allocation6 + $0x440] ss:$16 sps:$4 sm:$0xff]   ;;  %v3425_v35 = vld [vmem:[#allocation6 + $0xc8] ss:$16 sps:$4 sm:$0xff]  }
  0x5b   :  { %1723 = vmatprep.subr.bf16.mxu0 %v3342_v37  ;;  %v3406_v18 = vld [vmem:[#allocation6 + $0x464] ss:$16 sps:$4 sm:$0xff]   ;;  %v3404_v20 = vld [vmem:[#allocation6 + $0x460] ss:$16 sps:$4 sm:$0xff]   ;;  %v3433_v37 = vld [vmem:[#allocation6 + $0xec] ss:$16 sps:$4 sm:$0xff]  }
  0x5c   :  { %v3412_v22 = vld [vmem:[#allocation6 + $0x484] ss:$16 sps:$4 sm:$0xff]   ;;  %v3410_v24 = vld [vmem:[#allocation6 + $0x480] ss:$16 sps:$4 sm:$0xff]  }
  0x5d   :  { %1683 = vmatpush1.bf16.msra.mxu1 %v3344_v38  ;;  %v3418_v26 = vld [vmem:[#allocation6 + $0x4a4] ss:$16 sps:$4 sm:$0xff]   ;;  %v3416_v28 = vld [vmem:[#allocation6 + $0x4a0] ss:$16 sps:$4 sm:$0xff]  }
  0x5e   :  { %1724 = vmatpush1.bf16.msra.mxu0 %v3345_v39  ;;  %1684 = vmatprep.subr.bf16.mxu1 %v3346_v40  ;;  %v3424_v30 = vld [vmem:[#allocation6 + $0x4c4] ss:$16 sps:$4 sm:$0xff]   ;;  %v3422_v33 = vld [vmem:[#allocation6 + $0x4c0] ss:$16 sps:$4 sm:$0xff]   ;;  %v3431_v39 = vld [vmem:[#allocation6 + $0xe8] ss:$16 sps:$4 sm:$0xff]  }
  0x5f   :  { %1725 = vmatprep.subr.bf16.mxu0 %v3348_v41  ;;  %v3992_v32 = vld [vmem:[#allocation3 + $0x10] sm:$0xff]  ;;  %v3439_v41 = vld [vmem:[#allocation6 + $0x10c] ss:$16 sps:$4 sm:$0xff]  }
  0x60   :  { %v3996_v34 = vcombine.high %v3992_v32, %v3992_v32  ;;  %v3430_v36 = vld [vmem:[#allocation6 + $0x4e4] ss:$16 sps:$4 sm:$0xff]   ;;  %v3428_v38 = vld [vmem:[#allocation6 + $0x4e0] ss:$16 sps:$4 sm:$0xff]  }
  0x61   :  { %1685 = vmatpush1.bf16.msra.mxu1 %v3350_v42  ;;  %v3436_v40 = vld [vmem:[#allocation6 + $0x504] ss:$16 sps:$4 sm:$0xff]   ;;  %v3434_v42 = vld [vmem:[#allocation6 + $0x500] ss:$16 sps:$4 sm:$0xff]  }
  0x62   :  { %1726 = vmatpush1.bf16.msra.mxu0 %v3351_v43  ;;  %1686 = vmatprep.subr.bf16.mxu1 %v3352_v44  ;;  %v3437_v43 = vld [vmem:[#allocation6 + $0x108] ss:$16 sps:$4 sm:$0xff]   ;;  %v3442_v44 = vld [vmem:[#allocation6 + $0x524] ss:$16 sps:$4 sm:$0xff]   ;;  %v3440_v46 = vld [vmem:[#allocation6 + $0x520] ss:$16 sps:$4 sm:$0xff]  }
  0x63   :  { %1727 = vmatprep.subr.bf16.mxu0 %v3354_v45  ;;  %v3445_v45 = vld [vmem:[#allocation6 + $0x12c] ss:$16 sps:$4 sm:$0xff]   ;;  %v3448_v48 = vld [vmem:[#allocation6 + $0x544] ss:$16 sps:$4 sm:$0xff]  }
  0x65   :  { %1687 = vmatpush1.bf16.msra.mxu1 %v3356_v49  ;;  %v3451_v49 = vld [vmem:[#allocation6 + $0x14c] ss:$16 sps:$4 sm:$0xff]  }
  0x66   :  { %1728 = vmatpush1.bf16.msra.mxu0 %v3357_v50  ;;  %1688 = vmatprep.subr.bf16.mxu1 %v3358_v52  ;;  %v3446_v50 = vld [vmem:[#allocation6 + $0x540] ss:$16 sps:$4 sm:$0xff]   ;;  %v3449_v52 = vld [vmem:[#allocation6 + $0x148] ss:$16 sps:$4 sm:$0xff]  }
  0x67   :  { %1729 = vmatprep.subr.bf16.mxu0 %v3360_v53  ;;  %v3454_v53 = vld [vmem:[#allocation6 + $0x564] ss:$16 sps:$4 sm:$0xff]  }
  0x69   :  { %1689 = vmatpush1.bf16.msra.mxu1 %v3362_v54  ;;  %v3457_v54 = vld [vmem:[#allocation6 + $0x16c] ss:$16 sps:$4 sm:$0xff]  }
  0x6a   :  { %1730 = vmatpush1.bf16.msra.mxu0 %v3363_v55  ;;  %1690 = vmatprep.subr.bf16.mxu1 %v3364_v56  ;;  %v3452_v55 = vld [vmem:[#allocation6 + $0x560] ss:$16 sps:$4 sm:$0xff]   ;;  %v3455_v56 = vld [vmem:[#allocation6 + $0x168] ss:$16 sps:$4 sm:$0xff]  }
  0x6b   :  { %1731 = vmatprep.subr.bf16.mxu0 %v3366_v57  ;;  %v3460_v57 = vld [vmem:[#allocation6 + $0x584] ss:$16 sps:$4 sm:$0xff]  }
  0x6d   :  { %1691 = vmatpush1.bf16.msra.mxu1 %v3368_v58  ;;  %v3463_v58 = vld [vmem:[#allocation6 + $0x18c] ss:$16 sps:$4 sm:$0xff]  }
  0x6e   :  { %1732 = vmatpush1.bf16.msra.mxu0 %v3369_v59  ;;  %1692 = vmatprep.subr.bf16.mxu1 %v3370_v60  ;;  %v3458_v59 = vld [vmem:[#allocation6 + $0x580] ss:$16 sps:$4 sm:$0xff]   ;;  %v3461_v60 = vld [vmem:[#allocation6 + $0x188] ss:$16 sps:$4 sm:$0xff]  }
  0x6f   :  { %1733 = vmatprep.subr.bf16.mxu0 %v3372_v61  ;;  %v3466_v61 = vld [vmem:[#allocation6 + $0x5a4] ss:$16 sps:$4 sm:$0xff]  }
  0x71   :  { %1693 = vmatpush1.bf16.msra.mxu1 %v3374_v62  ;;  %v3469_v62 = vld [vmem:[#allocation6 + $0x1ac] ss:$16 sps:$4 sm:$0xff]  }
  0x72   :  { %1734 = vmatpush1.bf16.msra.mxu0 %v3375_v63  ;;  %1694 = vmatprep.subr.bf16.mxu1 %v3376_v0  ;;  %v3464_v63 = vld [vmem:[#allocation6 + $0x5a0] ss:$16 sps:$4 sm:$0xff]   ;;  %v3467_v0 = vld [vmem:[#allocation6 + $0x1a8] ss:$16 sps:$4 sm:$0xff]  }
  0x73   :  { %1735 = vmatprep.subr.bf16.mxu0 %v3378_v1  ;;  %v3472_v1 = vld [vmem:[#allocation6 + $0x5c4] ss:$16 sps:$4 sm:$0xff]  }
  0x75   :  { %1695 = vmatpush1.bf16.msra.mxu1 %v3380_v2  ;;  %v3475_v2 = vld [vmem:[#allocation6 + $0x1cc] ss:$16 sps:$4 sm:$0xff]  }
  0x76   :  { %1736 = vmatpush1.bf16.msra.mxu0 %v3381_v3  ;;  %1828 = vmatprep.subr.bf16.mxu1 %v3391_v5  ;;  %v3470_v3 = vld [vmem:[#allocation6 + $0x5c0] ss:$16 sps:$4 sm:$0xff]   ;;  %v3478_v5 = vld [vmem:[#allocation6 + $0x5e4] ss:$16 sps:$4 sm:$0xff]  }
  0x77   :  { %1746 = vmatprep.subr.bf16.mxu0 %v3388_v4  ;;  %v3473_v4 = vld [vmem:[#allocation6 + $0x1c8] ss:$16 sps:$4 sm:$0xff]  }
  0x78   :  { %1697 = vmatmul.mubr.bf16.vlgmr.msra.gmra.mrb[0].mxu1 %v3985_v6 }
  0x79   :  { %1738 = vmatmul.mubr.bf16.vlgmr.msra.gmra.mrb[0].mxu0 %v3987_v7  ;;  %1829 = vmatpush1.bf16.msra.mxu1 %v3389_v9  ;;  %v3476_v9 = vld [vmem:[#allocation6 + $0x5e0] ss:$16 sps:$4 sm:$0xff]  }
  0x7a   :  { %1747 = vmatpush1.bf16.msra.mxu0 %v3386_v8  ;;  %1830 = vmatprep.subr.bf16.mxu1 %v3397_v11  ;;  %v3481_v8 = vld [vmem:[#allocation6 + $0x1ec] ss:$16 sps:$4 sm:$0xff]   ;;  %v3486_v11 = vld [vmem:[#allocation6 + $0x604] ss:$16 sps:$4 sm:$0xff]  }
  0x7b   :  { %1748 = vmatprep.subr.bf16.mxu0 %v3394_v10  ;;  %1860 = vmatprep.mubr.bf16.mxu1 %v3979_v47  ;;  %v3443_v47 = vld [vmem:[#allocation6 + $0x128] ss:$16 sps:$4 sm:$0xff]  }
  0x7c   :  { %1778 = vmatprep.mubr.bf16.mxu0 %v3996_v34  ;;  %v3479_v10 = vld [vmem:[#allocation6 + $0x1e8] ss:$16 sps:$4 sm:$0xff]  }
  0x7d   :  { %1831 = vmatpush1.bf16.msra.mxu1 %v3395_v13  ;;  %v4001_v13 = vcombine.low %v3992_v32, %v3992_v32  ;;  %v3511_v32 = vld [vmem:[#allocation6 + $0x288] ss:$16 sps:$4 sm:$0xff]  }
  0x7e   :  { %1749 = vmatpush1.bf16.msra.mxu0 %v3392_v12  ;;  %1832 = vmatprep.subr.bf16.mxu1 %v3403_v15  ;;  %v3489_v12 = vld [vmem:[#allocation6 + $0x20c] ss:$16 sps:$4 sm:$0xff]   ;;  %v3487_v15 = vld [vmem:[#allocation6 + $0x208] ss:$16 sps:$4 sm:$0xff]  }
  0x7f   :  { %1750 = vmatprep.subr.bf16.mxu0 %v3400_v14  ;;  %v3484_v14 = vld [vmem:[#allocation6 + $0x600] ss:$16 sps:$4 sm:$0xff]  }
  0x81   :  { %1833 = vmatpush1.bf16.msra.mxu1 %v3401_v17  ;;  %v3495_v17 = vld [vmem:[#allocation6 + $0x22c] ss:$16 sps:$4 sm:$0xff]  }
  0x82   :  { %1751 = vmatpush1.bf16.msra.mxu0 %v3398_v16  ;;  %1834 = vmatprep.subr.bf16.mxu1 %v3409_v19  ;;  %v3492_v16 = vld [vmem:[#allocation6 + $0x624] ss:$16 sps:$4 sm:$0xff]  }
  0x83   :  { %1752 = vmatprep.subr.bf16.mxu0 %v3406_v18  ;;  %v4003_v18 = vld [vmem:[#allocation3 + $0x18] sm:$0xff] }
  0x84   :  { %v4007_v19 = vcombine.high %v4003_v18, %v4003_v18 }
  0x85   :  { %1835 = vmatpush1.bf16.msra.mxu1 %v3407_v21  ;;  %v3493_v21 = vld [vmem:[#allocation6 + $0x228] ss:$16 sps:$4 sm:$0xff]  }
  0x86   :  { %1753 = vmatpush1.bf16.msra.mxu0 %v3404_v20  ;;  %1836 = vmatprep.subr.bf16.mxu1 %v3415_v23  ;;  %v3490_v20 = vld [vmem:[#allocation6 + $0x620] ss:$16 sps:$4 sm:$0xff]   ;;  %v3501_v23 = vld [vmem:[#allocation6 + $0x24c] ss:$16 sps:$4 sm:$0xff]  }
  0x87   :  { %1754 = vmatprep.subr.bf16.mxu0 %v3412_v22  ;;  %v3498_v22 = vld [vmem:[#allocation6 + $0x644] ss:$16 sps:$4 sm:$0xff]  }
  0x89   :  { %1837 = vmatpush1.bf16.msra.mxu1 %v3413_v25  ;;  %v3499_v25 = vld [vmem:[#allocation6 + $0x248] ss:$16 sps:$4 sm:$0xff]  }
  0x8a   :  { %1755 = vmatpush1.bf16.msra.mxu0 %v3410_v24  ;;  %1838 = vmatprep.subr.bf16.mxu1 %v3421_v27  ;;  %v3496_v24 = vld [vmem:[#allocation6 + $0x640] ss:$16 sps:$4 sm:$0xff]  }
  0x8b   :  { %1756 = vmatprep.subr.bf16.mxu0 %v3418_v26  ;;  %v3504_v26 = vld [vmem:[#allocation6 + $0x664] ss:$16 sps:$4 sm:$0xff]   ;;  %v3502_v27 = vld [vmem:[#allocation6 + $0x660] ss:$16 sps:$4 sm:$0xff]  }
  0x8d   :  { %1839 = vmatpush1.bf16.msra.mxu1 %v3419_v29  ;;  %v3510_v29 = vld [vmem:[#allocation6 + $0x684] ss:$16 sps:$4 sm:$0xff]  }
  0x8e   :  { %1757 = vmatpush1.bf16.msra.mxu0 %v3416_v28  ;;  %1840 = vmatprep.subr.bf16.mxu1 %v3427_v31  ;;  %v3505_v28 = vld [vmem:[#allocation6 + $0x268] ss:$16 sps:$4 sm:$0xff]   ;;  %v3508_v31 = vld [vmem:[#allocation6 + $0x680] ss:$16 sps:$4 sm:$0xff]  }
  0x8f   :  { %1758 = vmatprep.subr.bf16.mxu0 %v3424_v30  ;;  %v3513_v30 = vld [vmem:[#allocation6 + $0x28c] ss:$16 sps:$4 sm:$0xff]  }
  0x91   :  { %1841 = vmatpush1.bf16.msra.mxu1 %v3425_v35  ;;  %v3514_v35 = vld [vmem:[#allocation6 + $0x6a0] ss:$16 sps:$4 sm:$0xff]  }
  0x92   :  { %1759 = vmatpush1.bf16.msra.mxu0 %v3422_v33  ;;  %1842 = vmatprep.subr.bf16.mxu1 %v3433_v37  ;;  %v3519_v33 = vld [vmem:[#allocation6 + $0x2ac] ss:$16 sps:$4 sm:$0xff]   ;;  %v3522_v37 = vld [vmem:[#allocation6 + $0x6c4] ss:$16 sps:$4 sm:$0xff]  }
  0x93   :  { %1760 = vmatprep.subr.bf16.mxu0 %v3430_v36  ;;  %v3517_v36 = vld [vmem:[#allocation6 + $0x2a8] ss:$16 sps:$4 sm:$0xff]  }
  0x95   :  { %1843 = vmatpush1.bf16.msra.mxu1 %v3431_v39  ;;  %v3520_v39 = vld [vmem:[#allocation6 + $0x6c0] ss:$16 sps:$4 sm:$0xff]  }
  0x96   :  { %1761 = vmatpush1.bf16.msra.mxu0 %v3428_v38  ;;  %1844 = vmatprep.subr.bf16.mxu1 %v3439_v41  ;;  %v3525_v38 = vld [vmem:[#allocation6 + $0x2cc] ss:$16 sps:$4 sm:$0xff]   ;;  %v3528_v41 = vld [vmem:[#allocation6 + $0x6e4] ss:$16 sps:$4 sm:$0xff]  }
  0x97   :  { %1762 = vmatprep.subr.bf16.mxu0 %v3436_v40  ;;  %v3523_v40 = vld [vmem:[#allocation6 + $0x2c8] ss:$16 sps:$4 sm:$0xff]  }
  0x99   :  { %1845 = vmatpush1.bf16.msra.mxu1 %v3437_v43  ;;  %v3526_v43 = vld [vmem:[#allocation6 + $0x6e0] ss:$16 sps:$4 sm:$0xff]  }
  0x9a   :  { %1763 = vmatpush1.bf16.msra.mxu0 %v3434_v42  ;;  %1846 = vmatprep.subr.bf16.mxu1 %v3445_v45  ;;  %v3531_v42 = vld [vmem:[#allocation6 + $0x2ec] ss:$16 sps:$4 sm:$0xff]   ;;  %v3534_v45 = vld [vmem:[#allocation6 + $0x704] ss:$16 sps:$4 sm:$0xff]  }
  0x9b   :  { %1764 = vmatprep.subr.bf16.mxu0 %v3442_v44  ;;  %v3529_v44 = vld [vmem:[#allocation6 + $0x2e8] ss:$16 sps:$4 sm:$0xff]  }
  0x9d   :  { %1847 = vmatpush1.bf16.msra.mxu1 %v3443_v47  ;;  %v3532_v47 = vld [vmem:[#allocation6 + $0x700] ss:$16 sps:$4 sm:$0xff]  }
  0x9e   :  { %1765 = vmatpush1.bf16.msra.mxu0 %v3440_v46  ;;  %1848 = vmatprep.subr.bf16.mxu1 %v3451_v49  ;;  %v3537_v46 = vld [vmem:[#allocation6 + $0x30c] ss:$16 sps:$4 sm:$0xff]   ;;  %v3540_v49 = vld [vmem:[#allocation6 + $0x724] ss:$16 sps:$4 sm:$0xff]  }
  0x9f   :  { %1766 = vmatprep.subr.bf16.mxu0 %v3448_v48  ;;  %v3535_v48 = vld [vmem:[#allocation6 + $0x308] ss:$16 sps:$4 sm:$0xff]  }
  0xa1   :  { %1849 = vmatpush1.bf16.msra.mxu1 %v3449_v52  ;;  %v3538_v52 = vld [vmem:[#allocation6 + $0x720] ss:$16 sps:$4 sm:$0xff]  }
  0xa2   :  { %1767 = vmatpush1.bf16.msra.mxu0 %v3446_v50  ;;  %1850 = vmatprep.subr.bf16.mxu1 %v3457_v54  ;;  %v3543_v50 = vld [vmem:[#allocation6 + $0x32c] ss:$16 sps:$4 sm:$0xff]   ;;  %v3546_v54 = vld [vmem:[#allocation6 + $0x744] ss:$16 sps:$4 sm:$0xff]  }
  0xa3   :  { %1768 = vmatprep.subr.bf16.mxu0 %v3454_v53  ;;  %v3541_v53 = vld [vmem:[#allocation6 + $0x328] ss:$16 sps:$4 sm:$0xff]  }
  0xa5   :  { %1851 = vmatpush1.bf16.msra.mxu1 %v3455_v56  ;;  %v3544_v56 = vld [vmem:[#allocation6 + $0x740] ss:$16 sps:$4 sm:$0xff]  }
  0xa6   :  { %1769 = vmatpush1.bf16.msra.mxu0 %v3452_v55  ;;  %1852 = vmatprep.subr.bf16.mxu1 %v3463_v58  ;;  %v3549_v55 = vld [vmem:[#allocation6 + $0x34c] ss:$16 sps:$4 sm:$0xff]   ;;  %v3552_v58 = vld [vmem:[#allocation6 + $0x764] ss:$16 sps:$4 sm:$0xff]  }
  0xa7   :  { %1770 = vmatprep.subr.bf16.mxu0 %v3460_v57  ;;  %v3547_v57 = vld [vmem:[#allocation6 + $0x348] ss:$16 sps:$4 sm:$0xff]  }
  0xa9   :  { %1853 = vmatpush1.bf16.msra.mxu1 %v3461_v60  ;;  %v3550_v60 = vld [vmem:[#allocation6 + $0x760] ss:$16 sps:$4 sm:$0xff]  }
  0xaa   :  { %1771 = vmatpush1.bf16.msra.mxu0 %v3458_v59  ;;  %1854 = vmatprep.subr.bf16.mxu1 %v3469_v62  ;;  %v3555_v59 = vld [vmem:[#allocation6 + $0x36c] ss:$16 sps:$4 sm:$0xff]   ;;  %v3558_v62 = vld [vmem:[#allocation6 + $0x784] ss:$16 sps:$4 sm:$0xff]  }
  0xab   :  { %1772 = vmatprep.subr.bf16.mxu0 %v3466_v61  ;;  %v3553_v61 = vld [vmem:[#allocation6 + $0x368] ss:$16 sps:$4 sm:$0xff]  }
  0xad   :  { %1855 = vmatpush1.bf16.msra.mxu1 %v3467_v0  ;;  %v3556_v0 = vld [vmem:[#allocation6 + $0x780] ss:$16 sps:$4 sm:$0xff]  }
  0xae   :  { %1773 = vmatpush1.bf16.msra.mxu0 %v3464_v63  ;;  %1856 = vmatprep.subr.bf16.mxu1 %v3475_v2  ;;  %v3561_v63 = vld [vmem:[#allocation6 + $0x38c] ss:$16 sps:$4 sm:$0xff]   ;;  %v3564_v2 = vld [vmem:[#allocation6 + $0x7a4] ss:$16 sps:$4 sm:$0xff]  }
  0xaf   :  { %1774 = vmatprep.subr.bf16.mxu0 %v3472_v1  ;;  %v3559_v1 = vld [vmem:[#allocation6 + $0x388] ss:$16 sps:$4 sm:$0xff]  }
  0xb1   :  { %1857 = vmatpush1.bf16.msra.mxu1 %v3473_v4  ;;  %v3562_v4 = vld [vmem:[#allocation6 + $0x7a0] ss:$16 sps:$4 sm:$0xff]  }
  0xb2   :  { %1775 = vmatpush1.bf16.msra.mxu0 %v3470_v3  ;;  %1858 = vmatprep.subr.bf16.mxu1 %v3481_v8  ;;  %v3567_v3 = vld [vmem:[#allocation6 + $0x3ac] ss:$16 sps:$4 sm:$0xff]   ;;  %v3570_v8 = vld [vmem:[#allocation6 + $0x7c4] ss:$16 sps:$4 sm:$0xff]  }
  0xb3   :  { %1776 = vmatprep.subr.bf16.mxu0 %v3478_v5  ;;  %v3565_v5 = vld [vmem:[#allocation6 + $0x3a8] ss:$16 sps:$4 sm:$0xff]  }
  0xb5   :  { %1859 = vmatpush1.bf16.msra.mxu1 %v3479_v10  ;;  %v3568_v10 = vld [vmem:[#allocation6 + $0x7c0] ss:$16 sps:$4 sm:$0xff]  }
  0xb6   :  { %1777 = vmatpush1.bf16.msra.mxu0 %v3476_v9  ;;  %1869 = vmatprep.subr.bf16.mxu1 %v3489_v12  ;;  %v3573_v9 = vld [vmem:[#allocation6 + $0x3cc] ss:$16 sps:$4 sm:$0xff]   ;;  %v3576_v12 = vld [vmem:[#allocation6 + $0x7e4] ss:$16 sps:$4 sm:$0xff]  }
  0xb7   :  { %1787 = vmatprep.subr.bf16.mxu0 %v3486_v11  ;;  %v3571_v11 = vld [vmem:[#allocation6 + $0x3c8] ss:$16 sps:$4 sm:$0xff]  }
  0xb8   :  { %1861 = vmatmul.mubr.bf16.vlgmr.msra.gmra.mrb[4].mxu1 %v3985_v6  ;;  %v3507_v6 = vld [vmem:[#allocation6 + $0x26c] ss:$16 sps:$4 sm:$0xff]  }
  0xb9   :  { %1779 = vmatmul.mubr.bf16.vlgmr.msra.gmra.mrb[0].mxu0 %v4001_v13  ;;  %1870 = vmatpush1.bf16.msra.mxu1 %v3487_v15  ;;  %v3574_v15 = vld [vmem:[#allocation6 + $0x7e0] ss:$16 sps:$4 sm:$0xff]  }
  0xba   :  { %1788 = vmatpush1.bf16.msra.mxu0 %v3484_v14  ;;  %1871 = vmatprep.subr.bf16.mxu1 %v3495_v17  ;;  %v3579_v14 = vld [vmem:[#allocation6 + $0x3ec] ss:$16 sps:$4 sm:$0xff]  }
  0xbb   :  { %1789 = vmatprep.subr.bf16.mxu0 %v3492_v16  ;;  %1819 = vmatprep.mubr.bf16.mxu0 %v4007_v19  ;;  %v3577_v16 = vld [vmem:[#allocation6 + $0x3e8] ss:$16 sps:$4 sm:$0xff]   ;;  %v3584_v17 = vld [vmem:[#allocation6 + $0x40c] ss:$16 sps:$4 sm:$0xff]  }
  0xbc   :  { %1901 = vmatprep.mubr.bf16.mxu1 %v3981_v51  ;;  %v3516_v51 = vld [vmem:[#allocation6 + $0x6a4] ss:$16 sps:$4 sm:$0xff]  }
  0xbd   :  { %1872 = vmatpush1.bf16.msra.mxu1 %v3493_v21  ;;  %v4015_v21 = vcombine.low %v4003_v18, %v4003_v18  ;;  %v3681_v18 = vld [vmem:[#allocation8 + $0x10] ss:$8 sps:$4 sm:$0xff]  }
  0xbe   :  { %1790 = vmatpush1.bf16.msra.mxu0 %v3490_v20  ;;  %1873 = vmatprep.subr.bf16.mxu1 %v3501_v23  ;;  %v3582_v20 = vld [vmem:[#allocation6 + $0x408] ss:$16 sps:$4 sm:$0xff]  }
  0xbf   :  { %1791 = vmatprep.subr.bf16.mxu0 %v3498_v22  ;;  %v3587_v22 = vld [vmem:[#allocation6 + $0x42c] ss:$16 sps:$4 sm:$0xff]   ;;  %v3678_v23 = vld [vmem:[#allocation8] ss:$8 sps:$4 sm:$0xff]  }
  0xc1   :  { %1874 = vmatpush1.bf16.msra.mxu1 %v3499_v25  ;;  %v3585_v25 = vld [vmem:[#allocation6 + $0x428] ss:$16 sps:$4 sm:$0xff]  }
  0xc2   :  { %1792 = vmatpush1.bf16.msra.mxu0 %v3496_v24  ;;  %1875 = vmatprep.subr.bf16.mxu1 %v3507_v6  ;;  %v3680_v24 = vld [vmem:[#allocation8 + $0x4] ss:$8 sps:$4 sm:$0xff]  }
  0xc3   :  { %1793 = vmatprep.subr.bf16.mxu0 %v3504_v26  ;;  %v3683_v26 = vld [vmem:[#allocation8 + $0x14] ss:$8 sps:$4 sm:$0xff]  }
  0xc4   :  { %v3590_v6 = vld [vmem:[#allocation6 + $0x44c] ss:$16 sps:$4 sm:$0xff]  }
  0xc5   :  { %1876 = vmatpush1.bf16.msra.mxu1 %v3505_v28  ;;  %v3588_v28 = vld [vmem:[#allocation6 + $0x448] ss:$16 sps:$4 sm:$0xff]  }
  0xc6   :  { %1794 = vmatpush1.bf16.msra.mxu0 %v3502_v27  ;;  %1877 = vmatprep.subr.bf16.mxu1 %v3513_v30  ;;  %v3686_v27 = vld [vmem:[#allocation8 + $0x24] ss:$8 sps:$4 sm:$0xff]   ;;  %v3591_v30 = vld [vmem:[#allocation6 + $0x468] ss:$16 sps:$4 sm:$0xff]  }
  0xc7   :  { %1795 = vmatprep.subr.bf16.mxu0 %v3510_v29  ;;  %v3593_v29 = vld [vmem:[#allocation6 + $0x46c] ss:$16 sps:$4 sm:$0xff]  }
  0xc9   :  { %1878 = vmatpush1.bf16.msra.mxu1 %v3511_v32  ;;  %v3689_v32 = vld [vmem:[#allocation8 + $0x34] ss:$8 sps:$4 sm:$0xff]  }
  0xca   :  { %1796 = vmatpush1.bf16.msra.mxu0 %v3508_v31  ;;  %1879 = vmatprep.subr.bf16.mxu1 %v3519_v33  ;;  %v3596_v31 = vld [vmem:[#allocation6 + $0x48c] ss:$16 sps:$4 sm:$0xff]   ;;  %v3594_v33 = vld [vmem:[#allocation6 + $0x488] ss:$16 sps:$4 sm:$0xff]  }
  0xcb   :  { %1797 = vmatprep.subr.bf16.mxu0 %v3516_v51  ;;  %v3692_v51 = vld [vmem:[#allocation8 + $0x44] ss:$8 sps:$4 sm:$0xff]  }
  0xcd   :  { %1880 = vmatpush1.bf16.msra.mxu1 %v3517_v36  ;;  %v3690_v36 = vld [vmem:[#allocation8 + $0x40] ss:$8 sps:$4 sm:$0xff]  }
  0xce   :  { %1798 = vmatpush1.bf16.msra.mxu0 %v3514_v35  ;;  %1881 = vmatprep.subr.bf16.mxu1 %v3525_v38  ;;  %v3599_v35 = vld [vmem:[#allocation6 + $0x4ac] ss:$16 sps:$4 sm:$0xff]   ;;  %v3597_v38 = vld [vmem:[#allocation6 + $0x4a8] ss:$16 sps:$4 sm:$0xff]  }
  0xcf   :  { %1799 = vmatprep.subr.bf16.mxu0 %v3522_v37  ;;  %v3695_v37 = vld [vmem:[#allocation8 + $0x54] ss:$8 sps:$4 sm:$0xff]  }
  0xd1   :  { %1882 = vmatpush1.bf16.msra.mxu1 %v3523_v40  ;;  %v3693_v40 = vld [vmem:[#allocation8 + $0x50] ss:$8 sps:$4 sm:$0xff]  }
  0xd2   :  { %1800 = vmatpush1.bf16.msra.mxu0 %v3520_v39  ;;  %1883 = vmatprep.subr.bf16.mxu1 %v3531_v42  ;;  %v3602_v39 = vld [vmem:[#allocation6 + $0x4cc] ss:$16 sps:$4 sm:$0xff]   ;;  %v3600_v42 = vld [vmem:[#allocation6 + $0x4c8] ss:$16 sps:$4 sm:$0xff]  }
  0xd3   :  { %1801 = vmatprep.subr.bf16.mxu0 %v3528_v41  ;;  %v3698_v41 = vld [vmem:[#allocation8 + $0x64] ss:$8 sps:$4 sm:$0xff]  }
  0xd5   :  { %1884 = vmatpush1.bf16.msra.mxu1 %v3529_v44  ;;  %v3696_v44 = vld [vmem:[#allocation8 + $0x60] ss:$8 sps:$4 sm:$0xff]  }
  0xd6   :  { %1802 = vmatpush1.bf16.msra.mxu0 %v3526_v43  ;;  %1885 = vmatprep.subr.bf16.mxu1 %v3537_v46  ;;  %v3605_v43 = vld [vmem:[#allocation6 + $0x4ec] ss:$16 sps:$4 sm:$0xff]   ;;  %v3603_v46 = vld [vmem:[#allocation6 + $0x4e8] ss:$16 sps:$4 sm:$0xff]  }
  0xd7   :  { %1803 = vmatprep.subr.bf16.mxu0 %v3534_v45  ;;  %v3701_v45 = vld [vmem:[#allocation8 + $0x74] ss:$8 sps:$4 sm:$0xff]  }
  0xd9   :  { %1886 = vmatpush1.bf16.msra.mxu1 %v3535_v48  ;;  %v3699_v48 = vld [vmem:[#allocation8 + $0x70] ss:$8 sps:$4 sm:$0xff]  }
  0xda   :  { %1804 = vmatpush1.bf16.msra.mxu0 %v3532_v47  ;;  %1887 = vmatprep.subr.bf16.mxu1 %v3543_v50  ;;  %v3608_v47 = vld [vmem:[#allocation6 + $0x50c] ss:$16 sps:$4 sm:$0xff]   ;;  %v3606_v50 = vld [vmem:[#allocation6 + $0x508] ss:$16 sps:$4 sm:$0xff]  }
  0xdb   :  { %1805 = vmatprep.subr.bf16.mxu0 %v3540_v49  ;;  %v3704_v49 = vld [vmem:[#allocation8 + $0x84] ss:$8 sps:$4 sm:$0xff]  }
  0xdd   :  { %1888 = vmatpush1.bf16.msra.mxu1 %v3541_v53  ;;  %v3702_v53 = vld [vmem:[#allocation8 + $0x80] ss:$8 sps:$4 sm:$0xff]  }
  0xde   :  { %1806 = vmatpush1.bf16.msra.mxu0 %v3538_v52  ;;  %1889 = vmatprep.subr.bf16.mxu1 %v3549_v55  ;;  %v3611_v52 = vld [vmem:[#allocation6 + $0x52c] ss:$16 sps:$4 sm:$0xff]   ;;  %v3609_v55 = vld [vmem:[#allocation6 + $0x528] ss:$16 sps:$4 sm:$0xff]  }
  0xdf   :  { %1807 = vmatprep.subr.bf16.mxu0 %v3546_v54  ;;  %v3707_v54 = vld [vmem:[#allocation8 + $0x94] ss:$8 sps:$4 sm:$0xff]  }
  0xe1   :  { %1890 = vmatpush1.bf16.msra.mxu1 %v3547_v57  ;;  %v3705_v57 = vld [vmem:[#allocation8 + $0x90] ss:$8 sps:$4 sm:$0xff]  }
  0xe2   :  { %1808 = vmatpush1.bf16.msra.mxu0 %v3544_v56  ;;  %1891 = vmatprep.subr.bf16.mxu1 %v3555_v59  ;;  %v3614_v56 = vld [vmem:[#allocation6 + $0x54c] ss:$16 sps:$4 sm:$0xff]   ;;  %v3612_v59 = vld [vmem:[#allocation6 + $0x548] ss:$16 sps:$4 sm:$0xff]  }
  0xe3   :  { %1809 = vmatprep.subr.bf16.mxu0 %v3552_v58  ;;  %v3710_v58 = vld [vmem:[#allocation8 + $0xa4] ss:$8 sps:$4 sm:$0xff]  }
  0xe5   :  { %1892 = vmatpush1.bf16.msra.mxu1 %v3553_v61  ;;  %v3708_v61 = vld [vmem:[#allocation8 + $0xa0] ss:$8 sps:$4 sm:$0xff]  }
  0xe6   :  { %1810 = vmatpush1.bf16.msra.mxu0 %v3550_v60  ;;  %1893 = vmatprep.subr.bf16.mxu1 %v3561_v63  ;;  %v3617_v60 = vld [vmem:[#allocation6 + $0x56c] ss:$16 sps:$4 sm:$0xff]   ;;  %v3615_v63 = vld [vmem:[#allocation6 + $0x568] ss:$16 sps:$4 sm:$0xff]  }
  0xe7   :  { %1811 = vmatprep.subr.bf16.mxu0 %v3558_v62  ;;  %v3713_v62 = vld [vmem:[#allocation8 + $0xb4] ss:$8 sps:$4 sm:$0xff]  }
  0xe9   :  { %1894 = vmatpush1.bf16.msra.mxu1 %v3559_v1  ;;  %v3711_v1 = vld [vmem:[#allocation8 + $0xb0] ss:$8 sps:$4 sm:$0xff]  }
  0xea   :  { %1812 = vmatpush1.bf16.msra.mxu0 %v3556_v0  ;;  %1895 = vmatprep.subr.bf16.mxu1 %v3567_v3  ;;  %v3620_v0 = vld [vmem:[#allocation6 + $0x58c] ss:$16 sps:$4 sm:$0xff]   ;;  %v3618_v3 = vld [vmem:[#allocation6 + $0x588] ss:$16 sps:$4 sm:$0xff]  }
  0xeb   :  { %1813 = vmatprep.subr.bf16.mxu0 %v3564_v2  ;;  %v3716_v2 = vld [vmem:[#allocation8 + $0xc4] ss:$8 sps:$4 sm:$0xff]  }
  0xed   :  { %1896 = vmatpush1.bf16.msra.mxu1 %v3565_v5  ;;  %v3714_v5 = vld [vmem:[#allocation8 + $0xc0] ss:$8 sps:$4 sm:$0xff]  }
  0xee   :  { %1814 = vmatpush1.bf16.msra.mxu0 %v3562_v4  ;;  %1897 = vmatprep.subr.bf16.mxu1 %v3573_v9  ;;  %v3623_v4 = vld [vmem:[#allocation6 + $0x5ac] ss:$16 sps:$4 sm:$0xff]   ;;  %v3621_v9 = vld [vmem:[#allocation6 + $0x5a8] ss:$16 sps:$4 sm:$0xff]  }
  0xef   :  { %1815 = vmatprep.subr.bf16.mxu0 %v3570_v8  ;;  %v3719_v8 = vld [vmem:[#allocation8 + $0xd4] ss:$8 sps:$4 sm:$0xff]  }
  0xf1   :  { %1898 = vmatpush1.bf16.msra.mxu1 %v3571_v11  ;;  %v3717_v11 = vld [vmem:[#allocation8 + $0xd0] ss:$8 sps:$4 sm:$0xff]  }
  0xf2   :  { %1816 = vmatpush1.bf16.msra.mxu0 %v3568_v10  ;;  %1899 = vmatprep.subr.bf16.mxu1 %v3579_v14  ;;  %v3626_v10 = vld [vmem:[#allocation6 + $0x5cc] ss:$16 sps:$4 sm:$0xff]  }
  0xf3   :  { %1817 = vmatprep.subr.bf16.mxu0 %v3576_v12  ;;  %v3624_v12 = vld [vmem:[#allocation6 + $0x5c8] ss:$16 sps:$4 sm:$0xff]   ;;  %v3629_v14 = vld [vmem:[#allocation6 + $0x5ec] ss:$16 sps:$4 sm:$0xff]  }
  0xf5   :  { %1900 = vmatpush1.bf16.msra.mxu1 %v3577_v16  ;;  %v3632_v16 = vld [vmem:[#allocation6 + $0x60c] ss:$16 sps:$4 sm:$0xff]  }
  0xf6   :  { %1818 = vmatpush1.bf16.msra.mxu0 %v3574_v15  ;;  %1910 = vmatprep.subr.bf16.mxu1 %v3584_v17  ;;  %v3627_v15 = vld [vmem:[#allocation6 + $0x5e8] ss:$16 sps:$4 sm:$0xff]  }
  0xf7   :  { %2404 = vmatprep.subr.bf16.mxu0 %v3680_v24  ;;  %v3630_v17 = vld [vmem:[#allocation6 + $0x608] ss:$16 sps:$4 sm:$0xff]  }
  0xf8   :  { %1902 = vmatmul.mubr.bf16.vlgmr.msra.gmra.mrb[4].mxu1 %v3987_v7  ;;  %v3684_v7 = vld [vmem:[#allocation8 + $0x20] ss:$8 sps:$4 sm:$0xff]  }
  0xf9   :  { %1820 = vmatmul.mubr.bf16.vlgmr.msra.gmra.mrb[0].mxu0 %v4015_v21  ;;  %1911 = vmatpush1.bf16.msra.mxu1 %v3582_v20  ;;  %v3635_v20 = vld [vmem:[#allocation6 + $0x62c] ss:$16 sps:$4 sm:$0xff]   ;;  %v3636_v24 = vld [vmem:[#allocation6 + $0x648] ss:$16 sps:$4 sm:$0xff]  }
  0xfa   :  { %1942 = vmatprep.mubr.bf16.mxu1 %v3996_v34  ;;  %1912 = vmatprep.subr.bf16.mxu1 %v3587_v22  ;;  %v3687_v34 = vld [vmem:[#allocation8 + $0x30] ss:$8 sps:$4 sm:$0xff]  }
  0xfb   :  { %2405 = vmatpush1.bf16.msra.mxu0 %v3678_v23  ;;  %v3633_v22 = vld [vmem:[#allocation6 + $0x628] ss:$16 sps:$4 sm:$0xff]   ;;  %v3638_v23 = vld [vmem:[#allocation6 + $0x64c] ss:$16 sps:$4 sm:$0xff]  }
  0xfc   :  { %2406 = vmatprep.subr.bf16.mxu0 %v3683_v26  ;;  %v3639_v26 = vld [vmem:[#allocation6 + $0x668] ss:$16 sps:$4 sm:$0xff]  }
  0xfd   :  { %1913 = vmatpush1.bf16.msra.mxu1 %v3585_v25  ;;  %v3641_v25 = vld [vmem:[#allocation6 + $0x66c] ss:$16 sps:$4 sm:$0xff]  }
  0xfe   :  { %1914 = vmatprep.subr.bf16.mxu1 %v3590_v6  ;;  %v3644_v6 = vld [vmem:[#allocation6 + $0x68c] ss:$16 sps:$4 sm:$0xff]  }
  0xff   :  { %2407 = vmatpush1.bf16.msra.mxu0 %v3681_v18  ;;  %v3642_v18 = vld [vmem:[#allocation6 + $0x688] ss:$16 sps:$4 sm:$0xff]  }
 0x100   :  { %2408 = vmatprep.subr.bf16.mxu0 %v3686_v27  ;;  %v3647_v27 = vld [vmem:[#allocation6 + $0x6ac] ss:$16 sps:$4 sm:$0xff]  }
 0x101   :  { %1915 = vmatpush1.bf16.msra.mxu1 %v3588_v28  ;;  %v3650_v28 = vld [vmem:[#allocation6 + $0x6cc] ss:$16 sps:$4 sm:$0xff]  }
 0x102   :  { %1916 = vmatprep.subr.bf16.mxu1 %v3593_v29 }
 0x103   :  { %2409 = vmatpush1.bf16.msra.mxu0 %v3684_v7 }
 0x104   :  { %2410 = vmatprep.subr.bf16.mxu0 %v3689_v32  ;;  %v3648_v32 = vld [vmem:[#allocation6 + $0x6c8] ss:$16 sps:$4 sm:$0xff]  }
 0x105   :  { %1917 = vmatpush1.bf16.msra.mxu1 %v3591_v30  ;;  %v3720_v30 = vld [vmem:[#allocation8 + $0xe0] ss:$8 sps:$4 sm:$0xff]  }
 0x106   :  { %1918 = vmatprep.subr.bf16.mxu1 %v3596_v31 }
 0x107   :  { %2411 = vmatpush1.bf16.msra.mxu0 %v3687_v34 }
 0x108   :  { %2412 = vmatprep.subr.bf16.mxu0 %v3692_v51  ;;  %v3653_v51 = vld [vmem:[#allocation6 + $0x6ec] ss:$16 sps:$4 sm:$0xff]  }
 0x109   :  { %1919 = vmatpush1.bf16.msra.mxu1 %v3594_v33  ;;  %v3725_v33 = vld [vmem:[#allocation8 + $0xf4] ss:$8 sps:$4 sm:$0xff]  }
 0x10a   :  { %1920 = vmatprep.subr.bf16.mxu1 %v3599_v35  ;;  %v3723_v35 = vld [vmem:[#allocation8 + $0xf0] ss:$8 sps:$4 sm:$0xff]  }
 0x10b   :  { %2413 = vmatpush1.bf16.msra.mxu0 %v3690_v36  ;;  %v3651_v36 = vld [vmem:[#allocation6 + $0x6e8] ss:$16 sps:$4 sm:$0xff]  }
 0x10c   :  { %2414 = vmatprep.subr.bf16.mxu0 %v3695_v37  ;;  %v3656_v37 = vld [vmem:[#allocation6 + $0x70c] ss:$16 sps:$4 sm:$0xff]  }
 0x10d   :  { %1921 = vmatpush1.bf16.msra.mxu1 %v3597_v38  ;;  %v3654_v38 = vld [vmem:[#allocation6 + $0x708] ss:$16 sps:$4 sm:$0xff]  }
 0x10e   :  { %1922 = vmatprep.subr.bf16.mxu1 %v3602_v39  ;;  %v3728_v39 = vld [vmem:[#allocation8 + $0x104] ss:$8 sps:$4 sm:$0xff]  }
 0x10f   :  { %2415 = vmatpush1.bf16.msra.mxu0 %v3693_v40  ;;  %v3659_v40 = vld [vmem:[#allocation6 + $0x72c] ss:$16 sps:$4 sm:$0xff]  }
 0x110   :  { %2416 = vmatprep.subr.bf16.mxu0 %v3698_v41  ;;  %v3657_v41 = vld [vmem:[#allocation6 + $0x728] ss:$16 sps:$4 sm:$0xff]  }
 0x111   :  { %1923 = vmatpush1.bf16.msra.mxu1 %v3600_v42  ;;  %v3662_v42 = vld [vmem:[#allocation6 + $0x74c] ss:$16 sps:$4 sm:$0xff]  }
 0x112   :  { %1924 = vmatprep.subr.bf16.mxu1 %v3605_v43  ;;  %v3660_v43 = vld [vmem:[#allocation6 + $0x748] ss:$16 sps:$4 sm:$0xff]  }
 0x113   :  { %2417 = vmatpush1.bf16.msra.mxu0 %v3696_v44  ;;  %v3665_v44 = vld [vmem:[#allocation6 + $0x76c] ss:$16 sps:$4 sm:$0xff]  }
 0x114   :  { %2418 = vmatprep.subr.bf16.mxu0 %v3701_v45  ;;  %v3663_v45 = vld [vmem:[#allocation6 + $0x768] ss:$16 sps:$4 sm:$0xff]  }
 0x115   :  { %1925 = vmatpush1.bf16.msra.mxu1 %v3603_v46  ;;  %v3668_v46 = vld [vmem:[#allocation6 + $0x78c] ss:$16 sps:$4 sm:$0xff]  }
 0x116   :  { %1926 = vmatprep.subr.bf16.mxu1 %v3608_v47  ;;  %v3666_v47 = vld [vmem:[#allocation6 + $0x788] ss:$16 sps:$4 sm:$0xff]  }
 0x117   :  { %2419 = vmatpush1.bf16.msra.mxu0 %v3699_v48  ;;  %v3671_v48 = vld [vmem:[#allocation6 + $0x7ac] ss:$16 sps:$4 sm:$0xff]  }
 0x118   :  { %2420 = vmatprep.subr.bf16.mxu0 %v3704_v49  ;;  %v3669_v49 = vld [vmem:[#allocation6 + $0x7a8] ss:$16 sps:$4 sm:$0xff]  }
 0x119   :  { %1927 = vmatpush1.bf16.msra.mxu1 %v3606_v50  ;;  %v3674_v50 = vld [vmem:[#allocation6 + $0x7cc] ss:$16 sps:$4 sm:$0xff]  }
 0x11a   :  { %1928 = vmatprep.subr.bf16.mxu1 %v3611_v52  ;;  %v3672_v52 = vld [vmem:[#allocation6 + $0x7c8] ss:$16 sps:$4 sm:$0xff]  }
 0x11b   :  { %2421 = vmatpush1.bf16.msra.mxu0 %v3702_v53  ;;  %v3677_v53 = vld [vmem:[#allocation6 + $0x7ec] ss:$16 sps:$4 sm:$0xff]  }
 0x11c   :  { %2422 = vmatprep.subr.bf16.mxu0 %v3707_v54  ;;  %v3675_v54 = vld [vmem:[#allocation6 + $0x7e8] ss:$16 sps:$4 sm:$0xff]  }
 0x11d   :  { %1929 = vmatpush1.bf16.msra.mxu1 %v3609_v55  ;;  %v336_v55 = vlaneseq }
 0x11e   :  { %1930 = vmatprep.subr.bf16.mxu1 %v3614_v56 }
 0x11f   :  { %2423 = vmatpush1.bf16.msra.mxu0 %v3705_v57  ;;  %v4023_v56 = vshrl.u32 %v336_v55, 7 }
 0x120   :  { %2424 = vmatprep.subr.bf16.mxu0 %v3710_v58  ;;  %v4029_v58 = vld [vmem:[%s4181_s2] sm:$0xf] }
 0x121   :  { %1931 = vmatpush1.bf16.msra.mxu1 %v3612_v59  ;;  %v338_v57 = vsub.s32 0, %v4023_v56  ;;  %v342_v59 = vsub.s32 1, %v4023_v56  ;;  %v346_v55 = vsub.s32 2, %v4023_v56 }
 0x122   :  { %1932 = vmatprep.subr.bf16.mxu1 %v3617_v60 }
 0x123   :  { %2425 = vmatpush1.bf16.msra.mxu0 %v3708_v61  ;;  %v339_v60 = vrot.slane %v4029_v58, %v338_v57 }
 0x124   :  { %2426 = vmatprep.subr.bf16.mxu0 %v3713_v62 }
 0x125   :  { %1933 = vmatpush1.bf16.msra.mxu1 %v3615_v63 }
 0x126   :  { %1934 = vmatprep.subr.bf16.mxu1 %v3620_v0 }
 0x127   :  { %2427 = vmatpush1.bf16.msra.mxu0 %v3711_v1 }
 0x128   :  { %2428 = vmatprep.subr.bf16.mxu0 %v3716_v2 }
 0x129   :  { %1935 = vmatpush1.bf16.msra.mxu1 %v3618_v3 }
 0x12a   :  { %1936 = vmatprep.subr.bf16.mxu1 %v3623_v4 }
 0x12b   :  { %2429 = vmatpush1.bf16.msra.mxu0 %v3714_v5 }
 0x12c   :  { %2430 = vmatprep.subr.bf16.mxu0 %v3719_v8 }
 0x12d   :  { %1937 = vmatpush1.bf16.msra.mxu1 %v3621_v9 }
 0x12e   :  { %1938 = vmatprep.subr.bf16.mxu1 %v3626_v10 }
 0x12f   :  { %2431 = vmatpush1.bf16.msra.mxu0 %v3717_v11 }
 0x131   :  { %1939 = vmatpush1.bf16.msra.mxu1 %v3624_v12  ;;  %v3726_v12 = vld [vmem:[#allocation8 + $0x100] ss:$8 sps:$4 sm:$0xff]  }
 0x132   :  { %1940 = vmatprep.subr.bf16.mxu1 %v3629_v14 }
 0x135   :  { %1941 = vmatpush1.bf16.msra.mxu1 %v3627_v15  ;;  %v3731_v15 = vld [vmem:[#allocation8 + $0x114] ss:$8 sps:$4 sm:$0xff]  }
 0x136   :  { %1951 = vmatprep.subr.bf16.mxu1 %v3632_v16  ;;  %v3774_v16 = vld [vmem:[%s4184_s5 + $0x40] sm:$0xff]  }
 0x138   :  { %1943 = vmatmul.mubr.bf16.vlgmr.msra.gmra.mrb[4].mxu1 %v4001_v13  ;;  %v3645_v13 = vld [vmem:[#allocation6 + $0x6a8] ss:$16 sps:$4 sm:$0xff]  }
 0x139   :  { %1952 = vmatpush1.bf16.msra.mxu1 %v3630_v17  ;;  %1983 = vmatprep.mubr.bf16.mxu1 %v4007_v19  ;;  %v3722_v19 = vld [vmem:[#allocation8 + $0xe4] ss:$8 sps:$4 sm:$0xff]  }
 0x13a   :  { %1953 = vmatprep.subr.bf16.mxu1 %v3635_v20  ;;  %2432 = vmatprep.subr.bf16.mxu0 %v3722_v19  ;;  %v3775_v17 = vld [vmem:[%s4184_s5] sm:$0xff]   ;;  %v3776_v20 = vld [vmem:[%s4184_s5 + $0x48] sm:$0xff]  }
 0x13b   :  { %2433 = vmatpush1.bf16.msra.mxu0 %v3720_v30  ;;  %v3782_v19 = vld [vmem:[%s4184_s5 + $0x60] sm:$0xff]   ;;  %v3743_v30 = vld [vmem:[#allocation8 + $0x154] ss:$8 sps:$4 sm:$0xff]  }
 0x13c   :  { %2434 = vmatprep.subr.bf16.mxu0 %v3725_v33  ;;  %v3785_v33 = vld [vmem:[%s4184_s5 + $0x28] sm:$0xff]  }
 0x13d   :  { %1954 = vmatpush1.bf16.msra.mxu1 %v3633_v22  ;;  %v3729_v22 = vld [vmem:[#allocation8 + $0x110] ss:$8 sps:$4 sm:$0xff]  }
 0x13e   :  { %1955 = vmatprep.subr.bf16.mxu1 %v3638_v23  ;;  %v3734_v23 = vld [vmem:[#allocation8 + $0x124] ss:$8 sps:$4 sm:$0xff]  }
 0x13f   :  { %2435 = vmatpush1.bf16.msra.mxu0 %v3723_v35  ;;  %v3744_v35 = vld [vmem:[#allocation8 + $0x160] ss:$8 sps:$4 sm:$0xff]  }
 0x140   :  { %2445 = vmatprep.subr.bf16.mxu0 %v3728_v39  ;;  %v3750_v39 = vld [vmem:[#allocation8 + $0x180] ss:$8 sps:$4 sm:$0xff]  }
 0x141   :  { %1956 = vmatpush1.bf16.msra.mxu1 %v3636_v24  ;;  %v3777_v24 = vld [vmem:[%s4184_s5 + $0x8] sm:$0xff]  }
 0x142   :  { %1957 = vmatprep.subr.bf16.mxu1 %v3641_v25  ;;  %v3778_v25 = vld [vmem:[%s4184_s5 + $0x50] sm:$0xff]  }
 0x145   :  { %1958 = vmatpush1.bf16.msra.mxu1 %v3639_v26  ;;  %v3732_v26 = vld [vmem:[#allocation8 + $0x120] ss:$8 sps:$4 sm:$0xff]  }
 0x146   :  { %1959 = vmatprep.subr.bf16.mxu1 %v3644_v6  ;;  %v3737_v6 = vld [vmem:[#allocation8 + $0x134] ss:$8 sps:$4 sm:$0xff]  }
 0x149   :  { %1960 = vmatpush1.bf16.msra.mxu1 %v3642_v18  ;;  %v3779_v18 = vld [vmem:[%s4184_s5 + $0x10] sm:$0xff]  }
 0x14a   :  { %1961 = vmatprep.subr.bf16.mxu1 %v3647_v27  ;;  %v3780_v27 = vld [vmem:[%s4184_s5 + $0x58] sm:$0xff]  }
 0x14b   :  { %v1698_v29 = vpop.f32.mrb[0].mxu1 }
 0x14c   :  { %v1700_v7 = vpop.f32.mrb[1].mxu1  ;;  %v1699_v61 = vadd.f32 %v1698_v29, %v339_v60  ;;  %v3781_v29 = vld [vmem:[%s4184_s5 + $0x18] sm:$0xff]   ;;  %v350_v60 = vsub.s32 3, %v4023_v56  ;;  %v2704_v56 = vld [vmem:[%s4186_s7] sm:$0xff] }
 0x14d   :  { %v1702_v31 = vpop.f32.mrb[2].mxu1  ;;  %1962 = vmatpush1.bf16.msra.mxu1 %v3645_v13  ;;  %v3735_v13 = vld [vmem:[#allocation8 + $0x130] ss:$8 sps:$4 sm:$0xff]  }
 0x14e   :  { %v1703_v34 = vpop.f32.mrb[3].mxu1  ;;  %1963 = vmatprep.subr.bf16.mxu1 %v3650_v28  ;;  %v3740_v28 = vld [vmem:[#allocation8 + $0x144] ss:$8 sps:$4 sm:$0xff]  }
 0x14f   :  { %v3783_v31 = vld [vmem:[%s4184_s5 + $0x20] sm:$0xff]   ;;  %v3741_v34 = vld [vmem:[#allocation8 + $0x150] ss:$8 sps:$4 sm:$0xff]  }
 0x151   :  { %1964 = vmatpush1.bf16.msra.mxu1 %v3648_v32  ;;  %v3784_v32 = vld [vmem:[%s4184_s5 + $0x68] sm:$0xff]  }
 0x152   :  { %1965 = vmatprep.subr.bf16.mxu1 %v3653_v51  ;;  %v3746_v51 = vld [vmem:[#allocation8 + $0x164] ss:$8 sps:$4 sm:$0xff]  }
 0x155   :  { %1966 = vmatpush1.bf16.msra.mxu1 %v3651_v36  ;;  %v3749_v36 = vld [vmem:[#allocation8 + $0x174] ss:$8 sps:$4 sm:$0xff]  }
 0x156   :  { %1967 = vmatprep.subr.bf16.mxu1 %v3656_v37  ;;  %v3747_v37 = vld [vmem:[#allocation8 + $0x170] ss:$8 sps:$4 sm:$0xff]  }
 0x159   :  { %1968 = vmatpush1.bf16.msra.mxu1 %v3654_v38  ;;  %v3752_v38 = vld [vmem:[#allocation8 + $0x184] ss:$8 sps:$4 sm:$0xff]  }
 0x15a   :  { %1969 = vmatprep.subr.bf16.mxu1 %v3659_v40  ;;  %v3755_v40 = vld [vmem:[#allocation8 + $0x194] ss:$8 sps:$4 sm:$0xff]  }
 0x15d   :  { %1970 = vmatpush1.bf16.msra.mxu1 %v3657_v41  ;;  %v3753_v41 = vld [vmem:[#allocation8 + $0x190] ss:$8 sps:$4 sm:$0xff]  }
 0x15e   :  { %1971 = vmatprep.subr.bf16.mxu1 %v3662_v42  ;;  %v3758_v42 = vld [vmem:[#allocation8 + $0x1a4] ss:$8 sps:$4 sm:$0xff]  }
 0x161   :  { %1972 = vmatpush1.bf16.msra.mxu1 %v3660_v43  ;;  %v3756_v43 = vld [vmem:[#allocation8 + $0x1a0] ss:$8 sps:$4 sm:$0xff]  }
 0x162   :  { %1973 = vmatprep.subr.bf16.mxu1 %v3665_v44  ;;  %v3761_v44 = vld [vmem:[#allocation8 + $0x1b4] ss:$8 sps:$4 sm:$0xff]  }
 0x165   :  { %1974 = vmatpush1.bf16.msra.mxu1 %v3663_v45  ;;  %v3759_v45 = vld [vmem:[#allocation8 + $0x1b0] ss:$8 sps:$4 sm:$0xff]  }
 0x166   :  { %1975 = vmatprep.subr.bf16.mxu1 %v3668_v46  ;;  %v3764_v46 = vld [vmem:[#allocation8 + $0x1c4] ss:$8 sps:$4 sm:$0xff]  }
 0x169   :  { %1976 = vmatpush1.bf16.msra.mxu1 %v3666_v47  ;;  %v3762_v47 = vld [vmem:[#allocation8 + $0x1c0] ss:$8 sps:$4 sm:$0xff]  }
 0x16a   :  { %1977 = vmatprep.subr.bf16.mxu1 %v3671_v48  ;;  %v3767_v48 = vld [vmem:[#allocation8 + $0x1d4] ss:$8 sps:$4 sm:$0xff]  }
 0x16d   :  { %1978 = vmatpush1.bf16.msra.mxu1 %v3669_v49  ;;  %v3765_v49 = vld [vmem:[#allocation8 + $0x1d0] ss:$8 sps:$4 sm:$0xff]  }
 0x16e   :  { %1979 = vmatprep.subr.bf16.mxu1 %v3674_v50  ;;  %v3770_v50 = vld [vmem:[#allocation8 + $0x1e4] ss:$8 sps:$4 sm:$0xff]  }
 0x171   :  { %1980 = vmatpush1.bf16.msra.mxu1 %v3672_v52  ;;  %v3768_v52 = vld [vmem:[#allocation8 + $0x1e0] ss:$8 sps:$4 sm:$0xff]  }
 0x172   :  { %1981 = vmatprep.subr.bf16.mxu1 %v3677_v53  ;;  %v3773_v53 = vld [vmem:[#allocation8 + $0x1f4] ss:$8 sps:$4 sm:$0xff]  }
 0x175   :  { %1982 = vmatpush1.bf16.msra.mxu1 %v3675_v54  ;;  %v3771_v54 = vld [vmem:[#allocation8 + $0x1f0] ss:$8 sps:$4 sm:$0xff]  }
 0x176   :  { %3220 = vmatprep.subr.bf16.mxu1 %v3774_v16  ;;  %v2706_v16 = vld [vmem:[%s4186_s7 + $0x10] sm:$0xff] }
 0x178   :  { %1984 = vmatmul.mubr.bf16.vlgmr.msra.gmra.mrb[4].mxu1 %v4015_v21  ;;  %v343_v21 = vrot.slane %v4029_v58, %v342_v59 }
 0x179   :  { %3221 = vmatpush3.bf16.msra.mxu1 %v3775_v17  ;;  %v3891_v17 = vmov 0  }
 0x17a   :  { %v1701_v62 = vadd.f32 %v1700_v7, %v343_v21  ;;  %3222 = vmatprep.subr.bf16.mxu1 %v3776_v20  ;;  %v3738_v7 = vld [vmem:[#allocation8 + $0x140] ss:$8 sps:$4 sm:$0xff]   ;;  %v347_v21 = vrot.slane %v4029_v58, %v346_v55  ;;  %3285 = vset.pattern.permute.xlu1 %v3891_v17  ;;  %v2707_v20 = vld [vmem:[%s4186_s7 + $0x18] sm:$0xff] }
 0x17b   :  { %3284 = vset.pattern.permute.xlu0 %v3891_v17  ;;  %2732 = vperm.xlu1 %3285, %v2706_v16  }
 0x17c   :  { %2722 = vperm.xlu0 %3284, %v2704_v56  }
 0x17d   :  { %3223 = vmatpush3.bf16.msra.mxu1 %v3777_v24  ;;  %v2713_v24 = vld [vmem:[%s4186_s7 + $0x48] sm:$0xff] }
 0x17e   :  { %3224 = vmatprep.subr.bf16.mxu1 %v3778_v25  ;;  %v2715_v25 = vld [vmem:[%s4186_s7 + $0x58] sm:$0xff] }
 0x17f   :  { %2737 = vperm.xlu1 %3285, %v2707_v20  }
 0x181   :  { %3225 = vmatpush3.bf16.msra.mxu1 %v3779_v18 }
 0x182   :  { %3226 = vmatprep.subr.bf16.mxu1 %v3780_v27 }
 0x185   :  { %3227 = vmatpush3.bf16.msra.mxu1 %v3781_v29 }
 0x186   :  { %3228 = vmatprep.subr.bf16.mxu1 %v3782_v19 }
 0x189   :  { %3229 = vmatpush3.bf16.msra.mxu1 %v3783_v31 }
 0x18a   :  { %3230 = vmatprep.subr.bf16.mxu1 %v3784_v32 }
 0x18d   :  { %3231 = vmatpush3.bf16.msra.mxu1 %v3785_v33 }
 0x1cc   :  { %v1821_v63 = vpop.f32.mrb[0].mxu0 }
 0x1cd   :  { %v3243_v0 = vadd.f32 %v1821_v63, %v1699_v61  ;;  %v1823_v1 = vpop.f32.mrb[1].mxu0  ;;  %v351_v61 = vrot.slane %v4029_v58, %v350_v60  ;;  %v3786_v58 = vld [vmem:[%s4184_s5 + $0x70] sm:$0xff]  }
 0x1ce   :  { %v3245_v2 = vadd.f32 %v1823_v1, %v1701_v62  ;;  %v1825_v3 = vpop.f32.mrb[2].mxu0  ;;  %3232 = vmatprep.subr.bf16.mxu1 %v3786_v58 }
 0x1cf   :  { %vm1992_vm0 = vcmp.ge.f32.partialorder %v3243_v0, 0.0  ;;  %v1996_v4 = vmul.f32 0.2, %v3243_v0  ;;  %v1826_v5 = vpop.f32.mrb[3].mxu0 }
 0x1d0   :  { %vm1993_vm1 = vcmp.ge.f32.partialorder %v3245_v2, 0.0  ;;  %v1997_v8 = vmul.f32 0.2, %v3245_v2 }
 0x1d1   :  { %v2000_v9 = vsel %vm1992_vm0, %v3243_v0, %v1996_v4 }
 0x1d2   :  { %v2001_v10 = vsel %vm1993_vm1, %v3245_v2, %v1997_v8  ;;  %v2004_v14 = vpack.c.bf16 %v2000_v9, %v2000_v9 }
 0x1d3   :  { %v2005_v11 = vpack.c.bf16 %v2001_v10, %v2001_v10 }
 0x1d5   :  { %2436 = vmatprep.mubr.bf16.mxu0 %v2005_v11 }
 0x1d6   :  { %2437 = vmatmul.mubr.bf16.vlgmr.msra.gmra.mrb[4].mxu0 %v2004_v14  ;;  %v3788_v14 = vld [vmem:[%s4184_s5 + $0x78] sm:$0xff]  }
 0x1d7   :  { %2446 = vmatpush1.bf16.msra.mxu0 %v3726_v12  ;;  %v3787_v12 = vld [vmem:[%s4184_s5 + $0x30] sm:$0xff]  }
 0x1d8   :  { %2447 = vmatprep.subr.bf16.mxu0 %v3731_v15  ;;  %3233 = vmatpush3.bf16.msra.mxu1 %v3787_v12  ;;  %v3789_v15 = vld [vmem:[%s4184_s5 + $0x38] sm:$0xff]  }
 0x1d9   :  { %3234 = vmatprep.subr.bf16.mxu1 %v3788_v14 }
 0x1db   :  { %2448 = vmatpush1.bf16.msra.mxu0 %v3729_v22  ;;  %v2709_v22 = vld [vmem:[%s4186_s7 + $0x28] sm:$0xff] }
 0x1dc   :  { %2449 = vmatprep.subr.bf16.mxu0 %v3734_v23  ;;  %3235 = vmatpush3.bf16.msra.mxu1 %v3789_v15  ;;  %v2711_v23 = vld [vmem:[%s4186_s7 + $0x38] sm:$0xff] }
 0x1dd   :  { %2747 = vperm.xlu1 %3285, %v2709_v22  }
 0x1df   :  { %2450 = vmatpush1.bf16.msra.mxu0 %v3732_v26  ;;  %v2717_v26 = vld [vmem:[%s4186_s7 + $0x68] sm:$0xff] }
 0x1e0   :  { %2451 = vmatprep.subr.bf16.mxu0 %v3737_v6  ;;  %v2072_v6 = vld [vmem:[%s4183_s4] sm:$0x3] }
 0x1e1   :  { %2757 = vperm.xlu1 %3285, %v2711_v23   ;;  %v2077_v18 = vrot.slane %v2072_v6, %v338_v57  ;;  %v2081_v27 = vrot.slane %v2072_v6, %v342_v59  ;;  %v2705_v57 = vld [vmem:[%s4186_s7 + $0x8] sm:$0xff]  ;;  %v2708_v59 = vld [vmem:[%s4186_s7 + $0x20] sm:$0xff] }
 0x1e2   :  { %2727 = vperm.xlu0 %3284, %v2705_v57  }
 0x1e3   :  { %2452 = vmatpush1.bf16.msra.mxu0 %v3735_v13 }
 0x1e4   :  { %2453 = vmatprep.subr.bf16.mxu0 %v3740_v28 }
 0x1e5   :  { %2767 = vperm.xlu1 %3285, %v2713_v24  }
 0x1e6   :  { %2742 = vperm.xlu0 %3284, %v2708_v59  }
 0x1e7   :  { %2454 = vmatpush1.bf16.msra.mxu0 %v3738_v7 }
 0x1e8   :  { %2455 = vmatprep.subr.bf16.mxu0 %v3743_v30 }
 0x1e9   :  { %2777 = vperm.xlu1 %3285, %v2715_v25  }
 0x1eb   :  { %2456 = vmatpush1.bf16.msra.mxu0 %v3741_v34 }
 0x1ec   :  { %2457 = vmatprep.subr.bf16.mxu0 %v3746_v51 }
 0x1ed   :  { %2787 = vperm.xlu1 %3285, %v2717_v26  }
 0x1ef   :  { %2458 = vmatpush1.bf16.msra.mxu0 %v3744_v35 }
 0x1f0   :  { %2459 = vmatprep.subr.bf16.mxu0 %v3749_v36  ;;  %v2710_v36 = vld [vmem:[%s4186_s7 + $0x30] sm:$0xff] }
 0x1f1   :  { %2752 = vperm.xlu0 %3284, %v2710_v36  }
 0x1f3   :  { %2460 = vmatpush1.bf16.msra.mxu0 %v3747_v37  ;;  %v2712_v37 = vld [vmem:[%s4186_s7 + $0x40] sm:$0xff] }
 0x1f4   :  { %2461 = vmatprep.subr.bf16.mxu0 %v3752_v38  ;;  %v2714_v38 = vld [vmem:[%s4186_s7 + $0x50] sm:$0xff] }
 0x1f5   :  { %2762 = vperm.xlu0 %3284, %v2712_v37  }
 0x1f7   :  { %2462 = vmatpush1.bf16.msra.mxu0 %v3750_v39  ;;  %v2716_v39 = vld [vmem:[%s4186_s7 + $0x60] sm:$0xff] }
 0x1f8   :  { %2463 = vmatprep.subr.bf16.mxu0 %v3755_v40  ;;  %v2718_v40 = vld [vmem:[%s4186_s7 + $0x70] sm:$0xff] }
 0x1f9   :  { %2772 = vperm.xlu0 %3284, %v2714_v38  }
 0x1fb   :  { %2464 = vmatpush1.bf16.msra.mxu0 %v3753_v41  ;;  %v2719_v41 = vld [vmem:[%s4186_s7 + $0x78] sm:$0xff] }
 0x1fc   :  { %2465 = vmatprep.subr.bf16.mxu0 %v3758_v42 }
 0x1fd   :  { %2782 = vperm.xlu0 %3284, %v2716_v39  }
 0x1ff   :  { %2466 = vmatpush1.bf16.msra.mxu0 %v3756_v43  ;;  %v3203_v43 = vld [vmem:[%s4185_s6] ss:$0 sm:$0xff] }
 0x200   :  { %2467 = vmatprep.subr.bf16.mxu0 %v3761_v44 }
 0x201   :  { %2792 = vperm.xlu0 %3284, %v2718_v40  }
 0x203   :  { %2468 = vmatpush1.bf16.msra.mxu0 %v3759_v45 }
 0x204   :  { %2469 = vmatprep.subr.bf16.mxu0 %v3764_v46 }
 0x205   :  { %2797 = vperm.xlu0 %3284, %v2719_v41  }
 0x207   :  { %2470 = vmatpush1.bf16.msra.mxu0 %v3762_v47 }
 0x208   :  { %2471 = vmatprep.subr.bf16.mxu0 %v3767_v48 }
 0x20b   :  { %2472 = vmatpush1.bf16.msra.mxu0 %v3765_v49 }
 0x20c   :  { %2473 = vmatprep.subr.bf16.mxu0 %v3770_v50 }
 0x20f   :  { %2474 = vmatpush1.bf16.msra.mxu0 %v3768_v52  ;;  %v2733_v52 = vpop.permute.xlu1 %2732 }
 0x210   :  { %2475 = vmatprep.subr.bf16.mxu0 %v3773_v53 }
 0x213   :  { %2476 = vmatpush1.bf16.msra.mxu0 %v3771_v54  ;;  %v2738_v53 = vpop.permute.xlu1 %2737 }
 0x24b   :  { %v1985_v62 = vpop.f32.mrb[4].mxu1 }
 0x24c   :  { %v3246_v63 = vadd.f32 %v1985_v62, %v347_v21  ;;  %v1987_v0 = vpop.f32.mrb[5].mxu1 }
 0x24d   :  { %v3247_v1 = vadd.f32 %v1987_v0, %v351_v61  ;;  %v1989_v2 = vpop.f32.mrb[6].mxu1 }
 0x24e   :  { %vm1994_vm2 = vcmp.ge.f32.partialorder %v3246_v63, 0.0  ;;  %v1998_v3 = vmul.f32 0.2, %v3246_v63  ;;  %v1990_v4 = vpop.f32.mrb[7].mxu1 }
 0x24f   :  { %vm1995_vm3 = vcmp.ge.f32.partialorder %v3247_v1, 0.0  ;;  %v1999_v5 = vmul.f32 0.2, %v3247_v1 }
 0x250   :  { %v2002_v8 = vsel %vm1994_vm2, %v3246_v63, %v1998_v3 }
 0x251   :  { %v2003_v9 = vsel %vm1995_vm3, %v3247_v1, %v1999_v5  ;;  %v2006_v11 = vpack.c.bf16 %v2002_v8, %v2002_v8  ;;  %v2723_v1 = vpop.permute.xlu0 %2722 }
 0x252   :  { %v2007_v10 = vpack.c.bf16 %v2003_v9, %v2003_v9 }
 0x254   :  { %2477 = vmatprep.mubr.bf16.mxu0 %v2007_v10 }
 0x255   :  { %2478 = vmatmul.mubr.bf16.vlgmr.msra.gmra.mrb[4].mxu0 %v2006_v11 }
 0x25c   :  { %v2748_v54 = vpop.permute.xlu1 %2747 }
 0x260   :  { %v2758_v55 = vpop.permute.xlu1 %2757 }
 0x261   :  { %v2728_v4 = vpop.permute.xlu0 %2727 }
 0x264   :  { %v2768_v60 = vpop.permute.xlu1 %2767 }
 0x265   :  { %v2743_v8 = vpop.permute.xlu0 %2742 }
 0x268   :  { %v2778_v21 = vpop.permute.xlu1 %2777 }
 0x26c   :  { %v2788_v61 = vpop.permute.xlu1 %2787 }
 0x270   :  { %v2753_v58 = vpop.permute.xlu0 %2752 }
 0x274   :  { %v2763_v25 = vpop.permute.xlu0 %2762 }
 0x328   :  { %v2479_v13 = vpop.f32.mrb[4].mxu0 }
 0x329   :  { %v3248_v28 = vadd.f32 %v2479_v13, %v2077_v18  ;;  %v2481_v29 = vpop.f32.mrb[5].mxu0 }
 0x32a   :  { %v3249_v19 = vadd.f32 %v2481_v29, %v2081_v27  ;;  %v2483_v7 = vpop.f32.mrb[6].mxu0 }
 0x32b   :  { %vm2486_vm4 = vcmp.ge.f32.partialorder %v3248_v28, 0.0  ;;  %v2488_v30 = vmul.f32 0.2, %v3248_v28  ;;  %v2484_v31 = vpop.f32.mrb[7].mxu0 }
 0x32c   :  { %vm2487_vm5 = vcmp.ge.f32.partialorder %v3249_v19, 0.0  ;;  %v2489_v32 = vmul.f32 0.2, %v3249_v19  ;;  %v2773_v31 = vpop.permute.xlu0 %2772 }
 0x32d   :  { %v2490_v34 = vsel %vm2486_vm4, %v3248_v28, %v2488_v30 }
 0x32e   :  { %v2491_v51 = vsel %vm2487_vm5, %v3249_v19, %v2489_v32  ;;  %v2492_v35 = vpack.c.bf16 %v2490_v34, %v2490_v34 }
 0x32f   :  { %v2493_v33 = vpack.c.bf16 %v2491_v51, %v2491_v51 }
 0x330   :  { %v2783_v38 = vpop.permute.xlu0 %2782 }
 0x331   :  { %2661 = vmatprep.mubr.bf16.mxu1 %v2493_v33 }
 0x332   :  { %2662 = vmatmul.mubr.bf16.vlgmr.msra.gmra.mrb[8].mxu1 %v2492_v35 }
 0x405   :  { %v3236_v42 = vpop.f32.mrb[8].mxu1 }
 0x406   :  { %v3237_v44 = vpop.f32.mrb[9].mxu1 }
 0x407   :  { %v3238_v45 = vadd.f32 %v3237_v44, %v3236_v42  ;;  %v3239_v46 = vpop.f32.mrb[10].mxu1 }
 0x408   :  { %v3240_v47 = vpop.f32.mrb[11].mxu1 }
 0x409   :  { %v2664_v48 = vadd.f32 %v3238_v45, %v3203_v43 }
 0x40b   :  { %vm2669_vm6 = vcmp.ge.f32.partialorder %v2664_v48, 0.0  ;;  %v2670_v49 = vmul.f32 0.2, %v2664_v48 }
 0x40d   :  { %v2671_v50 = vsel %vm2669_vm6, %v2664_v48, %v2670_v49 }
 0x40e   :  { %2672 = vxpose.xlu1.b32.start.end [1/1] (short) %v2671_v50, 128  ;;  %v2793_v50 = vpop.permute.xlu0 %2792 }
 0x48e   :  { %v2688_v62 = vpop.trf.xlu1 }
 0x48f   :  { %v2800_v12 = vmul.f32 %v2723_v1, %v2688_v62 }
 0x491   :  { %v2817_v20 = vsel %vm2816_vm7, %v2800_v12, 0.0  ;;  %v2855_v12 = vstv %s4187_s8 }
 0x492   :  { %v2689_v63 = vpop.trf.xlu1 }
 0x493   :  { %v2801_v11 = vmul.f32 %v2728_v4, %v2689_v63 }
 0x495   :  { %v2818_v16 = vsel %vm2816_vm7, %v2801_v11, 0.0 }
 0x496   :  { %v2690_v0 = vpop.trf.xlu1  ;;  %v2819_v24 = vadd.f32 %v2818_v16, %v2817_v20 }
 0x497   :  { %v2802_v14 = vmul.f32 %v2733_v52, %v2690_v0  ;;  %v2798_v0 = vpop.permute.xlu0 %2797 }
 0x499   :  { %v2820_v22 = vsel %vm2816_vm7, %v2802_v14, 0.0 }
 0x49a   :  { %v2691_v2 = vpop.trf.xlu1  ;;  %v2821_v27 = vadd.f32 %v2820_v22, %v2819_v24 }
 0x49b   :  { %v2803_v17 = vmul.f32 %v2738_v53, %v2691_v2 }
 0x49d   :  { %v2822_v6 = vsel %vm2816_vm7, %v2803_v17, 0.0 }
 0x49e   :  { %v2692_v3 = vpop.trf.xlu1  ;;  %v2823_v29 = vadd.f32 %v2822_v6, %v2821_v27 }
 0x49f   :  { %v2804_v23 = vmul.f32 %v2743_v8, %v2692_v3 }
 0x4a1   :  { %v2824_v13 = vsel %vm2816_vm7, %v2804_v23, 0.0 }
 0x4a2   :  { %v2693_v5 = vpop.trf.xlu1  ;;  %v2825_v32 = vadd.f32 %v2824_v13, %v2823_v29 }
 0x4a3   :  { %v2805_v18 = vmul.f32 %v2748_v54, %v2693_v5 }
 0x4a5   :  { %v2826_v7 = vsel %vm2816_vm7, %v2805_v18, 0.0 }
 0x4a6   :  { %v2694_v9 = vpop.trf.xlu1  ;;  %v2827_v33 = vadd.f32 %v2826_v7, %v2825_v32 }
 0x4a7   :  { %v2806_v28 = vmul.f32 %v2753_v58, %v2694_v9 }
 0x4a9   :  { %v2828_v34 = vsel %vm2816_vm7, %v2806_v28, 0.0 }
 0x4aa   :  { %v2695_v10 = vpop.trf.xlu1  ;;  %v2829_v59 = vadd.f32 %v2828_v34, %v2827_v33 }
 0x4ab   :  { %v2807_v30 = vmul.f32 %v2758_v55, %v2695_v10 }
 0x4ad   :  { %v2830_v56 = vsel %vm2816_vm7, %v2807_v30, 0.0 }
 0x4ae   :  { %v2696_v15 = vpop.trf.xlu1  ;;  %v2831_v39 = vadd.f32 %v2830_v56, %v2829_v59 }
 0x4af   :  { %v2808_v51 = vmul.f32 %v2763_v25, %v2696_v15 }
 0x4b1   :  { %v2832_v36 = vsel %vm2816_vm7, %v2808_v51, 0.0 }
 0x4b2   :  { %v2697_v26 = vpop.trf.xlu1  ;;  %v2833_v43 = vadd.f32 %v2832_v36, %v2831_v39 }
 0x4b3   :  { %v2809_v57 = vmul.f32 %v2768_v60, %v2697_v26 }
 0x4b5   :  { %v2834_v41 = vsel %vm2816_vm7, %v2809_v57, 0.0 }
 0x4b6   :  { %v2698_v19 = vpop.trf.xlu1  ;;  %v2835_v46 = vadd.f32 %v2834_v41, %v2833_v43 }
 0x4b7   :  { %v2810_v37 = vmul.f32 %v2773_v31, %v2698_v19 }
 0x4b9   :  { %v2836_v44 = vsel %vm2816_vm7, %v2810_v37, 0.0 }
 0x4ba   :  { %v2699_v35 = vpop.trf.xlu1  ;;  %v2837_v52 = vadd.f32 %v2836_v44, %v2835_v46 }
 0x4bb   :  { %v2811_v42 = vmul.f32 %v2778_v21, %v2699_v35 }
 0x4bd   :  { %v2838_v48 = vsel %vm2816_vm7, %v2811_v42, 0.0 }
 0x4be   :  { %v2700_v40 = vpop.trf.xlu1  ;;  %v2839_v54 = vadd.f32 %v2838_v48, %v2837_v52 }
 0x4bf   :  { %v2812_v45 = vmul.f32 %v2783_v38, %v2700_v40 }
 0x4c1   :  { %v2840_v53 = vsel %vm2816_vm7, %v2812_v45, 0.0 }
 0x4c2   :  { %v2701_v47 = vpop.trf.xlu1  ;;  %v2841_v63 = vadd.f32 %v2840_v53, %v2839_v54 }
 0x4c3   :  { %v2813_v49 = vmul.f32 %v2788_v61, %v2701_v47 }
 0x4c5   :  { %v2842_v60 = vsel %vm2816_vm7, %v2813_v49, 0.0 }
 0x4c6   :  { %v2702_v55 = vpop.trf.xlu1  ;;  %v2843_v1 = vadd.f32 %v2842_v60, %v2841_v63 }
 0x4c7   :  { %v2814_v62 = vmul.f32 %v2793_v50, %v2702_v55 }
 0x4c9   :  { %v2844_v21 = vsel %vm2816_vm7, %v2814_v62, 0.0 }
 0x4ca   :  { %v2703_v2 = vpop.trf.xlu1  ;;  %v2845_v4 = vadd.f32 %v2844_v21, %v2843_v1 }
 0x4cb   :  { %v2815_v3 = vmul.f32 %v2798_v0, %v2703_v2 }
 0x4cd   :  { %v2846_v5 = vsel %vm2816_vm7, %v2815_v3, 0.0 }
 0x4ce   :  { %v2847_v61 = vadd.f32 %v2846_v5, %v2845_v4 }
 0x4d0   :  { %v2848_v8 = vrot.slane %v2847_v61, 4 }
 0x4d2   :  { %v2849_v9 = vadd.f32 %v2848_v8, %v2847_v61 }
 0x4d4   :  { %v2850_v10 = vrot.slane %v2849_v9, 2 }
 0x4d6   :  { %v2851_v11 = vadd.f32 %v2850_v10, %v2849_v9 }
 0x4d8   :  { %v2852_v58 = vrot.slane %v2851_v11, 1 }
 0x4da   :  { %v2853_v14 = vadd.f32 %v2852_v58, %v2851_v11 }
 0x4dc   :  { %v2856_v15 = vadd.f32 %v2855_v12, %v2853_v14 }
 0x4de   :  { %2858 = vst.msk [vmem:[#allocation9] sm:$0x1] %vm2857_vm8, %v2856_v15 }
 0x4df   :  { %3867 = shalt.err (!%p3864_p0)
}
 0x4e0   :  { %s3868_s24 = scalar_lea.hbm %s4188_s9, 16 }
 0x4e1   :  { %p3869_p1 = scmp.ne.s32.totalorder %s4188_s9, %s3868_s24  ;;  %p3872_p2 = scmp.lt.u32.totalorder %s3868_s24, %s4188_s9 }
 0x4e3   :  { %p3874_p3 = pnand %p3872_p2, %p3869_p1 }
 0x4e5   :  { %3877 = shalt.err (!%p3874_p3)
}
 0x4e6   :  { %2868 = dma.vmem_to_hbm [thread:$0]  %s2866_s20, 16, %s4188_s9, [#allocation5]  }
 0x4e7   :  { %3882 = dma.done.wait [#allocation5], 16  }
 0x4e8   :  { %3883 = vsyncadd [#allocation5], 4294967280 }
 0x4e9   :  { %2872 = vsyncpa [#allocation4], 1 }
 0x4ea   :  { %2873 = vsyncpa [#allocation7], 1 }
 0x4eb   :  { %2874 = vsyncpa [#allocation5], 1 }

// kernel: tpu_custom_call.1
= control target key start
LH: loop header
LB: loop body
LE: loop exit
PB: predicated region body
PF: predicated region fallthrough
CT: control target
= control target key end

     0   :  { %15 = vsyncpa [#allocation4], 0  ;;  %s4179_s0 = inlined_call_operand.hbm [shape: bf16[8,1024], index: 0, kind: input, shape index: {}]   ;;  %s4180_s1 = inlined_call_operand.hbm [shape: bf16[1024,512], index: 1, kind: input, shape index: {}]   ;;  %s4181_s2 = inlined_call_operand.vmem [shape: f32[1,512], index: 2, kind: input, shape index: {}]   ;;  %s4182_s3 = inlined_call_operand.hbm [shape: bf16[512,256], index: 3, kind: input, shape index: {}]   ;;  %s4183_s4 = inlined_call_operand.vmem [shape: f32[1,256], index: 4, kind: input, shape index: {}]   ;;  %s4184_s5 = inlined_call_operand.vmem [shape: bf16[256,128], index: 5, kind: input, shape index: {}]   ;;  %s4185_s6 = inlined_call_operand.vmem [shape: f32[1,128], index: 6, kind: input, shape index: {}]   ;;  %s4186_s7 = inlined_call_operand.vmem [shape: f32[128,1], index: 7, kind: input, shape index: {}]   ;;  %s4187_s8 = inlined_call_operand.<no memory space> [shape: f32[1], index: 8, kind: input, shape index: {}]   ;;  %s4188_s9 = inlined_call_operand.hbm [shape: f32[1,1,8], index: 9, kind: output, shape index: {}]  }
   0x1   :  { %16 = vsyncpa [#allocation7], 0 }
   0x2   :  { %17 = vsyncpa [#allocation5], 0  ;;  %s3884_s30 = smov [#allocation6]   ;;  %s3790_s13 = scalar_lea.hbm %s4180_s1, 32768 }
   0x3   :  { %s33_s10 = sshll.u32 %s3884_s30, 4  ;;  %p3791_p0 = scmp.ne.s32.totalorder %s4180_s1, %s3790_s13  ;;  %s34_s10 = int_to_ptr.vmem [resolvable:$true] %s33_s10 }
   0x4   :  { %p3794_p1 = scmp.lt.u32.totalorder %s3790_s13, %s4180_s1 }
   0x6   :  { %p3796_p2 = pnand %p3794_p1, %p3791_p0 }
   0x8   :  { %3799 = shalt.err (!%p3796_p2)
}
   0x9   :  { %s3800_s18 = scalar_lea.vmem %s34_s10, 32768  ;;  %p3805_p4 = scmp.lt.s32.totalorder %s34_s10, %s34_s10 }
   0xa   :  { %p3801_p3 = scmp.ne.s32.totalorder %s34_s10, %s3800_s18  ;;  %p3806_p5 = scmp.lt.s32.totalorder %s3800_s18, %s3800_s18 }
   0xc   :  { %p3807_p6 = por %p3806_p5, %p3805_p4 }
   0xe   :  { %p3808_p7 = pnand %p3807_p6, %p3801_p3 }
  0x10   :  { %3811 = shalt.err (!%p3808_p7)
}
  0x11   :  { %s3885_s19 = smov 256   ;;  %s3886_s20 = smov 16  }
  0x12   :  { %39 = dma.hbm_to_vmem [thread:$0]  %s4180_s1, 32768, %s34_s10, [#allocation7], %s3885_s19, %s3885_s19, %s3886_s20  }
  0x13   :  { %s3887_s23 = smov [#allocation3]   ;;  %s3888_s25 = smov [#allocation8]  }
  0x14   :  { %s24_s24 = sshll.u32 %s3887_s23, 4  ;;  %s47_s26 = sshll.u32 %s3888_s25, 4  ;;  %s25_s24 = int_to_ptr.vmem [resolvable:$true] %s24_s24  ;;  %s48_s26 = int_to_ptr.vmem [resolvable:$true] %s47_s26 }
  0x15   :  { %s3812_s29 = scalar_lea.hbm %s4179_s0, 512 }
  0x16   :  { %p3813_p8 = scmp.ne.s32.totalorder %s4179_s0, %s3812_s29  ;;  %p3816_p9 = scmp.lt.u32.totalorder %s3812_s29, %s4179_s0 }
  0x18   :  { %p3818_p10 = pnand %p3816_p9, %p3813_p8 }
  0x1a   :  { %3821 = shalt.err (!%p3818_p10)
}
  0x1b   :  { %s3822_s1 = scalar_lea.vmem %s25_s24, 512  ;;  %p3827_p12 = scmp.lt.s32.totalorder %s25_s24, %s25_s24 }
  0x1c   :  { %p3823_p11 = scmp.ne.s32.totalorder %s25_s24, %s3822_s1  ;;  %p3828_p13 = scmp.lt.s32.totalorder %s3822_s1, %s3822_s1 }
  0x1e   :  { %p3829_p0 = por %p3828_p13, %p3827_p12 }
  0x20   :  { %p3830_p1 = pnand %p3829_p0, %p3823_p11 }
  0x22   :  { %3833 = shalt.err (!%p3830_p1)
}
  0x23   :  { %27 = dma.hbm_to_vmem [thread:$0]  %s4179_s0, 512, %s25_s24, [#allocation4]  }
  0x24   :  { %s3834_s17 = scalar_lea.hbm %s4182_s3, 8192 }
  0x25   :  { %p3835_p2 = scmp.ne.s32.totalorder %s4182_s3, %s3834_s17  ;;  %p3838_p3 = scmp.lt.u32.totalorder %s3834_s17, %s4182_s3 }
  0x27   :  { %p3840_p4 = pnand %p3838_p3, %p3835_p2 }
  0x29   :  { %3843 = shalt.err (!%p3840_p4)
}
  0x2a   :  { %s3844_s22 = scalar_lea.vmem %s48_s26, 8192  ;;  %p3849_p6 = scmp.lt.s32.totalorder %s48_s26, %s48_s26 }
  0x2b   :  { %p3845_p5 = scmp.ne.s32.totalorder %s48_s26, %s3844_s22  ;;  %p3850_p7 = scmp.lt.s32.totalorder %s3844_s22, %s3844_s22 }
  0x2d   :  { %p3851_p8 = por %p3850_p7, %p3849_p6 }
  0x2f   :  { %p3852_p9 = pnand %p3851_p8, %p3845_p5 }
  0x31   :  { %3855 = shalt.err (!%p3852_p9)
}
  0x32   :  { %s3889_s0 = smov 128   ;;  %s3890_s23 = smov 8  }
  0x33   :  { %53 = dma.hbm_to_vmem [thread:$0]  %s4182_s3, 8192, %s48_s26, [#allocation7], %s3889_s0, %s3889_s0, %s3890_s23  }
  0x34   :  { %3878 = dma.done.wait [#allocation4], 512  }
  0x35   :  { %3879 = vsyncadd [#allocation4], 4294966784 }
  0x36   :  { %3880 = dma.done.wait [#allocation7], 40960  }
  0x37   :  { %3881 = vsyncadd [#allocation7], 4294926336  ;;  %v3286_v0 = vld [vmem:[#allocation6 + $0x4] ss:$16 sps:$4 sm:$0xff]   ;;  %v3290_v2 = vld [vmem:[#allocation6] ss:$16 sps:$4 sm:$0xff]  }
  0x38   :  { %v3288_v1 = vld [vmem:[#allocation6 + $0x204] ss:$16 sps:$4 sm:$0xff]   ;;  %1664 = vmatprep.subr.bf16.mxu1 %v3286_v0  ;;  %v3291_v3 = vld [vmem:[#allocation6 + $0x200] ss:$16 sps:$4 sm:$0xff]   ;;  %v75_v48 = vld [vmem:[#allocation3 + $0x8] sm:$0xff]  ;;  %vm2816_vm7 = vcmask 64512  }
  0x39   :  { %1705 = vmatprep.subr.bf16.mxu0 %v3288_v1  ;;  %v3292_v4 = vld [vmem:[#allocation6 + $0x24] ss:$16 sps:$4 sm:$0xff]   ;;  %1665 = vmatpush1.bf16.msra.mxu1 %v3290_v2  ;;  %v3296_v6 = vld [vmem:[#allocation6 + $0x20] ss:$16 sps:$4 sm:$0xff]   ;;  %v3981_v51 = vcombine.high %v75_v48, %v75_v48  ;;  %s3892_s19 = smov [#allocation9]   ;;  %vm2857_vm8 = vcmask 57344  }
  0x3a   :  { %1706 = vmatpush1.bf16.msra.mxu0 %v3291_v3  ;;  %v3294_v5 = vld [vmem:[#allocation6 + $0x224] ss:$16 sps:$4 sm:$0xff]   ;;  %1666 = vmatprep.subr.bf16.mxu1 %v3292_v4  ;;  %v3297_v7 = vld [vmem:[#allocation6 + $0x220] ss:$16 sps:$4 sm:$0xff]   ;;  %s2865_s20 = sshll.u32 %s3892_s19, 4  ;;  %s2866_s20 = int_to_ptr.vmem [resolvable:$true] %s2865_s20 }
  0x3b   :  { %1707 = vmatprep.subr.bf16.mxu0 %v3294_v5  ;;  %v3298_v8 = vld [vmem:[#allocation6 + $0x44] ss:$16 sps:$4 sm:$0xff]   ;;  %v3302_v10 = vld [vmem:[#allocation6 + $0x40] ss:$16 sps:$4 sm:$0xff]   ;;  %1737 = vmatprep.mubr.bf16.mxu0 %v3981_v51  ;;  %v3391_v5 = vld [vmem:[#allocation6 + $0xc] ss:$16 sps:$4 sm:$0xff]   ;;  %p3861_p11 = scmp.lt.s32.totalorder %s2866_s20, %s2866_s20 }
  0x3c   :  { %v3300_v9 = vld [vmem:[#allocation6 + $0x244] ss:$16 sps:$4 sm:$0xff]   ;;  %v3303_v11 = vld [vmem:[#allocation6 + $0x240] ss:$16 sps:$4 sm:$0xff]   ;;  %s3856_s21 = scalar_lea.vmem %s2866_s20, 16  ;;  %s3860_s22 = scalar_lea.vmem %s2866_s20, 32 }
  0x3d   :  { %1667 = vmatpush1.bf16.msra.mxu1 %v3296_v6  ;;  %v3304_v12 = vld [vmem:[#allocation6 + $0x64] ss:$16 sps:$4 sm:$0xff]   ;;  %v3308_v14 = vld [vmem:[#allocation6 + $0x60] ss:$16 sps:$4 sm:$0xff]   ;;  %p3857_p10 = scmp.ne.s32.totalorder %s2866_s20, %s3856_s21  ;;  %p3862_p12 = scmp.lt.s32.totalorder %s3860_s22, %s3856_s21 }
  0x3e   :  { %1708 = vmatpush1.bf16.msra.mxu0 %v3297_v7  ;;  %1668 = vmatprep.subr.bf16.mxu1 %v3298_v8  ;;  %v3306_v13 = vld [vmem:[#allocation6 + $0x264] ss:$16 sps:$4 sm:$0xff]   ;;  %v3309_v15 = vld [vmem:[#allocation6 + $0x260] ss:$16 sps:$4 sm:$0xff]   ;;  %v3987_v7 = vcombine.low %v75_v48, %v75_v48 }
  0x3f   :  { %1709 = vmatprep.subr.bf16.mxu0 %v3300_v9  ;;  %v3310_v16 = vld [vmem:[#allocation6 + $0x84] ss:$16 sps:$4 sm:$0xff]   ;;  %v3314_v18 = vld [vmem:[#allocation6 + $0x80] ss:$16 sps:$4 sm:$0xff]   ;;  %v3389_v9 = vld [vmem:[#allocation6 + $0x8] ss:$16 sps:$4 sm:$0xff]   ;;  %p3863_p13 = por %p3862_p12, %p3861_p11 }
  0x40   :  { %v3312_v17 = vld [vmem:[#allocation6 + $0x284] ss:$16 sps:$4 sm:$0xff]   ;;  %v3315_v19 = vld [vmem:[#allocation6 + $0x280] ss:$16 sps:$4 sm:$0xff]  }
  0x41   :  { %1669 = vmatpush1.bf16.msra.mxu1 %v3302_v10  ;;  %v3316_v20 = vld [vmem:[#allocation6 + $0xa4] ss:$16 sps:$4 sm:$0xff]   ;;  %v3320_v22 = vld [vmem:[#allocation6 + $0xa0] ss:$16 sps:$4 sm:$0xff]   ;;  %p3864_p0 = pnand %p3863_p13, %p3857_p10 }
  0x42   :  { %1710 = vmatpush1.bf16.msra.mxu0 %v3303_v11  ;;  %1670 = vmatprep.subr.bf16.mxu1 %v3304_v12  ;;  %v3318_v21 = vld [vmem:[#allocation6 + $0x2a4] ss:$16 sps:$4 sm:$0xff]   ;;  %v3321_v23 = vld [vmem:[#allocation6 + $0x2a0] ss:$16 sps:$4 sm:$0xff]   ;;  %v3397_v11 = vld [vmem:[#allocation6 + $0x2c] ss:$16 sps:$4 sm:$0xff]  }
  0x43   :  { %1711 = vmatprep.subr.bf16.mxu0 %v3306_v13  ;;  %v3322_v24 = vld [vmem:[#allocation6 + $0xc4] ss:$16 sps:$4 sm:$0xff]   ;;  %v3326_v26 = vld [vmem:[#allocation6 + $0xc0] ss:$16 sps:$4 sm:$0xff]   ;;  %v3395_v13 = vld [vmem:[#allocation6 + $0x28] ss:$16 sps:$4 sm:$0xff]  }
  0x44   :  { %v3324_v25 = vld [vmem:[#allocation6 + $0x2c4] ss:$16 sps:$4 sm:$0xff]   ;;  %v3327_v27 = vld [vmem:[#allocation6 + $0x2c0] ss:$16 sps:$4 sm:$0xff]  }
  0x45   :  { %1671 = vmatpush1.bf16.msra.mxu1 %v3308_v14  ;;  %v3328_v28 = vld [vmem:[#allocation6 + $0xe4] ss:$16 sps:$4 sm:$0xff]   ;;  %v3332_v30 = vld [vmem:[#allocation6 + $0xe0] ss:$16 sps:$4 sm:$0xff]  }
  0x46   :  { %1712 = vmatpush1.bf16.msra.mxu0 %v3309_v15  ;;  %1672 = vmatprep.subr.bf16.mxu1 %v3310_v16  ;;  %v3330_v29 = vld [vmem:[#allocation6 + $0x2e4] ss:$16 sps:$4 sm:$0xff]   ;;  %v3333_v31 = vld [vmem:[#allocation6 + $0x2e0] ss:$16 sps:$4 sm:$0xff]   ;;  %v3403_v15 = vld [vmem:[#allocation6 + $0x4c] ss:$16 sps:$4 sm:$0xff]  }
  0x47   :  { %1713 = vmatprep.subr.bf16.mxu0 %v3312_v17  ;;  %v3334_v32 = vld [vmem:[#allocation6 + $0x104] ss:$16 sps:$4 sm:$0xff]   ;;  %v3338_v34 = vld [vmem:[#allocation6 + $0x100] ss:$16 sps:$4 sm:$0xff]   ;;  %v3401_v17 = vld [vmem:[#allocation6 + $0x48] ss:$16 sps:$4 sm:$0xff]  }
  0x48   :  { %v3336_v33 = vld [vmem:[#allocation6 + $0x304] ss:$16 sps:$4 sm:$0xff]   ;;  %v3339_v35 = vld [vmem:[#allocation6 + $0x300] ss:$16 sps:$4 sm:$0xff]  }
  0x49   :  { %1673 = vmatpush1.bf16.msra.mxu1 %v3314_v18  ;;  %v3340_v36 = vld [vmem:[#allocation6 + $0x124] ss:$16 sps:$4 sm:$0xff]   ;;  %v3344_v38 = vld [vmem:[#allocation6 + $0x120] ss:$16 sps:$4 sm:$0xff]  }
  0x4a   :  { %1714 = vmatpush1.bf16.msra.mxu0 %v3315_v19  ;;  %1674 = vmatprep.subr.bf16.mxu1 %v3316_v20  ;;  %v3342_v37 = vld [vmem:[#allocation6 + $0x324] ss:$16 sps:$4 sm:$0xff]   ;;  %v3345_v39 = vld [vmem:[#allocation6 + $0x320] ss:$16 sps:$4 sm:$0xff]   ;;  %v3409_v19 = vld [vmem:[#allocation6 + $0x6c] ss:$16 sps:$4 sm:$0xff]  }
  0x4b   :  { %1715 = vmatprep.subr.bf16.mxu0 %v3318_v21  ;;  %v3346_v40 = vld [vmem:[#allocation6 + $0x144] ss:$16 sps:$4 sm:$0xff]   ;;  %v3350_v42 = vld [vmem:[#allocation6 + $0x140] ss:$16 sps:$4 sm:$0xff]   ;;  %v3407_v21 = vld [vmem:[#allocation6 + $0x68] ss:$16 sps:$4 sm:$0xff]  }
  0x4c   :  { %v3348_v41 = vld [vmem:[#allocation6 + $0x344] ss:$16 sps:$4 sm:$0xff]   ;;  %v3351_v43 = vld [vmem:[#allocation6 + $0x340] ss:$16 sps:$4 sm:$0xff]  }
  0x4d   :  { %1675 = vmatpush1.bf16.msra.mxu1 %v3320_v22  ;;  %v3352_v44 = vld [vmem:[#allocation6 + $0x164] ss:$16 sps:$4 sm:$0xff]   ;;  %v3356_v49 = vld [vmem:[#allocation6 + $0x160] ss:$16 sps:$4 sm:$0xff]  }
  0x4e   :  { %1716 = vmatpush1.bf16.msra.mxu0 %v3321_v23  ;;  %1676 = vmatprep.subr.bf16.mxu1 %v3322_v24  ;;  %v3354_v45 = vld [vmem:[#allocation6 + $0x364] ss:$16 sps:$4 sm:$0xff]   ;;  %v3357_v50 = vld [vmem:[#allocation6 + $0x360] ss:$16 sps:$4 sm:$0xff]   ;;  %v3415_v23 = vld [vmem:[#allocation6 + $0x8c] ss:$16 sps:$4 sm:$0xff]  }
  0x4f   :  { %1717 = vmatprep.subr.bf16.mxu0 %v3324_v25  ;;  %v74_v46 = vld [vmem:[#allocation3] sm:$0xff]  ;;  %v3413_v25 = vld [vmem:[#allocation6 + $0x88] ss:$16 sps:$4 sm:$0xff]  }
  0x50   :  { %v3979_v47 = vcombine.high %v74_v46, %v74_v46  ;;  %v3358_v52 = vld [vmem:[#allocation6 + $0x184] ss:$16 sps:$4 sm:$0xff]   ;;  %v3362_v54 = vld [vmem:[#allocation6 + $0x180] ss:$16 sps:$4 sm:$0xff]   ;;  %v3985_v6 = vcombine.low %v74_v46, %v74_v46 }
  0x51   :  { %1677 = vmatpush1.bf16.msra.mxu1 %v3326_v26  ;;  %v3360_v53 = vld [vmem:[#allocation6 + $0x384] ss:$16 sps:$4 sm:$0xff]   ;;  %v3363_v55 = vld [vmem:[#allocation6 + $0x380] ss:$16 sps:$4 sm:$0xff]  }
  0x52   :  { %1718 = vmatpush1.bf16.msra.mxu0 %v3327_v27  ;;  %1678 = vmatprep.subr.bf16.mxu1 %v3328_v28  ;;  %v3364_v56 = vld [vmem:[#allocation6 + $0x1a4] ss:$16 sps:$4 sm:$0xff]   ;;  %v3368_v58 = vld [vmem:[#allocation6 + $0x1a0] ss:$16 sps:$4 sm:$0xff]   ;;  %v3421_v27 = vld [vmem:[#allocation6 + $0xac] ss:$16 sps:$4 sm:$0xff]  }
  0x53   :  { %1719 = vmatprep.subr.bf16.mxu0 %v3330_v29  ;;  %1696 = vmatprep.mubr.bf16.mxu1 %v3979_v47  ;;  %v3366_v57 = vld [vmem:[#allocation6 + $0x3a4] ss:$16 sps:$4 sm:$0xff]   ;;  %v3369_v59 = vld [vmem:[#allocation6 + $0x3a0] ss:$16 sps:$4 sm:$0xff]   ;;  %v3419_v29 = vld [vmem:[#allocation6 + $0xa8] ss:$16 sps:$4 sm:$0xff]  }
  0x54   :  { %v3370_v60 = vld [vmem:[#allocation6 + $0x1c4] ss:$16 sps:$4 sm:$0xff]   ;;  %v3374_v62 = vld [vmem:[#allocation6 + $0x1c0] ss:$16 sps:$4 sm:$0xff]  }
  0x55   :  { %1679 = vmatpush1.bf16.msra.mxu1 %v3332_v30  ;;  %v3372_v61 = vld [vmem:[#allocation6 + $0x3c4] ss:$16 sps:$4 sm:$0xff]   ;;  %v3375_v63 = vld [vmem:[#allocation6 + $0x3c0] ss:$16 sps:$4 sm:$0xff]  }
  0x56   :  { %1720 = vmatpush1.bf16.msra.mxu0 %v3333_v31  ;;  %1680 = vmatprep.subr.bf16.mxu1 %v3334_v32  ;;  %v3376_v0 = vld [vmem:[#allocation6 + $0x1e4] ss:$16 sps:$4 sm:$0xff]   ;;  %v3380_v2 = vld [vmem:[#allocation6 + $0x1e0] ss:$16 sps:$4 sm:$0xff]   ;;  %v3427_v31 = vld [vmem:[#allocation6 + $0xcc] ss:$16 sps:$4 sm:$0xff]  }
  0x57   :  { %1721 = vmatprep.subr.bf16.mxu0 %v3336_v33  ;;  %v3378_v1 = vld [vmem:[#allocation6 + $0x3e4] ss:$16 sps:$4 sm:$0xff]   ;;  %v3381_v3 = vld [vmem:[#allocation6 + $0x3e0] ss:$16 sps:$4 sm:$0xff]  }
  0x58   :  { %v3388_v4 = vld [vmem:[#allocation6 + $0x404] ss:$16 sps:$4 sm:$0xff]   ;;  %v3386_v8 = vld [vmem:[#allocation6 + $0x400] ss:$16 sps:$4 sm:$0xff]  }
  0x59   :  { %1681 = vmatpush1.bf16.msra.mxu1 %v3338_v34  ;;  %v3394_v10 = vld [vmem:[#allocation6 + $0x424] ss:$16 sps:$4 sm:$0xff]   ;;  %v3392_v12 = vld [vmem:[#allocation6 + $0x420] ss:$16 sps:$4 sm:$0xff]  }
  0x5a   :  { %1722 = vmatpush1.bf16.msra.mxu0 %v3339_v35  ;;  %1682 = vmatprep.subr.bf16.mxu1 %v3340_v36  ;;  %v3400_v14 = vld [vmem:[#allocation6 + $0x444] ss:$16 sps:$4 sm:$0xff]   ;;  %v3398_v16 = vld [vmem:[#allocation6 + $0x440] ss:$16 sps:$4 sm:$0xff]   ;;  %v3425_v35 = vld [vmem:[#allocation6 + $0xc8] ss:$16 sps:$4 sm:$0xff]  }
  0x5b   :  { %1723 = vmatprep.subr.bf16.mxu0 %v3342_v37  ;;  %v3406_v18 = vld [vmem:[#allocation6 + $0x464] ss:$16 sps:$4 sm:$0xff]   ;;  %v3404_v20 = vld [vmem:[#allocation6 + $0x460] ss:$16 sps:$4 sm:$0xff]   ;;  %v3433_v37 = vld [vmem:[#allocation6 + $0xec] ss:$16 sps:$4 sm:$0xff]  }
  0x5c   :  { %v3412_v22 = vld [vmem:[#allocation6 + $0x484] ss:$16 sps:$4 sm:$0xff]   ;;  %v3410_v24 = vld [vmem:[#allocation6 + $0x480] ss:$16 sps:$4 sm:$0xff]  }
  0x5d   :  { %1683 = vmatpush1.bf16.msra.mxu1 %v3344_v38  ;;  %v3418_v26 = vld [vmem:[#allocation6 + $0x4a4] ss:$16 sps:$4 sm:$0xff]   ;;  %v3416_v28 = vld [vmem:[#allocation6 + $0x4a0] ss:$16 sps:$4 sm:$0xff]  }
  0x5e   :  { %1724 = vmatpush1.bf16.msra.mxu0 %v3345_v39  ;;  %1684 = vmatprep.subr.bf16.mxu1 %v3346_v40  ;;  %v3424_v30 = vld [vmem:[#allocation6 + $0x4c4] ss:$16 sps:$4 sm:$0xff]   ;;  %v3422_v33 = vld [vmem:[#allocation6 + $0x4c0] ss:$16 sps:$4 sm:$0xff]   ;;  %v3431_v39 = vld [vmem:[#allocation6 + $0xe8] ss:$16 sps:$4 sm:$0xff]  }
  0x5f   :  { %1725 = vmatprep.subr.bf16.mxu0 %v3348_v41  ;;  %v3992_v32 = vld [vmem:[#allocation3 + $0x10] sm:$0xff]  ;;  %v3439_v41 = vld [vmem:[#allocation6 + $0x10c] ss:$16 sps:$4 sm:$0xff]  }
  0x60   :  { %v3996_v34 = vcombine.high %v3992_v32, %v3992_v32  ;;  %v3430_v36 = vld [vmem:[#allocation6 + $0x4e4] ss:$16 sps:$4 sm:$0xff]   ;;  %v3428_v38 = vld [vmem:[#allocation6 + $0x4e0] ss:$16 sps:$4 sm:$0xff]  }
  0x61   :  { %1685 = vmatpush1.bf16.msra.mxu1 %v3350_v42  ;;  %v3436_v40 = vld [vmem:[#allocation6 + $0x504] ss:$16 sps:$4 sm:$0xff]   ;;  %v3434_v42 = vld [vmem:[#allocation6 + $0x500] ss:$16 sps:$4 sm:$0xff]  }
  0x62   :  { %1726 = vmatpush1.bf16.msra.mxu0 %v3351_v43  ;;  %1686 = vmatprep.subr.bf16.mxu1 %v3352_v44  ;;  %v3437_v43 = vld [vmem:[#allocation6 + $0x108] ss:$16 sps:$4 sm:$0xff]   ;;  %v3442_v44 = vld [vmem:[#allocation6 + $0x524] ss:$16 sps:$4 sm:$0xff]   ;;  %v3440_v46 = vld [vmem:[#allocation6 + $0x520] ss:$16 sps:$4 sm:$0xff]  }
  0x63   :  { %1727 = vmatprep.subr.bf16.mxu0 %v3354_v45  ;;  %v3445_v45 = vld [vmem:[#allocation6 + $0x12c] ss:$16 sps:$4 sm:$0xff]   ;;  %v3448_v48 = vld [vmem:[#allocation6 + $0x544] ss:$16 sps:$4 sm:$0xff]  }
  0x65   :  { %1687 = vmatpush1.bf16.msra.mxu1 %v3356_v49  ;;  %v3451_v49 = vld [vmem:[#allocation6 + $0x14c] ss:$16 sps:$4 sm:$0xff]  }
  0x66   :  { %1728 = vmatpush1.bf16.msra.mxu0 %v3357_v50  ;;  %1688 = vmatprep.subr.bf16.mxu1 %v3358_v52  ;;  %v3446_v50 = vld [vmem:[#allocation6 + $0x540] ss:$16 sps:$4 sm:$0xff]   ;;  %v3449_v52 = vld [vmem:[#allocation6 + $0x148] ss:$16 sps:$4 sm:$0xff]  }
  0x67   :  { %1729 = vmatprep.subr.bf16.mxu0 %v3360_v53  ;;  %v3454_v53 = vld [vmem:[#allocation6 + $0x564] ss:$16 sps:$4 sm:$0xff]  }
  0x69   :  { %1689 = vmatpush1.bf16.msra.mxu1 %v3362_v54  ;;  %v3457_v54 = vld [vmem:[#allocation6 + $0x16c] ss:$16 sps:$4 sm:$0xff]  }
  0x6a   :  { %1730 = vmatpush1.bf16.msra.mxu0 %v3363_v55  ;;  %1690 = vmatprep.subr.bf16.mxu1 %v3364_v56  ;;  %v3452_v55 = vld [vmem:[#allocation6 + $0x560] ss:$16 sps:$4 sm:$0xff]   ;;  %v3455_v56 = vld [vmem:[#allocation6 + $0x168] ss:$16 sps:$4 sm:$0xff]  }
  0x6b   :  { %1731 = vmatprep.subr.bf16.mxu0 %v3366_v57  ;;  %v3460_v57 = vld [vmem:[#allocation6 + $0x584] ss:$16 sps:$4 sm:$0xff]  }
  0x6d   :  { %1691 = vmatpush1.bf16.msra.mxu1 %v3368_v58  ;;  %v3463_v58 = vld [vmem:[#allocation6 + $0x18c] ss:$16 sps:$4 sm:$0xff]  }
  0x6e   :  { %1732 = vmatpush1.bf16.msra.mxu0 %v3369_v59  ;;  %1692 = vmatprep.subr.bf16.mxu1 %v3370_v60  ;;  %v3458_v59 = vld [vmem:[#allocation6 + $0x580] ss:$16 sps:$4 sm:$0xff]   ;;  %v3461_v60 = vld [vmem:[#allocation6 + $0x188] ss:$16 sps:$4 sm:$0xff]  }
  0x6f   :  { %1733 = vmatprep.subr.bf16.mxu0 %v3372_v61  ;;  %v3466_v61 = vld [vmem:[#allocation6 + $0x5a4] ss:$16 sps:$4 sm:$0xff]  }
  0x71   :  { %1693 = vmatpush1.bf16.msra.mxu1 %v3374_v62  ;;  %v3469_v62 = vld [vmem:[#allocation6 + $0x1ac] ss:$16 sps:$4 sm:$0xff]  }
  0x72   :  { %1734 = vmatpush1.bf16.msra.mxu0 %v3375_v63  ;;  %1694 = vmatprep.subr.bf16.mxu1 %v3376_v0  ;;  %v3464_v63 = vld [vmem:[#allocation6 + $0x5a0] ss:$16 sps:$4 sm:$0xff]   ;;  %v3467_v0 = vld [vmem:[#allocation6 + $0x1a8] ss:$16 sps:$4 sm:$0xff]  }
  0x73   :  { %1735 = vmatprep.subr.bf16.mxu0 %v3378_v1  ;;  %v3472_v1 = vld [vmem:[#allocation6 + $0x5c4] ss:$16 sps:$4 sm:$0xff]  }
  0x75   :  { %1695 = vmatpush1.bf16.msra.mxu1 %v3380_v2  ;;  %v3475_v2 = vld [vmem:[#allocation6 + $0x1cc] ss:$16 sps:$4 sm:$0xff]  }
  0x76   :  { %1736 = vmatpush1.bf16.msra.mxu0 %v3381_v3  ;;  %1828 = vmatprep.subr.bf16.mxu1 %v3391_v5  ;;  %v3470_v3 = vld [vmem:[#allocation6 + $0x5c0] ss:$16 sps:$4 sm:$0xff]   ;;  %v3478_v5 = vld [vmem:[#allocation6 + $0x5e4] ss:$16 sps:$4 sm:$0xff]  }
  0x77   :  { %1746 = vmatprep.subr.bf16.mxu0 %v3388_v4  ;;  %v3473_v4 = vld [vmem:[#allocation6 + $0x1c8] ss:$16 sps:$4 sm:$0xff]  }
  0x78   :  { %1697 = vmatmul.mubr.bf16.vlgmr.msra.gmra.mrb[0].mxu1 %v3985_v6 }
  0x79   :  { %1738 = vmatmul.mubr.bf16.vlgmr.msra.gmra.mrb[0].mxu0 %v3987_v7  ;;  %1829 = vmatpush1.bf16.msra.mxu1 %v3389_v9  ;;  %v3476_v9 = vld [vmem:[#allocation6 + $0x5e0] ss:$16 sps:$4 sm:$0xff]  }
  0x7a   :  { %1747 = vmatpush1.bf16.msra.mxu0 %v3386_v8  ;;  %1830 = vmatprep.subr.bf16.mxu1 %v3397_v11  ;;  %v3481_v8 = vld [vmem:[#allocation6 + $0x1ec] ss:$16 sps:$4 sm:$0xff]   ;;  %v3486_v11 = vld [vmem:[#allocation6 + $0x604] ss:$16 sps:$4 sm:$0xff]  }
  0x7b   :  { %1748 = vmatprep.subr.bf16.mxu0 %v3394_v10  ;;  %1860 = vmatprep.mubr.bf16.mxu1 %v3979_v47  ;;  %v3443_v47 = vld [vmem:[#allocation6 + $0x128] ss:$16 sps:$4 sm:$0xff]  }
  0x7c   :  { %1778 = vmatprep.mubr.bf16.mxu0 %v3996_v34  ;;  %v3479_v10 = vld [vmem:[#allocation6 + $0x1e8] ss:$16 sps:$4 sm:$0xff]  }
  0x7d   :  { %1831 = vmatpush1.bf16.msra.mxu1 %v3395_v13  ;;  %v4001_v13 = vcombine.low %v3992_v32, %v3992_v32  ;;  %v3511_v32 = vld [vmem:[#allocation6 + $0x288] ss:$16 sps:$4 sm:$0xff]  }
  0x7e   :  { %1749 = vmatpush1.bf16.msra.mxu0 %v3392_v12  ;;  %1832 = vmatprep.subr.bf16.mxu1 %v3403_v15  ;;  %v3489_v12 = vld [vmem:[#allocation6 + $0x20c] ss:$16 sps:$4 sm:$0xff]   ;;  %v3487_v15 = vld [vmem:[#allocation6 + $0x208] ss:$16 sps:$4 sm:$0xff]  }
  0x7f   :  { %1750 = vmatprep.subr.bf16.mxu0 %v3400_v14  ;;  %v3484_v14 = vld [vmem:[#allocation6 + $0x600] ss:$16 sps:$4 sm:$0xff]  }
  0x81   :  { %1833 = vmatpush1.bf16.msra.mxu1 %v3401_v17  ;;  %v3495_v17 = vld [vmem:[#allocation6 + $0x22c] ss:$16 sps:$4 sm:$0xff]  }
  0x82   :  { %1751 = vmatpush1.bf16.msra.mxu0 %v3398_v16  ;;  %1834 = vmatprep.subr.bf16.mxu1 %v3409_v19  ;;  %v3492_v16 = vld [vmem:[#allocation6 + $0x624] ss:$16 sps:$4 sm:$0xff]  }
  0x83   :  { %1752 = vmatprep.subr.bf16.mxu0 %v3406_v18  ;;  %v4003_v18 = vld [vmem:[#allocation3 + $0x18] sm:$0xff] }
  0x84   :  { %v4007_v19 = vcombine.high %v4003_v18, %v4003_v18 }
  0x85   :  { %1835 = vmatpush1.bf16.msra.mxu1 %v3407_v21  ;;  %v3493_v21 = vld [vmem:[#allocation6 + $0x228] ss:$16 sps:$4 sm:$0xff]  }
  0x86   :  { %1753 = vmatpush1.bf16.msra.mxu0 %v3404_v20  ;;  %1836 = vmatprep.subr.bf16.mxu1 %v3415_v23  ;;  %v3490_v20 = vld [vmem:[#allocation6 + $0x620] ss:$16 sps:$4 sm:$0xff]   ;;  %v3501_v23 = vld [vmem:[#allocation6 + $0x24c] ss:$16 sps:$4 sm:$0xff]  }
  0x87   :  { %1754 = vmatprep.subr.bf16.mxu0 %v3412_v22  ;;  %v3498_v22 = vld [vmem:[#allocation6 + $0x644] ss:$16 sps:$4 sm:$0xff]  }
  0x89   :  { %1837 = vmatpush1.bf16.msra.mxu1 %v3413_v25  ;;  %v3499_v25 = vld [vmem:[#allocation6 + $0x248] ss:$16 sps:$4 sm:$0xff]  }
  0x8a   :  { %1755 = vmatpush1.bf16.msra.mxu0 %v3410_v24  ;;  %1838 = vmatprep.subr.bf16.mxu1 %v3421_v27  ;;  %v3496_v24 = vld [vmem:[#allocation6 + $0x640] ss:$16 sps:$4 sm:$0xff]  }
  0x8b   :  { %1756 = vmatprep.subr.bf16.mxu0 %v3418_v26  ;;  %v3504_v26 = vld [vmem:[#allocation6 + $0x664] ss:$16 sps:$4 sm:$0xff]   ;;  %v3502_v27 = vld [vmem:[#allocation6 + $0x660] ss:$16 sps:$4 sm:$0xff]  }
  0x8d   :  { %1839 = vmatpush1.bf16.msra.mxu1 %v3419_v29  ;;  %v3510_v29 = vld [vmem:[#allocation6 + $0x684] ss:$16 sps:$4 sm:$0xff]  }
  0x8e   :  { %1757 = vmatpush1.bf16.msra.mxu0 %v3416_v28  ;;  %1840 = vmatprep.subr.bf16.mxu1 %v3427_v31  ;;  %v3505_v28 = vld [vmem:[#allocation6 + $0x268] ss:$16 sps:$4 sm:$0xff]   ;;  %v3508_v31 = vld [vmem:[#allocation6 + $0x680] ss:$16 sps:$4 sm:$0xff]  }
  0x8f   :  { %1758 = vmatprep.subr.bf16.mxu0 %v3424_v30  ;;  %v3513_v30 = vld [vmem:[#allocation6 + $0x28c] ss:$16 sps:$4 sm:$0xff]  }
  0x91   :  { %1841 = vmatpush1.bf16.msra.mxu1 %v3425_v35  ;;  %v3514_v35 = vld [vmem:[#allocation6 + $0x6a0] ss:$16 sps:$4 sm:$0xff]  }
  0x92   :  { %1759 = vmatpush1.bf16.msra.mxu0 %v3422_v33  ;;  %1842 = vmatprep.subr.bf16.mxu1 %v3433_v37  ;;  %v3519_v33 = vld [vmem:[#allocation6 + $0x2ac] ss:$16 sps:$4 sm:$0xff]   ;;  %v3522_v37 = vld [vmem:[#allocation6 + $0x6c4] ss:$16 sps:$4 sm:$0xff]  }
  0x93   :  { %1760 = vmatprep.subr.bf16.mxu0 %v3430_v36  ;;  %v3517_v36 = vld [vmem:[#allocation6 + $0x2a8] ss:$16 sps:$4 sm:$0xff]  }
  0x95   :  { %1843 = vmatpush1.bf16.msra.mxu1 %v3431_v39  ;;  %v3520_v39 = vld [vmem:[#allocation6 + $0x6c0] ss:$16 sps:$4 sm:$0xff]  }
  0x96   :  { %1761 = vmatpush1.bf16.msra.mxu0 %v3428_v38  ;;  %1844 = vmatprep.subr.bf16.mxu1 %v3439_v41  ;;  %v3525_v38 = vld [vmem:[#allocation6 + $0x2cc] ss:$16 sps:$4 sm:$0xff]   ;;  %v3528_v41 = vld [vmem:[#allocation6 + $0x6e4] ss:$16 sps:$4 sm:$0xff]  }
  0x97   :  { %1762 = vmatprep.subr.bf16.mxu0 %v3436_v40  ;;  %v3523_v40 = vld [vmem:[#allocation6 + $0x2c8] ss:$16 sps:$4 sm:$0xff]  }
  0x99   :  { %1845 = vmatpush1.bf16.msra.mxu1 %v3437_v43  ;;  %v3526_v43 = vld [vmem:[#allocation6 + $0x6e0] ss:$16 sps:$4 sm:$0xff]  }
  0x9a   :  { %1763 = vmatpush1.bf16.msra.mxu0 %v3434_v42  ;;  %1846 = vmatprep.subr.bf16.mxu1 %v3445_v45  ;;  %v3531_v42 = vld [vmem:[#allocation6 + $0x2ec] ss:$16 sps:$4 sm:$0xff]   ;;  %v3534_v45 = vld [vmem:[#allocation6 + $0x704] ss:$16 sps:$4 sm:$0xff]  }
  0x9b   :  { %1764 = vmatprep.subr.bf16.mxu0 %v3442_v44  ;;  %v3529_v44 = vld [vmem:[#allocation6 + $0x2e8] ss:$16 sps:$4 sm:$0xff]  }
  0x9d   :  { %1847 = vmatpush1.bf16.msra.mxu1 %v3443_v47  ;;  %v3532_v47 = vld [vmem:[#allocation6 + $0x700] ss:$16 sps:$4 sm:$0xff]  }
  0x9e   :  { %1765 = vmatpush1.bf16.msra.mxu0 %v3440_v46  ;;  %1848 = vmatprep.subr.bf16.mxu1 %v3451_v49  ;;  %v3537_v46 = vld [vmem:[#allocation6 + $0x30c] ss:$16 sps:$4 sm:$0xff]   ;;  %v3540_v49 = vld [vmem:[#allocation6 + $0x724] ss:$16 sps:$4 sm:$0xff]  }
  0x9f   :  { %1766 = vmatprep.subr.bf16.mxu0 %v3448_v48  ;;  %v3535_v48 = vld [vmem:[#allocation6 + $0x308] ss:$16 sps:$4 sm:$0xff]  }
  0xa1   :  { %1849 = vmatpush1.bf16.msra.mxu1 %v3449_v52  ;;  %v3538_v52 = vld [vmem:[#allocation6 + $0x720] ss:$16 sps:$4 sm:$0xff]  }
  0xa2   :  { %1767 = vmatpush1.bf16.msra.mxu0 %v3446_v50  ;;  %1850 = vmatprep.subr.bf16.mxu1 %v3457_v54  ;;  %v3543_v50 = vld [vmem:[#allocation6 + $0x32c] ss:$16 sps:$4 sm:$0xff]   ;;  %v3546_v54 = vld [vmem:[#allocation6 + $0x744] ss:$16 sps:$4 sm:$0xff]  }
  0xa3   :  { %1768 = vmatprep.subr.bf16.mxu0 %v3454_v53  ;;  %v3541_v53 = vld [vmem:[#allocation6 + $0x328] ss:$16 sps:$4 sm:$0xff]  }
  0xa5   :  { %1851 = vmatpush1.bf16.msra.mxu1 %v3455_v56  ;;  %v3544_v56 = vld [vmem:[#allocation6 + $0x740] ss:$16 sps:$4 sm:$0xff]  }
  0xa6   :  { %1769 = vmatpush1.bf16.msra.mxu0 %v3452_v55  ;;  %1852 = vmatprep.subr.bf16.mxu1 %v3463_v58  ;;  %v3549_v55 = vld [vmem:[#allocation6 + $0x34c] ss:$16 sps:$4 sm:$0xff]   ;;  %v3552_v58 = vld [vmem:[#allocation6 + $0x764] ss:$16 sps:$4 sm:$0xff]  }
  0xa7   :  { %1770 = vmatprep.subr.bf16.mxu0 %v3460_v57  ;;  %v3547_v57 = vld [vmem:[#allocation6 + $0x348] ss:$16 sps:$4 sm:$0xff]  }
  0xa9   :  { %1853 = vmatpush1.bf16.msra.mxu1 %v3461_v60  ;;  %v3550_v60 = vld [vmem:[#allocation6 + $0x760] ss:$16 sps:$4 sm:$0xff]  }
  0xaa   :  { %1771 = vmatpush1.bf16.msra.mxu0 %v3458_v59  ;;  %1854 = vmatprep.subr.bf16.mxu1 %v3469_v62  ;;  %v3555_v59 = vld [vmem:[#allocation6 + $0x36c] ss:$16 sps:$4 sm:$0xff]   ;;  %v3558_v62 = vld [vmem:[#allocation6 + $0x784] ss:$16 sps:$4 sm:$0xff]  }
  0xab   :  { %1772 = vmatprep.subr.bf16.mxu0 %v3466_v61  ;;  %v3553_v61 = vld [vmem:[#allocation6 + $0x368] ss:$16 sps:$4 sm:$0xff]  }
  0xad   :  { %1855 = vmatpush1.bf16.msra.mxu1 %v3467_v0  ;;  %v3556_v0 = vld [vmem:[#allocation6 + $0x780] ss:$16 sps:$4 sm:$0xff]  }
  0xae   :  { %1773 = vmatpush1.bf16.msra.mxu0 %v3464_v63  ;;  %1856 = vmatprep.subr.bf16.mxu1 %v3475_v2  ;;  %v3561_v63 = vld [vmem:[#allocation6 + $0x38c] ss:$16 sps:$4 sm:$0xff]   ;;  %v3564_v2 = vld [vmem:[#allocation6 + $0x7a4] ss:$16 sps:$4 sm:$0xff]  }
  0xaf   :  { %1774 = vmatprep.subr.bf16.mxu0 %v3472_v1  ;;  %v3559_v1 = vld [vmem:[#allocation6 + $0x388] ss:$16 sps:$4 sm:$0xff]  }
  0xb1   :  { %1857 = vmatpush1.bf16.msra.mxu1 %v3473_v4  ;;  %v3562_v4 = vld [vmem:[#allocation6 + $0x7a0] ss:$16 sps:$4 sm:$0xff]  }
  0xb2   :  { %1775 = vmatpush1.bf16.msra.mxu0 %v3470_v3  ;;  %1858 = vmatprep.subr.bf16.mxu1 %v3481_v8  ;;  %v3567_v3 = vld [vmem:[#allocation6 + $0x3ac] ss:$16 sps:$4 sm:$0xff]   ;;  %v3570_v8 = vld [vmem:[#allocation6 + $0x7c4] ss:$16 sps:$4 sm:$0xff]  }
  0xb3   :  { %1776 = vmatprep.subr.bf16.mxu0 %v3478_v5  ;;  %v3565_v5 = vld [vmem:[#allocation6 + $0x3a8] ss:$16 sps:$4 sm:$0xff]  }
  0xb5   :  { %1859 = vmatpush1.bf16.msra.mxu1 %v3479_v10  ;;  %v3568_v10 = vld [vmem:[#allocation6 + $0x7c0] ss:$16 sps:$4 sm:$0xff]  }
  0xb6   :  { %1777 = vmatpush1.bf16.msra.mxu0 %v3476_v9  ;;  %1869 = vmatprep.subr.bf16.mxu1 %v3489_v12  ;;  %v3573_v9 = vld [vmem:[#allocation6 + $0x3cc] ss:$16 sps:$4 sm:$0xff]   ;;  %v3576_v12 = vld [vmem:[#allocation6 + $0x7e4] ss:$16 sps:$4 sm:$0xff]  }
  0xb7   :  { %1787 = vmatprep.subr.bf16.mxu0 %v3486_v11  ;;  %v3571_v11 = vld [vmem:[#allocation6 + $0x3c8] ss:$16 sps:$4 sm:$0xff]  }
  0xb8   :  { %1861 = vmatmul.mubr.bf16.vlgmr.msra.gmra.mrb[4].mxu1 %v3985_v6  ;;  %v3507_v6 = vld [vmem:[#allocation6 + $0x26c] ss:$16 sps:$4 sm:$0xff]  }
  0xb9   :  { %1779 = vmatmul.mubr.bf16.vlgmr.msra.gmra.mrb[0].mxu0 %v4001_v13  ;;  %1870 = vmatpush1.bf16.msra.mxu1 %v3487_v15  ;;  %v3574_v15 = vld [vmem:[#allocation6 + $0x7e0] ss:$16 sps:$4 sm:$0xff]  }
  0xba   :  { %1788 = vmatpush1.bf16.msra.mxu0 %v3484_v14  ;;  %1871 = vmatprep.subr.bf16.mxu1 %v3495_v17  ;;  %v3579_v14 = vld [vmem:[#allocation6 + $0x3ec] ss:$16 sps:$4 sm:$0xff]  }
  0xbb   :  { %1789 = vmatprep.subr.bf16.mxu0 %v3492_v16  ;;  %1819 = vmatprep.mubr.bf16.mxu0 %v4007_v19  ;;  %v3577_v16 = vld [vmem:[#allocation6 + $0x3e8] ss:$16 sps:$4 sm:$0xff]   ;;  %v3584_v17 = vld [vmem:[#allocation6 + $0x40c] ss:$16 sps:$4 sm:$0xff]  }
  0xbc   :  { %1901 = vmatprep.mubr.bf16.mxu1 %v3981_v51  ;;  %v3516_v51 = vld [vmem:[#allocation6 + $0x6a4] ss:$16 sps:$4 sm:$0xff]  }
  0xbd   :  { %1872 = vmatpush1.bf16.msra.mxu1 %v3493_v21  ;;  %v4015_v21 = vcombine.low %v4003_v18, %v4003_v18  ;;  %v3681_v18 = vld [vmem:[#allocation8 + $0x10] ss:$8 sps:$4 sm:$0xff]  }
  0xbe   :  { %1790 = vmatpush1.bf16.msra.mxu0 %v3490_v20  ;;  %1873 = vmatprep.subr.bf16.mxu1 %v3501_v23  ;;  %v3582_v20 = vld [vmem:[#allocation6 + $0x408] ss:$16 sps:$4 sm:$0xff]  }
  0xbf   :  { %1791 = vmatprep.subr.bf16.mxu0 %v3498_v22  ;;  %v3587_v22 = vld [vmem:[#allocation6 + $0x42c] ss:$16 sps:$4 sm:$0xff]   ;;  %v3678_v23 = vld [vmem:[#allocation8] ss:$8 sps:$4 sm:$0xff]  }
  0xc1   :  { %1874 = vmatpush1.bf16.msra.mxu1 %v3499_v25  ;;  %v3585_v25 = vld [vmem:[#allocation6 + $0x428] ss:$16 sps:$4 sm:$0xff]  }
  0xc2   :  { %1792 = vmatpush1.bf16.msra.mxu0 %v3496_v24  ;;  %1875 = vmatprep.subr.bf16.mxu1 %v3507_v6  ;;  %v3680_v24 = vld [vmem:[#allocation8 + $0x4] ss:$8 sps:$4 sm:$0xff]  }
  0xc3   :  { %1793 = vmatprep.subr.bf16.mxu0 %v3504_v26  ;;  %v3683_v26 = vld [vmem:[#allocation8 + $0x14] ss:$8 sps:$4 sm:$0xff]  }
  0xc4   :  { %v3590_v6 = vld [vmem:[#allocation6 + $0x44c] ss:$16 sps:$4 sm:$0xff]  }
  0xc5   :  { %1876 = vmatpush1.bf16.msra.mxu1 %v3505_v28  ;;  %v3588_v28 = vld [vmem:[#allocation6 + $0x448] ss:$16 sps:$4 sm:$0xff]  }
  0xc6   :  { %1794 = vmatpush1.bf16.msra.mxu0 %v3502_v27  ;;  %1877 = vmatprep.subr.bf16.mxu1 %v3513_v30  ;;  %v3686_v27 = vld [vmem:[#allocation8 + $0x24] ss:$8 sps:$4 sm:$0xff]   ;;  %v3591_v30 = vld [vmem:[#allocation6 + $0x468] ss:$16 sps:$4 sm:$0xff]  }
  0xc7   :  { %1795 = vmatprep.subr.bf16.mxu0 %v3510_v29  ;;  %v3593_v29 = vld [vmem:[#allocation6 + $0x46c] ss:$16 sps:$4 sm:$0xff]  }
  0xc9   :  { %1878 = vmatpush1.bf16.msra.mxu1 %v3511_v32  ;;  %v3689_v32 = vld [vmem:[#allocation8 + $0x34] ss:$8 sps:$4 sm:$0xff]  }
  0xca   :  { %1796 = vmatpush1.bf16.msra.mxu0 %v3508_v31  ;;  %1879 = vmatprep.subr.bf16.mxu1 %v3519_v33  ;;  %v3596_v31 = vld [vmem:[#allocation6 + $0x48c] ss:$16 sps:$4 sm:$0xff]   ;;  %v3594_v33 = vld [vmem:[#allocation6 + $0x488] ss:$16 sps:$4 sm:$0xff]  }
  0xcb   :  { %1797 = vmatprep.subr.bf16.mxu0 %v3516_v51  ;;  %v3692_v51 = vld [vmem:[#allocation8 + $0x44] ss:$8 sps:$4 sm:$0xff]  }
  0xcd   :  { %1880 = vmatpush1.bf16.msra.mxu1 %v3517_v36  ;;  %v3690_v36 = vld [vmem:[#allocation8 + $0x40] ss:$8 sps:$4 sm:$0xff]  }
  0xce   :  { %1798 = vmatpush1.bf16.msra.mxu0 %v3514_v35  ;;  %1881 = vmatprep.subr.bf16.mxu1 %v3525_v38  ;;  %v3599_v35 = vld [vmem:[#allocation6 + $0x4ac] ss:$16 sps:$4 sm:$0xff]   ;;  %v3597_v38 = vld [vmem:[#allocation6 + $0x4a8] ss:$16 sps:$4 sm:$0xff]  }
  0xcf   :  { %1799 = vmatprep.subr.bf16.mxu0 %v3522_v37  ;;  %v3695_v37 = vld [vmem:[#allocation8 + $0x54] ss:$8 sps:$4 sm:$0xff]  }
  0xd1   :  { %1882 = vmatpush1.bf16.msra.mxu1 %v3523_v40  ;;  %v3693_v40 = vld [vmem:[#allocation8 + $0x50] ss:$8 sps:$4 sm:$0xff]  }
  0xd2   :  { %1800 = vmatpush1.bf16.msra.mxu0 %v3520_v39  ;;  %1883 = vmatprep.subr.bf16.mxu1 %v3531_v42  ;;  %v3602_v39 = vld [vmem:[#allocation6 + $0x4cc] ss:$16 sps:$4 sm:$0xff]   ;;  %v3600_v42 = vld [vmem:[#allocation6 + $0x4c8] ss:$16 sps:$4 sm:$0xff]  }
  0xd3   :  { %1801 = vmatprep.subr.bf16.mxu0 %v3528_v41  ;;  %v3698_v41 = vld [vmem:[#allocation8 + $0x64] ss:$8 sps:$4 sm:$0xff]  }
  0xd5   :  { %1884 = vmatpush1.bf16.msra.mxu1 %v3529_v44  ;;  %v3696_v44 = vld [vmem:[#allocation8 + $0x60] ss:$8 sps:$4 sm:$0xff]  }
  0xd6   :  { %1802 = vmatpush1.bf16.msra.mxu0 %v3526_v43  ;;  %1885 = vmatprep.subr.bf16.mxu1 %v3537_v46  ;;  %v3605_v43 = vld [vmem:[#allocation6 + $0x4ec] ss:$16 sps:$4 sm:$0xff]   ;;  %v3603_v46 = vld [vmem:[#allocation6 + $0x4e8] ss:$16 sps:$4 sm:$0xff]  }
  0xd7   :  { %1803 = vmatprep.subr.bf16.mxu0 %v3534_v45  ;;  %v3701_v45 = vld [vmem:[#allocation8 + $0x74] ss:$8 sps:$4 sm:$0xff]  }
  0xd9   :  { %1886 = vmatpush1.bf16.msra.mxu1 %v3535_v48  ;;  %v3699_v48 = vld [vmem:[#allocation8 + $0x70] ss:$8 sps:$4 sm:$0xff]  }
  0xda   :  { %1804 = vmatpush1.bf16.msra.mxu0 %v3532_v47  ;;  %1887 = vmatprep.subr.bf16.mxu1 %v3543_v50  ;;  %v3608_v47 = vld [vmem:[#allocation6 + $0x50c] ss:$16 sps:$4 sm:$0xff]   ;;  %v3606_v50 = vld [vmem:[#allocation6 + $0x508] ss:$16 sps:$4 sm:$0xff]  }
  0xdb   :  { %1805 = vmatprep.subr.bf16.mxu0 %v3540_v49  ;;  %v3704_v49 = vld [vmem:[#allocation8 + $0x84] ss:$8 sps:$4 sm:$0xff]  }
  0xdd   :  { %1888 = vmatpush1.bf16.msra.mxu1 %v3541_v53  ;;  %v3702_v53 = vld [vmem:[#allocation8 + $0x80] ss:$8 sps:$4 sm:$0xff]  }
  0xde   :  { %1806 = vmatpush1.bf16.msra.mxu0 %v3538_v52  ;;  %1889 = vmatprep.subr.bf16.mxu1 %v3549_v55  ;;  %v3611_v52 = vld [vmem:[#allocation6 + $0x52c] ss:$16 sps:$4 sm:$0xff]   ;;  %v3609_v55 = vld [vmem:[#allocation6 + $0x528] ss:$16 sps:$4 sm:$0xff]  }
  0xdf   :  { %1807 = vmatprep.subr.bf16.mxu0 %v3546_v54  ;;  %v3707_v54 = vld [vmem:[#allocation8 + $0x94] ss:$8 sps:$4 sm:$0xff]  }
  0xe1   :  { %1890 = vmatpush1.bf16.msra.mxu1 %v3547_v57  ;;  %v3705_v57 = vld [vmem:[#allocation8 + $0x90] ss:$8 sps:$4 sm:$0xff]  }
  0xe2   :  { %1808 = vmatpush1.bf16.msra.mxu0 %v3544_v56  ;;  %1891 = vmatprep.subr.bf16.mxu1 %v3555_v59  ;;  %v3614_v56 = vld [vmem:[#allocation6 + $0x54c] ss:$16 sps:$4 sm:$0xff]   ;;  %v3612_v59 = vld [vmem:[#allocation6 + $0x548] ss:$16 sps:$4 sm:$0xff]  }
  0xe3   :  { %1809 = vmatprep.subr.bf16.mxu0 %v3552_v58  ;;  %v3710_v58 = vld [vmem:[#allocation8 + $0xa4] ss:$8 sps:$4 sm:$0xff]  }
  0xe5   :  { %1892 = vmatpush1.bf16.msra.mxu1 %v3553_v61  ;;  %v3708_v61 = vld [vmem:[#allocation8 + $0xa0] ss:$8 sps:$4 sm:$0xff]  }
  0xe6   :  { %1810 = vmatpush1.bf16.msra.mxu0 %v3550_v60  ;;  %1893 = vmatprep.subr.bf16.mxu1 %v3561_v63  ;;  %v3617_v60 = vld [vmem:[#allocation6 + $0x56c] ss:$16 sps:$4 sm:$0xff]   ;;  %v3615_v63 = vld [vmem:[#allocation6 + $0x568] ss:$16 sps:$4 sm:$0xff]  }
  0xe7   :  { %1811 = vmatprep.subr.bf16.mxu0 %v3558_v62  ;;  %v3713_v62 = vld [vmem:[#allocation8 + $0xb4] ss:$8 sps:$4 sm:$0xff]  }
  0xe9   :  { %1894 = vmatpush1.bf16.msra.mxu1 %v3559_v1  ;;  %v3711_v1 = vld [vmem:[#allocation8 + $0xb0] ss:$8 sps:$4 sm:$0xff]  }
  0xea   :  { %1812 = vmatpush1.bf16.msra.mxu0 %v3556_v0  ;;  %1895 = vmatprep.subr.bf16.mxu1 %v3567_v3  ;;  %v3620_v0 = vld [vmem:[#allocation6 + $0x58c] ss:$16 sps:$4 sm:$0xff]   ;;  %v3618_v3 = vld [vmem:[#allocation6 + $0x588] ss:$16 sps:$4 sm:$0xff]  }
  0xeb   :  { %1813 = vmatprep.subr.bf16.mxu0 %v3564_v2  ;;  %v3716_v2 = vld [vmem:[#allocation8 + $0xc4] ss:$8 sps:$4 sm:$0xff]  }
  0xed   :  { %1896 = vmatpush1.bf16.msra.mxu1 %v3565_v5  ;;  %v3714_v5 = vld [vmem:[#allocation8 + $0xc0] ss:$8 sps:$4 sm:$0xff]  }
  0xee   :  { %1814 = vmatpush1.bf16.msra.mxu0 %v3562_v4  ;;  %1897 = vmatprep.subr.bf16.mxu1 %v3573_v9  ;;  %v3623_v4 = vld [vmem:[#allocation6 + $0x5ac] ss:$16 sps:$4 sm:$0xff]   ;;  %v3621_v9 = vld [vmem:[#allocation6 + $0x5a8] ss:$16 sps:$4 sm:$0xff]  }
  0xef   :  { %1815 = vmatprep.subr.bf16.mxu0 %v3570_v8  ;;  %v3719_v8 = vld [vmem:[#allocation8 + $0xd4] ss:$8 sps:$4 sm:$0xff]  }
  0xf1   :  { %1898 = vmatpush1.bf16.msra.mxu1 %v3571_v11  ;;  %v3717_v11 = vld [vmem:[#allocation8 + $0xd0] ss:$8 sps:$4 sm:$0xff]  }
  0xf2   :  { %1816 = vmatpush1.bf16.msra.mxu0 %v3568_v10  ;;  %1899 = vmatprep.subr.bf16.mxu1 %v3579_v14  ;;  %v3626_v10 = vld [vmem:[#allocation6 + $0x5cc] ss:$16 sps:$4 sm:$0xff]  }
  0xf3   :  { %1817 = vmatprep.subr.bf16.mxu0 %v3576_v12  ;;  %v3624_v12 = vld [vmem:[#allocation6 + $0x5c8] ss:$16 sps:$4 sm:$0xff]   ;;  %v3629_v14 = vld [vmem:[#allocation6 + $0x5ec] ss:$16 sps:$4 sm:$0xff]  }
  0xf5   :  { %1900 = vmatpush1.bf16.msra.mxu1 %v3577_v16  ;;  %v3632_v16 = vld [vmem:[#allocation6 + $0x60c] ss:$16 sps:$4 sm:$0xff]  }
  0xf6   :  { %1818 = vmatpush1.bf16.msra.mxu0 %v3574_v15  ;;  %1910 = vmatprep.subr.bf16.mxu1 %v3584_v17  ;;  %v3627_v15 = vld [vmem:[#allocation6 + $0x5e8] ss:$16 sps:$4 sm:$0xff]  }
  0xf7   :  { %2404 = vmatprep.subr.bf16.mxu0 %v3680_v24  ;;  %v3630_v17 = vld [vmem:[#allocation6 + $0x608] ss:$16 sps:$4 sm:$0xff]  }
  0xf8   :  { %1902 = vmatmul.mubr.bf16.vlgmr.msra.gmra.mrb[4].mxu1 %v3987_v7  ;;  %v3684_v7 = vld [vmem:[#allocation8 + $0x20] ss:$8 sps:$4 sm:$0xff]  }
  0xf9   :  { %1820 = vmatmul.mubr.bf16.vlgmr.msra.gmra.mrb[0].mxu0 %v4015_v21  ;;  %1911 = vmatpush1.bf16.msra.mxu1 %v3582_v20  ;;  %v3635_v20 = vld [vmem:[#allocation6 + $0x62c] ss:$16 sps:$4 sm:$0xff]   ;;  %v3636_v24 = vld [vmem:[#allocation6 + $0x648] ss:$16 sps:$4 sm:$0xff]  }
  0xfa   :  { %1942 = vmatprep.mubr.bf16.mxu1 %v3996_v34  ;;  %1912 = vmatprep.subr.bf16.mxu1 %v3587_v22  ;;  %v3687_v34 = vld [vmem:[#allocation8 + $0x30] ss:$8 sps:$4 sm:$0xff]  }
  0xfb   :  { %2405 = vmatpush1.bf16.msra.mxu0 %v3678_v23  ;;  %v3633_v22 = vld [vmem:[#allocation6 + $0x628] ss:$16 sps:$4 sm:$0xff]   ;;  %v3638_v23 = vld [vmem:[#allocation6 + $0x64c] ss:$16 sps:$4 sm:$0xff]  }
  0xfc   :  { %2406 = vmatprep.subr.bf16.mxu0 %v3683_v26  ;;  %v3639_v26 = vld [vmem:[#allocation6 + $0x668] ss:$16 sps:$4 sm:$0xff]  }
  0xfd   :  { %1913 = vmatpush1.bf16.msra.mxu1 %v3585_v25  ;;  %v3641_v25 = vld [vmem:[#allocation6 + $0x66c] ss:$16 sps:$4 sm:$0xff]  }
  0xfe   :  { %1914 = vmatprep.subr.bf16.mxu1 %v3590_v6  ;;  %v3644_v6 = vld [vmem:[#allocation6 + $0x68c] ss:$16 sps:$4 sm:$0xff]  }
  0xff   :  { %2407 = vmatpush1.bf16.msra.mxu0 %v3681_v18  ;;  %v3642_v18 = vld [vmem:[#allocation6 + $0x688] ss:$16 sps:$4 sm:$0xff]  }
 0x100   :  { %2408 = vmatprep.subr.bf16.mxu0 %v3686_v27  ;;  %v3647_v27 = vld [vmem:[#allocation6 + $0x6ac] ss:$16 sps:$4 sm:$0xff]  }
 0x101   :  { %1915 = vmatpush1.bf16.msra.mxu1 %v3588_v28  ;;  %v3650_v28 = vld [vmem:[#allocation6 + $0x6cc] ss:$16 sps:$4 sm:$0xff]  }
 0x102   :  { %1916 = vmatprep.subr.bf16.mxu1 %v3593_v29 }
 0x103   :  { %2409 = vmatpush1.bf16.msra.mxu0 %v3684_v7 }
 0x104   :  { %2410 = vmatprep.subr.bf16.mxu0 %v3689_v32  ;;  %v3648_v32 = vld [vmem:[#allocation6 + $0x6c8] ss:$16 sps:$4 sm:$0xff]  }
 0x105   :  { %1917 = vmatpush1.bf16.msra.mxu1 %v3591_v30  ;;  %v3720_v30 = vld [vmem:[#allocation8 + $0xe0] ss:$8 sps:$4 sm:$0xff]  }
 0x106   :  { %1918 = vmatprep.subr.bf16.mxu1 %v3596_v31 }
 0x107   :  { %2411 = vmatpush1.bf16.msra.mxu0 %v3687_v34 }
 0x108   :  { %2412 = vmatprep.subr.bf16.mxu0 %v3692_v51  ;;  %v3653_v51 = vld [vmem:[#allocation6 + $0x6ec] ss:$16 sps:$4 sm:$0xff]  }
 0x109   :  { %1919 = vmatpush1.bf16.msra.mxu1 %v3594_v33  ;;  %v3725_v33 = vld [vmem:[#allocation8 + $0xf4] ss:$8 sps:$4 sm:$0xff]  }
 0x10a   :  { %1920 = vmatprep.subr.bf16.mxu1 %v3599_v35  ;;  %v3723_v35 = vld [vmem:[#allocation8 + $0xf0] ss:$8 sps:$4 sm:$0xff]  }
 0x10b   :  { %2413 = vmatpush1.bf16.msra.mxu0 %v3690_v36  ;;  %v3651_v36 = vld [vmem:[#allocation6 + $0x6e8] ss:$16 sps:$4 sm:$0xff]  }
 0x10c   :  { %2414 = vmatprep.subr.bf16.mxu0 %v3695_v37  ;;  %v3656_v37 = vld [vmem:[#allocation6 + $0x70c] ss:$16 sps:$4 sm:$0xff]  }
 0x10d   :  { %1921 = vmatpush1.bf16.msra.mxu1 %v3597_v38  ;;  %v3654_v38 = vld [vmem:[#allocation6 + $0x708] ss:$16 sps:$4 sm:$0xff]  }
 0x10e   :  { %1922 = vmatprep.subr.bf16.mxu1 %v3602_v39  ;;  %v3728_v39 = vld [vmem:[#allocation8 + $0x104] ss:$8 sps:$4 sm:$0xff]  }
 0x10f   :  { %2415 = vmatpush1.bf16.msra.mxu0 %v3693_v40  ;;  %v3659_v40 = vld [vmem:[#allocation6 + $0x72c] ss:$16 sps:$4 sm:$0xff]  }
 0x110   :  { %2416 = vmatprep.subr.bf16.mxu0 %v3698_v41  ;;  %v3657_v41 = vld [vmem:[#allocation6 + $0x728] ss:$16 sps:$4 sm:$0xff]  }
 0x111   :  { %1923 = vmatpush1.bf16.msra.mxu1 %v3600_v42  ;;  %v3662_v42 = vld [vmem:[#allocation6 + $0x74c] ss:$16 sps:$4 sm:$0xff]  }
 0x112   :  { %1924 = vmatprep.subr.bf16.mxu1 %v3605_v43  ;;  %v3660_v43 = vld [vmem:[#allocation6 + $0x748] ss:$16 sps:$4 sm:$0xff]  }
 0x113   :  { %2417 = vmatpush1.bf16.msra.mxu0 %v3696_v44  ;;  %v3665_v44 = vld [vmem:[#allocation6 + $0x76c] ss:$16 sps:$4 sm:$0xff]  }
 0x114   :  { %2418 = vmatprep.subr.bf16.mxu0 %v3701_v45  ;;  %v3663_v45 = vld [vmem:[#allocation6 + $0x768] ss:$16 sps:$4 sm:$0xff]  }
 0x115   :  { %1925 = vmatpush1.bf16.msra.mxu1 %v3603_v46  ;;  %v3668_v46 = vld [vmem:[#allocation6 + $0x78c] ss:$16 sps:$4 sm:$0xff]  }
 0x116   :  { %1926 = vmatprep.subr.bf16.mxu1 %v3608_v47  ;;  %v3666_v47 = vld [vmem:[#allocation6 + $0x788] ss:$16 sps:$4 sm:$0xff]  }
 0x117   :  { %2419 = vmatpush1.bf16.msra.mxu0 %v3699_v48  ;;  %v3671_v48 = vld [vmem:[#allocation6 + $0x7ac] ss:$16 sps:$4 sm:$0xff]  }
 0x118   :  { %2420 = vmatprep.subr.bf16.mxu0 %v3704_v49  ;;  %v3669_v49 = vld [vmem:[#allocation6 + $0x7a8] ss:$16 sps:$4 sm:$0xff]  }
 0x119   :  { %1927 = vmatpush1.bf16.msra.mxu1 %v3606_v50  ;;  %v3674_v50 = vld [vmem:[#allocation6 + $0x7cc] ss:$16 sps:$4 sm:$0xff]  }
 0x11a   :  { %1928 = vmatprep.subr.bf16.mxu1 %v3611_v52  ;;  %v3672_v52 = vld [vmem:[#allocation6 + $0x7c8] ss:$16 sps:$4 sm:$0xff]  }
 0x11b   :  { %2421 = vmatpush1.bf16.msra.mxu0 %v3702_v53  ;;  %v3677_v53 = vld [vmem:[#allocation6 + $0x7ec] ss:$16 sps:$4 sm:$0xff]  }
 0x11c   :  { %2422 = vmatprep.subr.bf16.mxu0 %v3707_v54  ;;  %v3675_v54 = vld [vmem:[#allocation6 + $0x7e8] ss:$16 sps:$4 sm:$0xff]  }
 0x11d   :  { %1929 = vmatpush1.bf16.msra.mxu1 %v3609_v55  ;;  %v336_v55 = vlaneseq }
 0x11e   :  { %1930 = vmatprep.subr.bf16.mxu1 %v3614_v56 }
 0x11f   :  { %2423 = vmatpush1.bf16.msra.mxu0 %v3705_v57  ;;  %v4023_v56 = vshrl.u32 %v336_v55, 7 }
 0x120   :  { %2424 = vmatprep.subr.bf16.mxu0 %v3710_v58  ;;  %v4029_v58 = vld [vmem:[%s4181_s2] sm:$0xf] }
 0x121   :  { %1931 = vmatpush1.bf16.msra.mxu1 %v3612_v59  ;;  %v338_v57 = vsub.s32 0, %v4023_v56  ;;  %v342_v59 = vsub.s32 1, %v4023_v56  ;;  %v346_v55 = vsub.s32 2, %v4023_v56 }
 0x122   :  { %1932 = vmatprep.subr.bf16.mxu1 %v3617_v60 }
 0x123   :  { %2425 = vmatpush1.bf16.msra.mxu0 %v3708_v61  ;;  %v339_v60 = vrot.slane %v4029_v58, %v338_v57 }
 0x124   :  { %2426 = vmatprep.subr.bf16.mxu0 %v3713_v62 }
 0x125   :  { %1933 = vmatpush1.bf16.msra.mxu1 %v3615_v63 }
 0x126   :  { %1934 = vmatprep.subr.bf16.mxu1 %v3620_v0 }
 0x127   :  { %2427 = vmatpush1.bf16.msra.mxu0 %v3711_v1 }
 0x128   :  { %2428 = vmatprep.subr.bf16.mxu0 %v3716_v2 }
 0x129   :  { %1935 = vmatpush1.bf16.msra.mxu1 %v3618_v3 }
 0x12a   :  { %1936 = vmatprep.subr.bf16.mxu1 %v3623_v4 }
 0x12b   :  { %2429 = vmatpush1.bf16.msra.mxu0 %v3714_v5 }
 0x12c   :  { %2430 = vmatprep.subr.bf16.mxu0 %v3719_v8 }
 0x12d   :  { %1937 = vmatpush1.bf16.msra.mxu1 %v3621_v9 }
 0x12e   :  { %1938 = vmatprep.subr.bf16.mxu1 %v3626_v10 }
 0x12f   :  { %2431 = vmatpush1.bf16.msra.mxu0 %v3717_v11 }
 0x131   :  { %1939 = vmatpush1.bf16.msra.mxu1 %v3624_v12  ;;  %v3726_v12 = vld [vmem:[#allocation8 + $0x100] ss:$8 sps:$4 sm:$0xff]  }
 0x132   :  { %1940 = vmatprep.subr.bf16.mxu1 %v3629_v14 }
 0x135   :  { %1941 = vmatpush1.bf16.msra.mxu1 %v3627_v15  ;;  %v3731_v15 = vld [vmem:[#allocation8 + $0x114] ss:$8 sps:$4 sm:$0xff]  }
 0x136   :  { %1951 = vmatprep.subr.bf16.mxu1 %v3632_v16  ;;  %v3774_v16 = vld [vmem:[%s4184_s5 + $0x40] sm:$0xff]  }
 0x138   :  { %1943 = vmatmul.mubr.bf16.vlgmr.msra.gmra.mrb[4].mxu1 %v4001_v13  ;;  %v3645_v13 = vld [vmem:[#allocation6 + $0x6a8] ss:$16 sps:$4 sm:$0xff]  }
 0x139   :  { %1952 = vmatpush1.bf16.msra.mxu1 %v3630_v17  ;;  %1983 = vmatprep.mubr.bf16.mxu1 %v4007_v19  ;;  %v3722_v19 = vld [vmem:[#allocation8 + $0xe4] ss:$8 sps:$4 sm:$0xff]  }
 0x13a   :  { %1953 = vmatprep.subr.bf16.mxu1 %v3635_v20  ;;  %2432 = vmatprep.subr.bf16.mxu0 %v3722_v19  ;;  %v3775_v17 = vld [vmem:[%s4184_s5] sm:$0xff]   ;;  %v3776_v20 = vld [vmem:[%s4184_s5 + $0x48] sm:$0xff]  }
 0x13b   :  { %2433 = vmatpush1.bf16.msra.mxu0 %v3720_v30  ;;  %v3782_v19 = vld [vmem:[%s4184_s5 + $0x60] sm:$0xff]   ;;  %v3743_v30 = vld [vmem:[#allocation8 + $0x154] ss:$8 sps:$4 sm:$0xff]  }
 0x13c   :  { %2434 = vmatprep.subr.bf16.mxu0 %v3725_v33  ;;  %v3785_v33 = vld [vmem:[%s4184_s5 + $0x28] sm:$0xff]  }
 0x13d   :  { %1954 = vmatpush1.bf16.msra.mxu1 %v3633_v22  ;;  %v3729_v22 = vld [vmem:[#allocation8 + $0x110] ss:$8 sps:$4 sm:$0xff]  }
 0x13e   :  { %1955 = vmatprep.subr.bf16.mxu1 %v3638_v23  ;;  %v3734_v23 = vld [vmem:[#allocation8 + $0x124] ss:$8 sps:$4 sm:$0xff]  }
 0x13f   :  { %2435 = vmatpush1.bf16.msra.mxu0 %v3723_v35  ;;  %v3744_v35 = vld [vmem:[#allocation8 + $0x160] ss:$8 sps:$4 sm:$0xff]  }
 0x140   :  { %2445 = vmatprep.subr.bf16.mxu0 %v3728_v39  ;;  %v3750_v39 = vld [vmem:[#allocation8 + $0x180] ss:$8 sps:$4 sm:$0xff]  }
 0x141   :  { %1956 = vmatpush1.bf16.msra.mxu1 %v3636_v24  ;;  %v3777_v24 = vld [vmem:[%s4184_s5 + $0x8] sm:$0xff]  }
 0x142   :  { %1957 = vmatprep.subr.bf16.mxu1 %v3641_v25  ;;  %v3778_v25 = vld [vmem:[%s4184_s5 + $0x50] sm:$0xff]  }
 0x145   :  { %1958 = vmatpush1.bf16.msra.mxu1 %v3639_v26  ;;  %v3732_v26 = vld [vmem:[#allocation8 + $0x120] ss:$8 sps:$4 sm:$0xff]  }
 0x146   :  { %1959 = vmatprep.subr.bf16.mxu1 %v3644_v6  ;;  %v3737_v6 = vld [vmem:[#allocation8 + $0x134] ss:$8 sps:$4 sm:$0xff]  }
 0x149   :  { %1960 = vmatpush1.bf16.msra.mxu1 %v3642_v18  ;;  %v3779_v18 = vld [vmem:[%s4184_s5 + $0x10] sm:$0xff]  }
 0x14a   :  { %1961 = vmatprep.subr.bf16.mxu1 %v3647_v27  ;;  %v3780_v27 = vld [vmem:[%s4184_s5 + $0x58] sm:$0xff]  }
 0x14b   :  { %v1698_v29 = vpop.f32.mrb[0].mxu1 }
 0x14c   :  { %v1700_v7 = vpop.f32.mrb[1].mxu1  ;;  %v1699_v61 = vadd.f32 %v1698_v29, %v339_v60  ;;  %v3781_v29 = vld [vmem:[%s4184_s5 + $0x18] sm:$0xff]   ;;  %v350_v60 = vsub.s32 3, %v4023_v56  ;;  %v2704_v56 = vld [vmem:[%s4186_s7] sm:$0xff] }
 0x14d   :  { %v1702_v31 = vpop.f32.mrb[2].mxu1  ;;  %1962 = vmatpush1.bf16.msra.mxu1 %v3645_v13  ;;  %v3735_v13 = vld [vmem:[#allocation8 + $0x130] ss:$8 sps:$4 sm:$0xff]  }
 0x14e   :  { %v1703_v34 = vpop.f32.mrb[3].mxu1  ;;  %1963 = vmatprep.subr.bf16.mxu1 %v3650_v28  ;;  %v3740_v28 = vld [vmem:[#allocation8 + $0x144] ss:$8 sps:$4 sm:$0xff]  }
 0x14f   :  { %v3783_v31 = vld [vmem:[%s4184_s5 + $0x20] sm:$0xff]   ;;  %v3741_v34 = vld [vmem:[#allocation8 + $0x150] ss:$8 sps:$4 sm:$0xff]  }
 0x151   :  { %1964 = vmatpush1.bf16.msra.mxu1 %v3648_v32  ;;  %v3784_v32 = vld [vmem:[%s4184_s5 + $0x68] sm:$0xff]  }
 0x152   :  { %1965 = vmatprep.subr.bf16.mxu1 %v3653_v51  ;;  %v3746_v51 = vld [vmem:[#allocation8 + $0x164] ss:$8 sps:$4 sm:$0xff]  }
 0x155   :  { %1966 = vmatpush1.bf16.msra.mxu1 %v3651_v36  ;;  %v3749_v36 = vld [vmem:[#allocation8 + $0x174] ss:$8 sps:$4 sm:$0xff]  }
 0x156   :  { %1967 = vmatprep.subr.bf16.mxu1 %v3656_v37  ;;  %v3747_v37 = vld [vmem:[#allocation8 + $0x170] ss:$8 sps:$4 sm:$0xff]  }
 0x159   :  { %1968 = vmatpush1.bf16.msra.mxu1 %v3654_v38  ;;  %v3752_v38 = vld [vmem:[#allocation8 + $0x184] ss:$8 sps:$4 sm:$0xff]  }
 0x15a   :  { %1969 = vmatprep.subr.bf16.mxu1 %v3659_v40  ;;  %v3755_v40 = vld [vmem:[#allocation8 + $0x194] ss:$8 sps:$4 sm:$0xff]  }
 0x15d   :  { %1970 = vmatpush1.bf16.msra.mxu1 %v3657_v41  ;;  %v3753_v41 = vld [vmem:[#allocation8 + $0x190] ss:$8 sps:$4 sm:$0xff]  }
 0x15e   :  { %1971 = vmatprep.subr.bf16.mxu1 %v3662_v42  ;;  %v3758_v42 = vld [vmem:[#allocation8 + $0x1a4] ss:$8 sps:$4 sm:$0xff]  }
 0x161   :  { %1972 = vmatpush1.bf16.msra.mxu1 %v3660_v43  ;;  %v3756_v43 = vld [vmem:[#allocation8 + $0x1a0] ss:$8 sps:$4 sm:$0xff]  }
 0x162   :  { %1973 = vmatprep.subr.bf16.mxu1 %v3665_v44  ;;  %v3761_v44 = vld [vmem:[#allocation8 + $0x1b4] ss:$8 sps:$4 sm:$0xff]  }
 0x165   :  { %1974 = vmatpush1.bf16.msra.mxu1 %v3663_v45  ;;  %v3759_v45 = vld [vmem:[#allocation8 + $0x1b0] ss:$8 sps:$4 sm:$0xff]  }
 0x166   :  { %1975 = vmatprep.subr.bf16.mxu1 %v3668_v46  ;;  %v3764_v46 = vld [vmem:[#allocation8 + $0x1c4] ss:$8 sps:$4 sm:$0xff]  }
 0x169   :  { %1976 = vmatpush1.bf16.msra.mxu1 %v3666_v47  ;;  %v3762_v47 = vld [vmem:[#allocation8 + $0x1c0] ss:$8 sps:$4 sm:$0xff]  }
 0x16a   :  { %1977 = vmatprep.subr.bf16.mxu1 %v3671_v48  ;;  %v3767_v48 = vld [vmem:[#allocation8 + $0x1d4] ss:$8 sps:$4 sm:$0xff]  }
 0x16d   :  { %1978 = vmatpush1.bf16.msra.mxu1 %v3669_v49  ;;  %v3765_v49 = vld [vmem:[#allocation8 + $0x1d0] ss:$8 sps:$4 sm:$0xff]  }
 0x16e   :  { %1979 = vmatprep.subr.bf16.mxu1 %v3674_v50  ;;  %v3770_v50 = vld [vmem:[#allocation8 + $0x1e4] ss:$8 sps:$4 sm:$0xff]  }
 0x171   :  { %1980 = vmatpush1.bf16.msra.mxu1 %v3672_v52  ;;  %v3768_v52 = vld [vmem:[#allocation8 + $0x1e0] ss:$8 sps:$4 sm:$0xff]  }
 0x172   :  { %1981 = vmatprep.subr.bf16.mxu1 %v3677_v53  ;;  %v3773_v53 = vld [vmem:[#allocation8 + $0x1f4] ss:$8 sps:$4 sm:$0xff]  }
 0x175   :  { %1982 = vmatpush1.bf16.msra.mxu1 %v3675_v54  ;;  %v3771_v54 = vld [vmem:[#allocation8 + $0x1f0] ss:$8 sps:$4 sm:$0xff]  }
 0x176   :  { %3220 = vmatprep.subr.bf16.mxu1 %v3774_v16  ;;  %v2706_v16 = vld [vmem:[%s4186_s7 + $0x10] sm:$0xff] }
 0x178   :  { %1984 = vmatmul.mubr.bf16.vlgmr.msra.gmra.mrb[4].mxu1 %v4015_v21  ;;  %v343_v21 = vrot.slane %v4029_v58, %v342_v59 }
 0x179   :  { %3221 = vmatpush3.bf16.msra.mxu1 %v3775_v17  ;;  %v3891_v17 = vmov 0  }
 0x17a   :  { %v1701_v62 = vadd.f32 %v1700_v7, %v343_v21  ;;  %3222 = vmatprep.subr.bf16.mxu1 %v3776_v20  ;;  %v3738_v7 = vld [vmem:[#allocation8 + $0x140] ss:$8 sps:$4 sm:$0xff]   ;;  %v347_v21 = vrot.slane %v4029_v58, %v346_v55  ;;  %3285 = vset.pattern.permute.xlu1 %v3891_v17  ;;  %v2707_v20 = vld [vmem:[%s4186_s7 + $0x18] sm:$0xff] }
 0x17b   :  { %3284 = vset.pattern.permute.xlu0 %v3891_v17  ;;  %2732 = vperm.xlu1 %3285, %v2706_v16  }
 0x17c   :  { %2722 = vperm.xlu0 %3284, %v2704_v56  }
 0x17d   :  { %3223 = vmatpush3.bf16.msra.mxu1 %v3777_v24  ;;  %v2713_v24 = vld [vmem:[%s4186_s7 + $0x48] sm:$0xff] }
 0x17e   :  { %3224 = vmatprep.subr.bf16.mxu1 %v3778_v25  ;;  %v2715_v25 = vld [vmem:[%s4186_s7 + $0x58] sm:$0xff] }
 0x17f   :  { %2737 = vperm.xlu1 %3285, %v2707_v20  }
 0x181   :  { %3225 = vmatpush3.bf16.msra.mxu1 %v3779_v18 }
 0x182   :  { %3226 = vmatprep.subr.bf16.mxu1 %v3780_v27 }
 0x185   :  { %3227 = vmatpush3.bf16.msra.mxu1 %v3781_v29 }
 0x186   :  { %3228 = vmatprep.subr.bf16.mxu1 %v3782_v19 }
 0x189   :  { %3229 = vmatpush3.bf16.msra.mxu1 %v3783_v31 }
 0x18a   :  { %3230 = vmatprep.subr.bf16.mxu1 %v3784_v32 }
 0x18d   :  { %3231 = vmatpush3.bf16.msra.mxu1 %v3785_v33 }
 0x1cc   :  { %v1821_v63 = vpop.f32.mrb[0].mxu0 }
 0x1cd   :  { %v3243_v0 = vadd.f32 %v1821_v63, %v1699_v61  ;;  %v1823_v1 = vpop.f32.mrb[1].mxu0  ;;  %v351_v61 = vrot.slane %v4029_v58, %v350_v60  ;;  %v3786_v58 = vld [vmem:[%s4184_s5 + $0x70] sm:$0xff]  }
 0x1ce   :  { %v3245_v2 = vadd.f32 %v1823_v1, %v1701_v62  ;;  %v1825_v3 = vpop.f32.mrb[2].mxu0  ;;  %3232 = vmatprep.subr.bf16.mxu1 %v3786_v58 }
 0x1cf   :  { %vm1992_vm0 = vcmp.ge.f32.partialorder %v3243_v0, 0.0  ;;  %v1996_v4 = vmul.f32 0.2, %v3243_v0  ;;  %v1826_v5 = vpop.f32.mrb[3].mxu0 }
 0x1d0   :  { %vm1993_vm1 = vcmp.ge.f32.partialorder %v3245_v2, 0.0  ;;  %v1997_v8 = vmul.f32 0.2, %v3245_v2 }
 0x1d1   :  { %v2000_v9 = vsel %vm1992_vm0, %v3243_v0, %v1996_v4 }
 0x1d2   :  { %v2001_v10 = vsel %vm1993_vm1, %v3245_v2, %v1997_v8  ;;  %v2004_v14 = vpack.c.bf16 %v2000_v9, %v2000_v9 }
 0x1d3   :  { %v2005_v11 = vpack.c.bf16 %v2001_v10, %v2001_v10 }
 0x1d5   :  { %2436 = vmatprep.mubr.bf16.mxu0 %v2005_v11 }
 0x1d6   :  { %2437 = vmatmul.mubr.bf16.vlgmr.msra.gmra.mrb[4].mxu0 %v2004_v14  ;;  %v3788_v14 = vld [vmem:[%s4184_s5 + $0x78] sm:$0xff]  }
 0x1d7   :  { %2446 = vmatpush1.bf16.msra.mxu0 %v3726_v12  ;;  %v3787_v12 = vld [vmem:[%s4184_s5 + $0x30] sm:$0xff]  }
 0x1d8   :  { %2447 = vmatprep.subr.bf16.mxu0 %v3731_v15  ;;  %3233 = vmatpush3.bf16.msra.mxu1 %v3787_v12  ;;  %v3789_v15 = vld [vmem:[%s4184_s5 + $0x38] sm:$0xff]  }
 0x1d9   :  { %3234 = vmatprep.subr.bf16.mxu1 %v3788_v14 }
 0x1db   :  { %2448 = vmatpush1.bf16.msra.mxu0 %v3729_v22  ;;  %v2709_v22 = vld [vmem:[%s4186_s7 + $0x28] sm:$0xff] }
 0x1dc   :  { %2449 = vmatprep.subr.bf16.mxu0 %v3734_v23  ;;  %3235 = vmatpush3.bf16.msra.mxu1 %v3789_v15  ;;  %v2711_v23 = vld [vmem:[%s4186_s7 + $0x38] sm:$0xff] }
 0x1dd   :  { %2747 = vperm.xlu1 %3285, %v2709_v22  }
 0x1df   :  { %2450 = vmatpush1.bf16.msra.mxu0 %v3732_v26  ;;  %v2717_v26 = vld [vmem:[%s4186_s7 + $0x68] sm:$0xff] }
 0x1e0   :  { %2451 = vmatprep.subr.bf16.mxu0 %v3737_v6  ;;  %v2072_v6 = vld [vmem:[%s4183_s4] sm:$0x3] }
 0x1e1   :  { %2757 = vperm.xlu1 %3285, %v2711_v23   ;;  %v2077_v18 = vrot.slane %v2072_v6, %v338_v57  ;;  %v2081_v27 = vrot.slane %v2072_v6, %v342_v59  ;;  %v2705_v57 = vld [vmem:[%s4186_s7 + $0x8] sm:$0xff]  ;;  %v2708_v59 = vld [vmem:[%s4186_s7 + $0x20] sm:$0xff] }
 0x1e2   :  { %2727 = vperm.xlu0 %3284, %v2705_v57  }
 0x1e3   :  { %2452 = vmatpush1.bf16.msra.mxu0 %v3735_v13 }
 0x1e4   :  { %2453 = vmatprep.subr.bf16.mxu0 %v3740_v28 }
 0x1e5   :  { %2767 = vperm.xlu1 %3285, %v2713_v24  }
 0x1e6   :  { %2742 = vperm.xlu0 %3284, %v2708_v59  }
 0x1e7   :  { %2454 = vmatpush1.bf16.msra.mxu0 %v3738_v7 }
 0x1e8   :  { %2455 = vmatprep.subr.bf16.mxu0 %v3743_v30 }
 0x1e9   :  { %2777 = vperm.xlu1 %3285, %v2715_v25  }
 0x1eb   :  { %2456 = vmatpush1.bf16.msra.mxu0 %v3741_v34 }
 0x1ec   :  { %2457 = vmatprep.subr.bf16.mxu0 %v3746_v51 }
 0x1ed   :  { %2787 = vperm.xlu1 %3285, %v2717_v26  }
 0x1ef   :  { %2458 = vmatpush1.bf16.msra.mxu0 %v3744_v35 }
 0x1f0   :  { %2459 = vmatprep.subr.bf16.mxu0 %v3749_v36  ;;  %v2710_v36 = vld [vmem:[%s4186_s7 + $0x30] sm:$0xff] }
 0x1f1   :  { %2752 = vperm.xlu0 %3284, %v2710_v36  }
 0x1f3   :  { %2460 = vmatpush1.bf16.msra.mxu0 %v3747_v37  ;;  %v2712_v37 = vld [vmem:[%s4186_s7 + $0x40] sm:$0xff] }
 0x1f4   :  { %2461 = vmatprep.subr.bf16.mxu0 %v3752_v38  ;;  %v2714_v38 = vld [vmem:[%s4186_s7 + $0x50] sm:$0xff] }
 0x1f5   :  { %2762 = vperm.xlu0 %3284, %v2712_v37  }
 0x1f7   :  { %2462 = vmatpush1.bf16.msra.mxu0 %v3750_v39  ;;  %v2716_v39 = vld [vmem:[%s4186_s7 + $0x60] sm:$0xff] }
 0x1f8   :  { %2463 = vmatprep.subr.bf16.mxu0 %v3755_v40  ;;  %v2718_v40 = vld [vmem:[%s4186_s7 + $0x70] sm:$0xff] }
 0x1f9   :  { %2772 = vperm.xlu0 %3284, %v2714_v38  }
 0x1fb   :  { %2464 = vmatpush1.bf16.msra.mxu0 %v3753_v41  ;;  %v2719_v41 = vld [vmem:[%s4186_s7 + $0x78] sm:$0xff] }
 0x1fc   :  { %2465 = vmatprep.subr.bf16.mxu0 %v3758_v42 }
 0x1fd   :  { %2782 = vperm.xlu0 %3284, %v2716_v39  }
 0x1ff   :  { %2466 = vmatpush1.bf16.msra.mxu0 %v3756_v43  ;;  %v3203_v43 = vld [vmem:[%s4185_s6] ss:$0 sm:$0xff] }
 0x200   :  { %2467 = vmatprep.subr.bf16.mxu0 %v3761_v44 }
 0x201   :  { %2792 = vperm.xlu0 %3284, %v2718_v40  }
 0x203   :  { %2468 = vmatpush1.bf16.msra.mxu0 %v3759_v45 }
 0x204   :  { %2469 = vmatprep.subr.bf16.mxu0 %v3764_v46 }
 0x205   :  { %2797 = vperm.xlu0 %3284, %v2719_v41  }
 0x207   :  { %2470 = vmatpush1.bf16.msra.mxu0 %v3762_v47 }
 0x208   :  { %2471 = vmatprep.subr.bf16.mxu0 %v3767_v48 }
 0x20b   :  { %2472 = vmatpush1.bf16.msra.mxu0 %v3765_v49 }
 0x20c   :  { %2473 = vmatprep.subr.bf16.mxu0 %v3770_v50 }
 0x20f   :  { %2474 = vmatpush1.bf16.msra.mxu0 %v3768_v52  ;;  %v2733_v52 = vpop.permute.xlu1 %2732 }
 0x210   :  { %2475 = vmatprep.subr.bf16.mxu0 %v3773_v53 }
 0x213   :  { %2476 = vmatpush1.bf16.msra.mxu0 %v3771_v54  ;;  %v2738_v53 = vpop.permute.xlu1 %2737 }
 0x24b   :  { %v1985_v62 = vpop.f32.mrb[4].mxu1 }
 0x24c   :  { %v3246_v63 = vadd.f32 %v1985_v62, %v347_v21  ;;  %v1987_v0 = vpop.f32.mrb[5].mxu1 }
 0x24d   :  { %v3247_v1 = vadd.f32 %v1987_v0, %v351_v61  ;;  %v1989_v2 = vpop.f32.mrb[6].mxu1 }
 0x24e   :  { %vm1994_vm2 = vcmp.ge.f32.partialorder %v3246_v63, 0.0  ;;  %v1998_v3 = vmul.f32 0.2, %v3246_v63  ;;  %v1990_v4 = vpop.f32.mrb[7].mxu1 }
 0x24f   :  { %vm1995_vm3 = vcmp.ge.f32.partialorder %v3247_v1, 0.0  ;;  %v1999_v5 = vmul.f32 0.2, %v3247_v1 }
 0x250   :  { %v2002_v8 = vsel %vm1994_vm2, %v3246_v63, %v1998_v3 }
 0x251   :  { %v2003_v9 = vsel %vm1995_vm3, %v3247_v1, %v1999_v5  ;;  %v2006_v11 = vpack.c.bf16 %v2002_v8, %v2002_v8  ;;  %v2723_v1 = vpop.permute.xlu0 %2722 }
 0x252   :  { %v2007_v10 = vpack.c.bf16 %v2003_v9, %v2003_v9 }
 0x254   :  { %2477 = vmatprep.mubr.bf16.mxu0 %v2007_v10 }
 0x255   :  { %2478 = vmatmul.mubr.bf16.vlgmr.msra.gmra.mrb[4].mxu0 %v2006_v11 }
 0x25c   :  { %v2748_v54 = vpop.permute.xlu1 %2747 }
 0x260   :  { %v2758_v55 = vpop.permute.xlu1 %2757 }
 0x261   :  { %v2728_v4 = vpop.permute.xlu0 %2727 }
 0x264   :  { %v2768_v60 = vpop.permute.xlu1 %2767 }
 0x265   :  { %v2743_v8 = vpop.permute.xlu0 %2742 }
 0x268   :  { %v2778_v21 = vpop.permute.xlu1 %2777 }
 0x26c   :  { %v2788_v61 = vpop.permute.xlu1 %2787 }
 0x270   :  { %v2753_v58 = vpop.permute.xlu0 %2752 }
 0x274   :  { %v2763_v25 = vpop.permute.xlu0 %2762 }
 0x328   :  { %v2479_v13 = vpop.f32.mrb[4].mxu0 }
 0x329   :  { %v3248_v28 = vadd.f32 %v2479_v13, %v2077_v18  ;;  %v2481_v29 = vpop.f32.mrb[5].mxu0 }
 0x32a   :  { %v3249_v19 = vadd.f32 %v2481_v29, %v2081_v27  ;;  %v2483_v7 = vpop.f32.mrb[6].mxu0 }
 0x32b   :  { %vm2486_vm4 = vcmp.ge.f32.partialorder %v3248_v28, 0.0  ;;  %v2488_v30 = vmul.f32 0.2, %v3248_v28  ;;  %v2484_v31 = vpop.f32.mrb[7].mxu0 }
 0x32c   :  { %vm2487_vm5 = vcmp.ge.f32.partialorder %v3249_v19, 0.0  ;;  %v2489_v32 = vmul.f32 0.2, %v3249_v19  ;;  %v2773_v31 = vpop.permute.xlu0 %2772 }
 0x32d   :  { %v2490_v34 = vsel %vm2486_vm4, %v3248_v28, %v2488_v30 }
 0x32e   :  { %v2491_v51 = vsel %vm2487_vm5, %v3249_v19, %v2489_v32  ;;  %v2492_v35 = vpack.c.bf16 %v2490_v34, %v2490_v34 }
 0x32f   :  { %v2493_v33 = vpack.c.bf16 %v2491_v51, %v2491_v51 }
 0x330   :  { %v2783_v38 = vpop.permute.xlu0 %2782 }
 0x331   :  { %2661 = vmatprep.mubr.bf16.mxu1 %v2493_v33 }
 0x332   :  { %2662 = vmatmul.mubr.bf16.vlgmr.msra.gmra.mrb[8].mxu1 %v2492_v35 }
 0x405   :  { %v3236_v42 = vpop.f32.mrb[8].mxu1 }
 0x406   :  { %v3237_v44 = vpop.f32.mrb[9].mxu1 }
 0x407   :  { %v3238_v45 = vadd.f32 %v3237_v44, %v3236_v42  ;;  %v3239_v46 = vpop.f32.mrb[10].mxu1 }
 0x408   :  { %v3240_v47 = vpop.f32.mrb[11].mxu1 }
 0x409   :  { %v2664_v48 = vadd.f32 %v3238_v45, %v3203_v43 }
 0x40b   :  { %vm2669_vm6 = vcmp.ge.f32.partialorder %v2664_v48, 0.0  ;;  %v2670_v49 = vmul.f32 0.2, %v2664_v48 }
 0x40d   :  { %v2671_v50 = vsel %vm2669_vm6, %v2664_v48, %v2670_v49 }
 0x40e   :  { %2672 = vxpose.xlu1.b32.start.end [1/1] (short) %v2671_v50, 128  ;;  %v2793_v50 = vpop.permute.xlu0 %2792 }
 0x48e   :  { %v2688_v62 = vpop.trf.xlu1 }
 0x48f   :  { %v2800_v12 = vmul.f32 %v2723_v1, %v2688_v62 }
 0x491   :  { %v2817_v20 = vsel %vm2816_vm7, %v2800_v12, 0.0  ;;  %v2855_v12 = vstv %s4187_s8 }
 0x492   :  { %v2689_v63 = vpop.trf.xlu1 }
 0x493   :  { %v2801_v11 = vmul.f32 %v2728_v4, %v2689_v63 }
 0x495   :  { %v2818_v16 = vsel %vm2816_vm7, %v2801_v11, 0.0 }
 0x496   :  { %v2690_v0 = vpop.trf.xlu1  ;;  %v2819_v24 = vadd.f32 %v2818_v16, %v2817_v20 }
 0x497   :  { %v2802_v14 = vmul.f32 %v2733_v52, %v2690_v0  ;;  %v2798_v0 = vpop.permute.xlu0 %2797 }
 0x499   :  { %v2820_v22 = vsel %vm2816_vm7, %v2802_v14, 0.0 }
 0x49a   :  { %v2691_v2 = vpop.trf.xlu1  ;;  %v2821_v27 = vadd.f32 %v2820_v22, %v2819_v24 }
 0x49b   :  { %v2803_v17 = vmul.f32 %v2738_v53, %v2691_v2 }
 0x49d   :  { %v2822_v6 = vsel %vm2816_vm7, %v2803_v17, 0.0 }
 0x49e   :  { %v2692_v3 = vpop.trf.xlu1  ;;  %v2823_v29 = vadd.f32 %v2822_v6, %v2821_v27 }
 0x49f   :  { %v2804_v23 = vmul.f32 %v2743_v8, %v2692_v3 }
 0x4a1   :  { %v2824_v13 = vsel %vm2816_vm7, %v2804_v23, 0.0 }
 0x4a2   :  { %v2693_v5 = vpop.trf.xlu1  ;;  %v2825_v32 = vadd.f32 %v2824_v13, %v2823_v29 }
 0x4a3   :  { %v2805_v18 = vmul.f32 %v2748_v54, %v2693_v5 }
 0x4a5   :  { %v2826_v7 = vsel %vm2816_vm7, %v2805_v18, 0.0 }
 0x4a6   :  { %v2694_v9 = vpop.trf.xlu1  ;;  %v2827_v33 = vadd.f32 %v2826_v7, %v2825_v32 }
 0x4a7   :  { %v2806_v28 = vmul.f32 %v2753_v58, %v2694_v9 }
 0x4a9   :  { %v2828_v34 = vsel %vm2816_vm7, %v2806_v28, 0.0 }
 0x4aa   :  { %v2695_v10 = vpop.trf.xlu1  ;;  %v2829_v59 = vadd.f32 %v2828_v34, %v2827_v33 }
 0x4ab   :  { %v2807_v30 = vmul.f32 %v2758_v55, %v2695_v10 }
 0x4ad   :  { %v2830_v56 = vsel %vm2816_vm7, %v2807_v30, 0.0 }
 0x4ae   :  { %v2696_v15 = vpop.trf.xlu1  ;;  %v2831_v39 = vadd.f32 %v2830_v56, %v2829_v59 }
 0x4af   :  { %v2808_v51 = vmul.f32 %v2763_v25, %v2696_v15 }
 0x4b1   :  { %v2832_v36 = vsel %vm2816_vm7, %v2808_v51, 0.0 }
 0x4b2   :  { %v2697_v26 = vpop.trf.xlu1  ;;  %v2833_v43 = vadd.f32 %v2832_v36, %v2831_v39 }
 0x4b3   :  { %v2809_v57 = vmul.f32 %v2768_v60, %v2697_v26 }
 0x4b5   :  { %v2834_v41 = vsel %vm2816_vm7, %v2809_v57, 0.0 }
 0x4b6   :  { %v2698_v19 = vpop.trf.xlu1  ;;  %v2835_v46 = vadd.f32 %v2834_v41, %v2833_v43 }
 0x4b7   :  { %v2810_v37 = vmul.f32 %v2773_v31, %v2698_v19 }
 0x4b9   :  { %v2836_v44 = vsel %vm2816_vm7, %v2810_v37, 0.0 }
 0x4ba   :  { %v2699_v35 = vpop.trf.xlu1  ;;  %v2837_v52 = vadd.f32 %v2836_v44, %v2835_v46 }
 0x4bb   :  { %v2811_v42 = vmul.f32 %v2778_v21, %v2699_v35 }
 0x4bd   :  { %v2838_v48 = vsel %vm2816_vm7, %v2811_v42, 0.0 }
 0x4be   :  { %v2700_v40 = vpop.trf.xlu1  ;;  %v2839_v54 = vadd.f32 %v2838_v48, %v2837_v52 }
 0x4bf   :  { %v2812_v45 = vmul.f32 %v2783_v38, %v2700_v40 }
 0x4c1   :  { %v2840_v53 = vsel %vm2816_vm7, %v2812_v45, 0.0 }
 0x4c2   :  { %v2701_v47 = vpop.trf.xlu1  ;;  %v2841_v63 = vadd.f32 %v2840_v53, %v2839_v54 }
 0x4c3   :  { %v2813_v49 = vmul.f32 %v2788_v61, %v2701_v47 }
 0x4c5   :  { %v2842_v60 = vsel %vm2816_vm7, %v2813_v49, 0.0 }
 0x4c6   :  { %v2702_v55 = vpop.trf.xlu1  ;;  %v2843_v1 = vadd.f32 %v2842_v60, %v2841_v63 }
 0x4c7   :  { %v2814_v62 = vmul.f32 %v2793_v50, %v2702_v55 }
 0x4c9   :  { %v2844_v21 = vsel %vm2816_vm7, %v2814_v62, 0.0 }
 0x4ca   :  { %v2703_v2 = vpop.trf.xlu1  ;;  %v2845_v4 = vadd.f32 %v2844_v21, %v2843_v1 }
 0x4cb   :  { %v2815_v3 = vmul.f32 %v2798_v0, %v2703_v2 }
 0x4cd   :  { %v2846_v5 = vsel %vm2816_vm7, %v2815_v3, 0.0 }
 0x4ce   :  { %v2847_v61 = vadd.f32 %v2846_v5, %v2845_v4 }
 0x4d0   :  { %v2848_v8 = vrot.slane %v2847_v61, 4 }
 0x4d2   :  { %v2849_v9 = vadd.f32 %v2848_v8, %v2847_v61 }
 0x4d4   :  { %v2850_v10 = vrot.slane %v2849_v9, 2 }
 0x4d6   :  { %v2851_v11 = vadd.f32 %v2850_v10, %v2849_v9 }
 0x4d8   :  { %v2852_v58 = vrot.slane %v2851_v11, 1 }
 0x4da   :  { %v2853_v14 = vadd.f32 %v2852_v58, %v2851_v11 }
 0x4dc   :  { %v2856_v15 = vadd.f32 %v2855_v12, %v2853_v14 }
 0x4de   :  { %2858 = vst.msk [vmem:[#allocation9] sm:$0x1] %vm2857_vm8, %v2856_v15 }
 0x4df   :  { %3867 = shalt.err (!%p3864_p0)
}
 0x4e0   :  { %s3868_s24 = scalar_lea.hbm %s4188_s9, 16 }
 0x4e1   :  { %p3869_p1 = scmp.ne.s32.totalorder %s4188_s9, %s3868_s24  ;;  %p3872_p2 = scmp.lt.u32.totalorder %s3868_s24, %s4188_s9 }
 0x4e3   :  { %p3874_p3 = pnand %p3872_p2, %p3869_p1 }
 0x4e5   :  { %3877 = shalt.err (!%p3874_p3)
}
 0x4e6   :  { %2868 = dma.vmem_to_hbm [thread:$0]  %s2866_s20, 16, %s4188_s9, [#allocation5]  }
 0x4e7   :  { %3882 = dma.done.wait [#allocation5], 16  }
 0x4e8   :  { %3883 = vsyncadd [#allocation5], 4294967280 }
 0x4e9   :  { %2872 = vsyncpa [#allocation4], 1 }
 0x4ea   :  { %2873 = vsyncpa [#allocation7], 1 }
 0x4eb   :  { %2874 = vsyncpa [#allocation5], 1 }

</bundles_post_ra>
